<compile_context>
chip_gen: v7x
topology: tpu7x:2x2x1
jax: 0.10.0
libtpu: 0.0.40
codegen_flags: <defaults>
</compile_context>

<pallas_src>
import functools

import jax
import jax.numpy as jnp
from jax import lax
from jax.experimental import pallas as pl
from jax.experimental.pallas import tpu as pltpu


def _round_up(n, m):
    return ((n + m - 1) // m) * m


def _base_block_kernel(x_ref, w1_ref, b1_ref, w2_ref, b2_ref, o_ref,
                       xpad_ref, mid_ref, *, H, W, Cin, Cout):
    """Fused (conv3x3 + bias + ReLU) x 2 for one image.  One grid step == one image.

      x_ref    : (H, W, Cin)            raw input image (no channel padding)
      w1_ref   : (9, Cin, Cout)         conv1 weights, tap t = kh*3 + kw
      b1_ref   : (1, Cout)
      w2_ref   : (9, Cout, Cout)        conv2 weights
      b2_ref   : (1, Cout)
      o_ref    : (H, W, Cout)           output (exact channels, no padding)
      xpad_ref : VMEM (H+2, Wp, Cin)    halo-padded conv1 input  (Wp = ceil8(W+2))
      mid_ref  : VMEM (H+2, Wp, Cout)   halo-padded conv1 output
    """

    def zero_halo(ref, C):
        # Zero only the 1-pixel border; the interior is fully overwritten below.
        wp = ref.shape[1]
        zrow = jnp.zeros((1, wp, C), jnp.float32)
        ref[0:1, :, :] = zrow                       # top halo row
        ref[H + 1:H + 2, :, :] = zrow               # bottom halo row
        zcol = jnp.zeros((H, 1, C), jnp.float32)
        ref[1:H + 1, 0:1, :] = zcol                 # left halo column
        ref[1:H + 1, W + 1:W + 2, :] = zcol         # right halo column

    def conv3x3_bias_relu(src_ref, w_ref, b_ref, C):
        # 9 accumulated K=C matmuls (no im2col concat, no patches buffer).
        # fp32 accumulation; MXU pops accumulate in-place on v7x's MRB.
        n_out = w_ref.shape[-1]
        acc = jnp.zeros((H * W, n_out), jnp.float32)
        for t in range(9):
            kh, kw = divmod(t, 3)
            tap = src_ref[kh:kh + H, kw:kw + W, :].reshape(H * W, C)
            acc = acc + jnp.dot(tap, w_ref[t],
                                preferred_element_type=jnp.float32)
        return jnp.maximum(acc + b_ref[...], 0.0)

    # --- conv1 + ReLU: build the halo-padded input directly in VMEM ----------
    zero_halo(xpad_ref, Cin)
    xpad_ref[1:H + 1, 1:W + 1, :] = x_ref[...]
    a1 = conv3x3_bias_relu(xpad_ref, w1_ref, b1_ref, Cin)        # (H*W, Cout)

    # --- conv2 + ReLU: intermediate never leaves the chip ---------------------
    zero_halo(mid_ref, Cout)
    mid_ref[1:H + 1, 1:W + 1, :] = a1.reshape(H, W, Cout)
    a2 = conv3x3_bias_relu(mid_ref, w2_ref, b2_ref, Cout)        # (H*W, Cout)

    o_ref[...] = a2.reshape(H, W, Cout).astype(o_ref.dtype)


def _base_block_pallas(x_nhwc, w1k, b1r, w2k, b2r, *, H, W, Cin, Cout):
    B = x_nhwc.shape[0]
    Wp = _round_up(W + 2, 8)          # sublane-multiple scratch width
    kernel = functools.partial(_base_block_kernel,
                               H=H, W=W, Cin=Cin, Cout=Cout)
    return pl.pallas_call(
        kernel,
        out_shape=jax.ShapeDtypeStruct((B, H, W, Cout), jnp.float32),
        grid=(B,),
        in_specs=[
            pl.BlockSpec((None, H, W, Cin), lambda b: (b, 0, 0, 0)),
            pl.BlockSpec((9, Cin, Cout), lambda b: (0, 0, 0)),
            pl.BlockSpec((1, Cout), lambda b: (0, 0)),
            pl.BlockSpec((9, Cout, Cout), lambda b: (0, 0, 0)),
            pl.BlockSpec((1, Cout), lambda b: (0, 0)),
        ],
        out_specs=pl.BlockSpec((None, H, W, Cout), lambda b: (b, 0, 0, 0)),
        scratch_shapes=[
            pltpu.VMEM((H + 2, Wp, Cin), jnp.float32),
            pltpu.VMEM((H + 2, Wp, Cout), jnp.float32),
        ],
        compiler_params=pltpu.CompilerParams(
            dimension_semantics=("parallel",)),
    )(x_nhwc, w1k, b1r, w2k, b2r)


def base_block_init(key, in_channels, out_channels, kernel_size=3):
    """PyTorch Conv2d default init: U(-1/sqrt(fan_in), +). Weights kept HWIO."""
    k1, k2, k3, k4 = jax.random.split(key, 4)
    fan1 = in_channels * kernel_size * kernel_size
    fan2 = out_channels * kernel_size * kernel_size
    b1lim = 1.0 / jnp.sqrt(fan1)
    b2lim = 1.0 / jnp.sqrt(fan2)
    w1 = jax.random.uniform(k1, (kernel_size, kernel_size, in_channels, out_channels),
                            jnp.float32, -b1lim, b1lim)
    b1 = jax.random.uniform(k2, (out_channels,), jnp.float32, -b1lim, b1lim)
    w2 = jax.random.uniform(k3, (kernel_size, kernel_size, out_channels, out_channels),
                            jnp.float32, -b2lim, b2lim)
    b2 = jax.random.uniform(k4, (out_channels,), jnp.float32, -b2lim, b2lim)
    return {"w1": w1, "b1": b1, "w2": w2, "b2": b2}


@jax.jit
def base_block_forward(params, x_nchw):
    """BaseBlock.forward: conv1 -> relu -> conv2 -> relu.  NCHW in / NCHW out."""
    w1, b1, w2, b2 = params["w1"], params["b1"], params["w2"], params["b2"]
    ksz, _, Cin, Cout = w1.shape
    assert ksz == 3, "kernel specialized to 3x3, padding=1"
    B, _, H, W = x_nchw.shape

    # NCHW -> NHWC; no channel padding in HBM (halo + widening live in VMEM).
    x = jnp.transpose(x_nchw, (0, 2, 3, 1))

    # Weights as (tap, cin, cout), tap = kh*3 + kw; biases as (1, cout).
    w1k = w1.reshape(9, Cin, Cout)
    w2k = w2.reshape(9, Cout, Cout)
    b1r = b1.reshape(1, Cout)
    b2r = b2.reshape(1, Cout)

    out = _base_block_pallas(x, w1k, b1r, w2k, b2r, H=H, W=W, Cin=Cin, Cout=Cout)
    return jnp.transpose(out, (0, 3, 1, 2))          # NHWC -> NCHW


def _reference_forward(params, x_nchw):
    """Pure-JAX reference (lax conv) for correctness check."""
    x = jnp.transpose(x_nchw, (0, 2, 3, 1))
    dn = lax.conv_dimension_numbers(x.shape, params["w1"].shape,
                                    ("NHWC", "HWIO", "NHWC"))
    x = lax.conv_general_dilated(x, params["w1"], (1, 1), "SAME",
                                 dimension_numbers=dn) + params["b1"]
    x = jnp.maximum(x, 0.0)
    x = lax.conv_general_dilated(x, params["w2"], (1, 1), "SAME",
                                 dimension_numbers=dn) + params["b2"]
    x = jnp.maximum(x, 0.0)
    return jnp.transpose(x, (0, 3, 1, 2))


if __name__ == "__main__":
    key = jax.random.PRNGKey(0)
    kx, kp = jax.random.split(key)

    B, Cin, Cout, H, W = 2, 4, 8, 16, 16
    x = jax.random.normal(kx, (B, Cin, H, W), dtype=jnp.float32)   # NCHW like PyTorch
    params = base_block_init(kp, Cin, Cout)

    out = base_block_forward(params, x)
    out = jax.block_until_ready(out)

    ref = _reference_forward(params, x)
    assert out.shape == (B, Cout, H, W), out.shape
    assert jnp.allclose(out, ref, atol=1e-4, rtol=1e-4), "mismatch vs reference conv"

    print("KERNEL_OK")
</pallas_src>

<mosaic_0001>
module attributes {stable_mosaic.version = 11 : i64} {
  func.func @_base_block_kernel(%arg0: i32, %arg1: memref<1x16x16x4xf32, #tpu.memory_space<vmem>>, %arg2: memref<9x4x8xf32, #tpu.memory_space<vmem>>, %arg3: memref<1x8xf32, #tpu.memory_space<vmem>>, %arg4: memref<9x8x8xf32, #tpu.memory_space<vmem>>, %arg5: memref<1x8xf32, #tpu.memory_space<vmem>>, %arg6: memref<1x16x16x8xf32, #tpu.memory_space<vmem>>, %arg7: memref<18x24x4xf32, #tpu.memory_space<vmem>>, %arg8: memref<18x24x8xf32, #tpu.memory_space<vmem>>) attributes {dimension_semantics = [#tpu.dimension_semantics<parallel>], iteration_bounds = array<i64: 2>, scalar_prefetch = 0 : i64, scratch_operands = 2 : i64, tpu.core_type = #tpu.core_type<tc>, window_params = [{transform_indices = @transform_0, window_bounds = array<i64: 1, 16, 16, 4>}, {pipeline_mode = #tpu.pipeline_mode<synchronous>, transform_indices = @transform_1, window_bounds = array<i64: 9, 4, 8>}, {pipeline_mode = #tpu.pipeline_mode<synchronous>, transform_indices = @transform_2, window_bounds = array<i64: 1, 8>}, {pipeline_mode = #tpu.pipeline_mode<synchronous>, transform_indices = @transform_3, window_bounds = array<i64: 9, 8, 8>}, {pipeline_mode = #tpu.pipeline_mode<synchronous>, transform_indices = @transform_4, window_bounds = array<i64: 1, 8>}, {transform_indices = @transform_5, window_bounds = array<i64: 1, 16, 16, 8>}]} {
    %cst = arith.constant 0.000000e+00 : f32
    %0 = vector.broadcast %cst : f32 to vector<1x24x4xf32>
    %c0 = arith.constant 0 : index
    %c0_0 = arith.constant 0 : index
    %c0_1 = arith.constant 0 : index
    %1 = vector.load %arg7[%c0, %c0_0, %c0_1] : memref<18x24x4xf32, #tpu.memory_space<vmem>>, vector<1x24x4xf32>
    tpu.vector_store %arg7[%c0, %c0_0, %c0_1], %0 {strides = array<i32>} : memref<18x24x4xf32, #tpu.memory_space<vmem>>, vector<1x24x4xf32>,
    %c17 = arith.constant 17 : index
    %c0_2 = arith.constant 0 : index
    %c0_3 = arith.constant 0 : index
    %2 = vector.load %arg7[%c17, %c0_2, %c0_3] : memref<18x24x4xf32, #tpu.memory_space<vmem>>, vector<1x24x4xf32>
    tpu.vector_store %arg7[%c17, %c0_2, %c0_3], %0 {strides = array<i32>} : memref<18x24x4xf32, #tpu.memory_space<vmem>>, vector<1x24x4xf32>,
    %cst_4 = arith.constant 0.000000e+00 : f32
    %3 = vector.broadcast %cst_4 : f32 to vector<16x1x4xf32>
    %c1 = arith.constant 1 : index
    %c0_5 = arith.constant 0 : index
    %c0_6 = arith.constant 0 : index
    %4 = vector.load %arg7[%c1, %c0_5, %c0_6] : memref<18x24x4xf32, #tpu.memory_space<vmem>>, vector<16x1x4xf32>
    tpu.vector_store %arg7[%c1, %c0_5, %c0_6], %3 {strides = array<i32>} : memref<18x24x4xf32, #tpu.memory_space<vmem>>, vector<16x1x4xf32>,
    %c1_7 = arith.constant 1 : index
    %c17_8 = arith.constant 17 : index
    %c0_9 = arith.constant 0 : index
    %5 = vector.load %arg7[%c1_7, %c17_8, %c0_9] : memref<18x24x4xf32, #tpu.memory_space<vmem>>, vector<16x1x4xf32>
    tpu.vector_store %arg7[%c1_7, %c17_8, %c0_9], %3 {strides = array<i32>} : memref<18x24x4xf32, #tpu.memory_space<vmem>>, vector<16x1x4xf32>,
    %c0_10 = arith.constant 0 : index
    %c0_11 = arith.constant 0 : index
    %c0_12 = arith.constant 0 : index
    %c0_13 = arith.constant 0 : index
    %6 = vector.load %arg1[%c0_10, %c0_11, %c0_12, %c0_13] : memref<1x16x16x4xf32, #tpu.memory_space<vmem>>, vector<1x16x16x4xf32>
    %7 = vector.shape_cast %6 : vector<1x16x16x4xf32> to vector<16x16x4xf32>
    %c1_14 = arith.constant 1 : index
    %c1_15 = arith.constant 1 : index
    %c0_16 = arith.constant 0 : index
    %8 = vector.load %arg7[%c1_14, %c1_15, %c0_16] : memref<18x24x4xf32, #tpu.memory_space<vmem>>, vector<16x16x4xf32>
    tpu.vector_store %arg7[%c1_14, %c1_15, %c0_16], %7 {strides = array<i32>} : memref<18x24x4xf32, #tpu.memory_space<vmem>>, vector<16x16x4xf32>,
    %cst_17 = arith.constant 0.000000e+00 : f32
    %9 = vector.broadcast %cst_17 : f32 to vector<256x8xf32>
    %c0_18 = arith.constant 0 : index
    %c0_19 = arith.constant 0 : index
    %c0_20 = arith.constant 0 : index
    %10 = vector.load %arg7[%c0_18, %c0_19, %c0_20] : memref<18x24x4xf32, #tpu.memory_space<vmem>>, vector<16x16x4xf32>
    %11 = vector.shape_cast %10 : vector<16x16x4xf32> to vector<256x4xf32>
    %c0_21 = arith.constant 0 : index
    %c0_22 = arith.constant 0 : index
    %c0_23 = arith.constant 0 : index
    %12 = vector.load %arg2[%c0_21, %c0_22, %c0_23] : memref<9x4x8xf32, #tpu.memory_space<vmem>>, vector<1x4x8xf32>
    %13 = vector.shape_cast %12 : vector<1x4x8xf32> to vector<4x8xf32>
    %cst_24 = arith.constant dense<0.000000e+00> : vector<256x8xf32>
    %14 = tpu.matmul %11, %13, %cst_24 {dimension_numbers = #tpu.dot_dimension_numbers<[1], [0], [0], [1], [0, 0, 1, 1], [], []>} : vector<256x4xf32>, vector<4x8xf32>, vector<256x8xf32> -> vector<256x8xf32>
    %15 = arith.addf %9, %14 : vector<256x8xf32>
    %c0_25 = arith.constant 0 : index
    %c1_26 = arith.constant 1 : index
    %c0_27 = arith.constant 0 : index
    %16 = vector.load %arg7[%c0_25, %c1_26, %c0_27] : memref<18x24x4xf32, #tpu.memory_space<vmem>>, vector<16x16x4xf32>
    %17 = vector.shape_cast %16 : vector<16x16x4xf32> to vector<256x4xf32>
    %c1_28 = arith.constant 1 : index
    %c0_29 = arith.constant 0 : index
    %c0_30 = arith.constant 0 : index
    %18 = vector.load %arg2[%c1_28, %c0_29, %c0_30] : memref<9x4x8xf32, #tpu.memory_space<vmem>>, vector<1x4x8xf32>
    %19 = vector.shape_cast %18 : vector<1x4x8xf32> to vector<4x8xf32>
    %cst_31 = arith.constant dense<0.000000e+00> : vector<256x8xf32>
    %20 = tpu.matmul %17, %19, %cst_31 {dimension_numbers = #tpu.dot_dimension_numbers<[1], [0], [0], [1], [0, 0, 1, 1], [], []>} : vector<256x4xf32>, vector<4x8xf32>, vector<256x8xf32> -> vector<256x8xf32>
    %21 = arith.addf %15, %20 : vector<256x8xf32>
    %c0_32 = arith.constant 0 : index
    %c2 = arith.constant 2 : index
    %c0_33 = arith.constant 0 : index
    %22 = vector.load %arg7[%c0_32, %c2, %c0_33] : memref<18x24x4xf32, #tpu.memory_space<vmem>>, vector<16x16x4xf32>
    %23 = vector.shape_cast %22 : vector<16x16x4xf32> to vector<256x4xf32>
    %c2_34 = arith.constant 2 : index
    %c0_35 = arith.constant 0 : index
    %c0_36 = arith.constant 0 : index
    %24 = vector.load %arg2[%c2_34, %c0_35, %c0_36] : memref<9x4x8xf32, #tpu.memory_space<vmem>>, vector<1x4x8xf32>
    %25 = vector.shape_cast %24 : vector<1x4x8xf32> to vector<4x8xf32>
    %cst_37 = arith.constant dense<0.000000e+00> : vector<256x8xf32>
    %26 = tpu.matmul %23, %25, %cst_37 {dimension_numbers = #tpu.dot_dimension_numbers<[1], [0], [0], [1], [0, 0, 1, 1], [], []>} : vector<256x4xf32>, vector<4x8xf32>, vector<256x8xf32> -> vector<256x8xf32>
    %27 = arith.addf %21, %26 : vector<256x8xf32>
    %c1_38 = arith.constant 1 : index
    %c0_39 = arith.constant 0 : index
    %c0_40 = arith.constant 0 : index
    %28 = vector.load %arg7[%c1_38, %c0_39, %c0_40] : memref<18x24x4xf32, #tpu.memory_space<vmem>>, vector<16x16x4xf32>
    %29 = vector.shape_cast %28 : vector<16x16x4xf32> to vector<256x4xf32>
    %c3 = arith.constant 3 : index
    %c0_41 = arith.constant 0 : index
    %c0_42 = arith.constant 0 : index
    %30 = vector.load %arg2[%c3, %c0_41, %c0_42] : memref<9x4x8xf32, #tpu.memory_space<vmem>>, vector<1x4x8xf32>
    %31 = vector.shape_cast %30 : vector<1x4x8xf32> to vector<4x8xf32>
    %cst_43 = arith.constant dense<0.000000e+00> : vector<256x8xf32>
    %32 = tpu.matmul %29, %31, %cst_43 {dimension_numbers = #tpu.dot_dimension_numbers<[1], [0], [0], [1], [0, 0, 1, 1], [], []>} : vector<256x4xf32>, vector<4x8xf32>, vector<256x8xf32> -> vector<256x8xf32>
    %33 = arith.addf %27, %32 : vector<256x8xf32>
    %c1_44 = arith.constant 1 : index
    %c1_45 = arith.constant 1 : index
    %c0_46 = arith.constant 0 : index
    %34 = vector.load %arg7[%c1_44, %c1_45, %c0_46] : memref<18x24x4xf32, #tpu.memory_space<vmem>>, vector<16x16x4xf32>
    %35 = vector.shape_cast %34 : vector<16x16x4xf32> to vector<256x4xf32>
    %c4 = arith.constant 4 : index
    %c0_47 = arith.constant 0 : index
    %c0_48 = arith.constant 0 : index
    %36 = vector.load %arg2[%c4, %c0_47, %c0_48] : memref<9x4x8xf32, #tpu.memory_space<vmem>>, vector<1x4x8xf32>
    %37 = vector.shape_cast %36 : vector<1x4x8xf32> to vector<4x8xf32>
    %cst_49 = arith.constant dense<0.000000e+00> : vector<256x8xf32>
    %38 = tpu.matmul %35, %37, %cst_49 {dimension_numbers = #tpu.dot_dimension_numbers<[1], [0], [0], [1], [0, 0, 1, 1], [], []>} : vector<256x4xf32>, vector<4x8xf32>, vector<256x8xf32> -> vector<256x8xf32>
    %39 = arith.addf %33, %38 : vector<256x8xf32>
    %c1_50 = arith.constant 1 : index
    %c2_51 = arith.constant 2 : index
    %c0_52 = arith.constant 0 : index
    %40 = vector.load %arg7[%c1_50, %c2_51, %c0_52] : memref<18x24x4xf32, #tpu.memory_space<vmem>>, vector<16x16x4xf32>
    %41 = vector.shape_cast %40 : vector<16x16x4xf32> to vector<256x4xf32>
    %c5 = arith.constant 5 : index
    %c0_53 = arith.constant 0 : index
    %c0_54 = arith.constant 0 : index
    %42 = vector.load %arg2[%c5, %c0_53, %c0_54] : memref<9x4x8xf32, #tpu.memory_space<vmem>>, vector<1x4x8xf32>
    %43 = vector.shape_cast %42 : vector<1x4x8xf32> to vector<4x8xf32>
    %cst_55 = arith.constant dense<0.000000e+00> : vector<256x8xf32>
    %44 = tpu.matmul %41, %43, %cst_55 {dimension_numbers = #tpu.dot_dimension_numbers<[1], [0], [0], [1], [0, 0, 1, 1], [], []>} : vector<256x4xf32>, vector<4x8xf32>, vector<256x8xf32> -> vector<256x8xf32>
    %45 = arith.addf %39, %44 : vector<256x8xf32>
    %c2_56 = arith.constant 2 : index
    %c0_57 = arith.constant 0 : index
    %c0_58 = arith.constant 0 : index
    %46 = vector.load %arg7[%c2_56, %c0_57, %c0_58] : memref<18x24x4xf32, #tpu.memory_space<vmem>>, vector<16x16x4xf32>
    %47 = vector.shape_cast %46 : vector<16x16x4xf32> to vector<256x4xf32>
    %c6 = arith.constant 6 : index
    %c0_59 = arith.constant 0 : index
    %c0_60 = arith.constant 0 : index
    %48 = vector.load %arg2[%c6, %c0_59, %c0_60] : memref<9x4x8xf32, #tpu.memory_space<vmem>>, vector<1x4x8xf32>
    %49 = vector.shape_cast %48 : vector<1x4x8xf32> to vector<4x8xf32>
    %cst_61 = arith.constant dense<0.000000e+00> : vector<256x8xf32>
    %50 = tpu.matmul %47, %49, %cst_61 {dimension_numbers = #tpu.dot_dimension_numbers<[1], [0], [0], [1], [0, 0, 1, 1], [], []>} : vector<256x4xf32>, vector<4x8xf32>, vector<256x8xf32> -> vector<256x8xf32>
    %51 = arith.addf %45, %50 : vector<256x8xf32>
    %c2_62 = arith.constant 2 : index
    %c1_63 = arith.constant 1 : index
    %c0_64 = arith.constant 0 : index
    %52 = vector.load %arg7[%c2_62, %c1_63, %c0_64] : memref<18x24x4xf32, #tpu.memory_space<vmem>>, vector<16x16x4xf32>
    %53 = vector.shape_cast %52 : vector<16x16x4xf32> to vector<256x4xf32>
    %c7 = arith.constant 7 : index
    %c0_65 = arith.constant 0 : index
    %c0_66 = arith.constant 0 : index
    %54 = vector.load %arg2[%c7, %c0_65, %c0_66] : memref<9x4x8xf32, #tpu.memory_space<vmem>>, vector<1x4x8xf32>
    %55 = vector.shape_cast %54 : vector<1x4x8xf32> to vector<4x8xf32>
    %cst_67 = arith.constant dense<0.000000e+00> : vector<256x8xf32>
    %56 = tpu.matmul %53, %55, %cst_67 {dimension_numbers = #tpu.dot_dimension_numbers<[1], [0], [0], [1], [0, 0, 1, 1], [], []>} : vector<256x4xf32>, vector<4x8xf32>, vector<256x8xf32> -> vector<256x8xf32>
    %57 = arith.addf %51, %56 : vector<256x8xf32>
    %c2_68 = arith.constant 2 : index
    %c2_69 = arith.constant 2 : index
    %c0_70 = arith.constant 0 : index
    %58 = vector.load %arg7[%c2_68, %c2_69, %c0_70] : memref<18x24x4xf32, #tpu.memory_space<vmem>>, vector<16x16x4xf32>
    %59 = vector.shape_cast %58 : vector<16x16x4xf32> to vector<256x4xf32>
    %c8 = arith.constant 8 : index
    %c0_71 = arith.constant 0 : index
    %c0_72 = arith.constant 0 : index
    %60 = vector.load %arg2[%c8, %c0_71, %c0_72] : memref<9x4x8xf32, #tpu.memory_space<vmem>>, vector<1x4x8xf32>
    %61 = vector.shape_cast %60 : vector<1x4x8xf32> to vector<4x8xf32>
    %cst_73 = arith.constant dense<0.000000e+00> : vector<256x8xf32>
    %62 = tpu.matmul %59, %61, %cst_73 {dimension_numbers = #tpu.dot_dimension_numbers<[1], [0], [0], [1], [0, 0, 1, 1], [], []>} : vector<256x4xf32>, vector<4x8xf32>, vector<256x8xf32> -> vector<256x8xf32>
    %63 = arith.addf %57, %62 : vector<256x8xf32>
    %c0_74 = arith.constant 0 : index
    %c0_75 = arith.constant 0 : index
    %64 = vector.load %arg3[%c0_74, %c0_75] : memref<1x8xf32, #tpu.memory_space<vmem>>, vector<1x8xf32>
    %65 = vector.broadcast %64 : vector<1x8xf32> to vector<256x8xf32>
    %66 = arith.addf %63, %65 : vector<256x8xf32>
    %cst_76 = arith.constant 0.000000e+00 : f32
    %67 = vector.broadcast %cst_76 : f32 to vector<256x8xf32>
    %68 = arith.maximumf %66, %67 : vector<256x8xf32>
    %cst_77 = arith.constant 0.000000e+00 : f32
    %69 = vector.broadcast %cst_77 : f32 to vector<1x24x8xf32>
    %c0_78 = arith.constant 0 : index
    %c0_79 = arith.constant 0 : index
    %c0_80 = arith.constant 0 : index
    %70 = vector.load %arg8[%c0_78, %c0_79, %c0_80] : memref<18x24x8xf32, #tpu.memory_space<vmem>>, vector<1x24x8xf32>
    tpu.vector_store %arg8[%c0_78, %c0_79, %c0_80], %69 {strides = array<i32>} : memref<18x24x8xf32, #tpu.memory_space<vmem>>, vector<1x24x8xf32>,
    %c17_81 = arith.constant 17 : index
    %c0_82 = arith.constant 0 : index
    %c0_83 = arith.constant 0 : index
    %71 = vector.load %arg8[%c17_81, %c0_82, %c0_83] : memref<18x24x8xf32, #tpu.memory_space<vmem>>, vector<1x24x8xf32>
    tpu.vector_store %arg8[%c17_81, %c0_82, %c0_83], %69 {strides = array<i32>} : memref<18x24x8xf32, #tpu.memory_space<vmem>>, vector<1x24x8xf32>,
    %cst_84 = arith.constant 0.000000e+00 : f32
    %72 = vector.broadcast %cst_84 : f32 to vector<16x1x8xf32>
    %c1_85 = arith.constant 1 : index
    %c0_86 = arith.constant 0 : index
    %c0_87 = arith.constant 0 : index
    %73 = vector.load %arg8[%c1_85, %c0_86, %c0_87] : memref<18x24x8xf32, #tpu.memory_space<vmem>>, vector<16x1x8xf32>
    tpu.vector_store %arg8[%c1_85, %c0_86, %c0_87], %72 {strides = array<i32>} : memref<18x24x8xf32, #tpu.memory_space<vmem>>, vector<16x1x8xf32>,
    %c1_88 = arith.constant 1 : index
    %c17_89 = arith.constant 17 : index
    %c0_90 = arith.constant 0 : index
    %74 = vector.load %arg8[%c1_88, %c17_89, %c0_90] : memref<18x24x8xf32, #tpu.memory_space<vmem>>, vector<16x1x8xf32>
    tpu.vector_store %arg8[%c1_88, %c17_89, %c0_90], %72 {strides = array<i32>} : memref<18x24x8xf32, #tpu.memory_space<vmem>>, vector<16x1x8xf32>,
    %75 = vector.shape_cast %68 : vector<256x8xf32> to vector<16x16x8xf32>
    %c1_91 = arith.constant 1 : index
    %c1_92 = arith.constant 1 : index
    %c0_93 = arith.constant 0 : index
    %76 = vector.load %arg8[%c1_91, %c1_92, %c0_93] : memref<18x24x8xf32, #tpu.memory_space<vmem>>, vector<16x16x8xf32>
    tpu.vector_store %arg8[%c1_91, %c1_92, %c0_93], %75 {strides = array<i32>} : memref<18x24x8xf32, #tpu.memory_space<vmem>>, vector<16x16x8xf32>,
    %cst_94 = arith.constant 0.000000e+00 : f32
    %77 = vector.broadcast %cst_94 : f32 to vector<256x8xf32>
    %c0_95 = arith.constant 0 : index
    %c0_96 = arith.constant 0 : index
    %c0_97 = arith.constant 0 : index
    %78 = vector.load %arg8[%c0_95, %c0_96, %c0_97] : memref<18x24x8xf32, #tpu.memory_space<vmem>>, vector<16x16x8xf32>
    %79 = vector.shape_cast %78 : vector<16x16x8xf32> to vector<256x8xf32>
    %c0_98 = arith.constant 0 : index
    %c0_99 = arith.constant 0 : index
    %c0_100 = arith.constant 0 : index
    %80 = vector.load %arg4[%c0_98, %c0_99, %c0_100] : memref<9x8x8xf32, #tpu.memory_space<vmem>>, vector<1x8x8xf32>
    %81 = vector.shape_cast %80 : vector<1x8x8xf32> to vector<8x8xf32>
    %cst_101 = arith.constant dense<0.000000e+00> : vector<256x8xf32>
    %82 = tpu.matmul %79, %81, %cst_101 {dimension_numbers = #tpu.dot_dimension_numbers<[1], [0], [0], [1], [0, 0, 1, 1], [], []>} : vector<256x8xf32>, vector<8x8xf32>, vector<256x8xf32> -> vector<256x8xf32>
    %83 = arith.addf %77, %82 : vector<256x8xf32>
    %c0_102 = arith.constant 0 : index
    %c1_103 = arith.constant 1 : index
    %c0_104 = arith.constant 0 : index
    %84 = vector.load %arg8[%c0_102, %c1_103, %c0_104] : memref<18x24x8xf32, #tpu.memory_space<vmem>>, vector<16x16x8xf32>
    %85 = vector.shape_cast %84 : vector<16x16x8xf32> to vector<256x8xf32>
    %c1_105 = arith.constant 1 : index
    %c0_106 = arith.constant 0 : index
    %c0_107 = arith.constant 0 : index
    %86 = vector.load %arg4[%c1_105, %c0_106, %c0_107] : memref<9x8x8xf32, #tpu.memory_space<vmem>>, vector<1x8x8xf32>
    %87 = vector.shape_cast %86 : vector<1x8x8xf32> to vector<8x8xf32>
    %cst_108 = arith.constant dense<0.000000e+00> : vector<256x8xf32>
    %88 = tpu.matmul %85, %87, %cst_108 {dimension_numbers = #tpu.dot_dimension_numbers<[1], [0], [0], [1], [0, 0, 1, 1], [], []>} : vector<256x8xf32>, vector<8x8xf32>, vector<256x8xf32> -> vector<256x8xf32>
    %89 = arith.addf %83, %88 : vector<256x8xf32>
    %c0_109 = arith.constant 0 : index
    %c2_110 = arith.constant 2 : index
    %c0_111 = arith.constant 0 : index
    %90 = vector.load %arg8[%c0_109, %c2_110, %c0_111] : memref<18x24x8xf32, #tpu.memory_space<vmem>>, vector<16x16x8xf32>
    %91 = vector.shape_cast %90 : vector<16x16x8xf32> to vector<256x8xf32>
    %c2_112 = arith.constant 2 : index
    %c0_113 = arith.constant 0 : index
    %c0_114 = arith.constant 0 : index
    %92 = vector.load %arg4[%c2_112, %c0_113, %c0_114] : memref<9x8x8xf32, #tpu.memory_space<vmem>>, vector<1x8x8xf32>
    %93 = vector.shape_cast %92 : vector<1x8x8xf32> to vector<8x8xf32>
    %cst_115 = arith.constant dense<0.000000e+00> : vector<256x8xf32>
    %94 = tpu.matmul %91, %93, %cst_115 {dimension_numbers = #tpu.dot_dimension_numbers<[1], [0], [0], [1], [0, 0, 1, 1], [], []>} : vector<256x8xf32>, vector<8x8xf32>, vector<256x8xf32> -> vector<256x8xf32>
    %95 = arith.addf %89, %94 : vector<256x8xf32>
    %c1_116 = arith.constant 1 : index
    %c0_117 = arith.constant 0 : index
    %c0_118 = arith.constant 0 : index
    %96 = vector.load %arg8[%c1_116, %c0_117, %c0_118] : memref<18x24x8xf32, #tpu.memory_space<vmem>>, vector<16x16x8xf32>
    %97 = vector.shape_cast %96 : vector<16x16x8xf32> to vector<256x8xf32>
    %c3_119 = arith.constant 3 : index
    %c0_120 = arith.constant 0 : index
    %c0_121 = arith.constant 0 : index
    %98 = vector.load %arg4[%c3_119, %c0_120, %c0_121] : memref<9x8x8xf32, #tpu.memory_space<vmem>>, vector<1x8x8xf32>
    %99 = vector.shape_cast %98 : vector<1x8x8xf32> to vector<8x8xf32>
    %cst_122 = arith.constant dense<0.000000e+00> : vector<256x8xf32>
    %100 = tpu.matmul %97, %99, %cst_122 {dimension_numbers = #tpu.dot_dimension_numbers<[1], [0], [0], [1], [0, 0, 1, 1], [], []>} : vector<256x8xf32>, vector<8x8xf32>, vector<256x8xf32> -> vector<256x8xf32>
    %101 = arith.addf %95, %100 : vector<256x8xf32>
    %c1_123 = arith.constant 1 : index
    %c1_124 = arith.constant 1 : index
    %c0_125 = arith.constant 0 : index
    %102 = vector.load %arg8[%c1_123, %c1_124, %c0_125] : memref<18x24x8xf32, #tpu.memory_space<vmem>>, vector<16x16x8xf32>
    %103 = vector.shape_cast %102 : vector<16x16x8xf32> to vector<256x8xf32>
    %c4_126 = arith.constant 4 : index
    %c0_127 = arith.constant 0 : index
    %c0_128 = arith.constant 0 : index
    %104 = vector.load %arg4[%c4_126, %c0_127, %c0_128] : memref<9x8x8xf32, #tpu.memory_space<vmem>>, vector<1x8x8xf32>
    %105 = vector.shape_cast %104 : vector<1x8x8xf32> to vector<8x8xf32>
    %cst_129 = arith.constant dense<0.000000e+00> : vector<256x8xf32>
    %106 = tpu.matmul %103, %105, %cst_129 {dimension_numbers = #tpu.dot_dimension_numbers<[1], [0], [0], [1], [0, 0, 1, 1], [], []>} : vector<256x8xf32>, vector<8x8xf32>, vector<256x8xf32> -> vector<256x8xf32>
    %107 = arith.addf %101, %106 : vector<256x8xf32>
    %c1_130 = arith.constant 1 : index
    %c2_131 = arith.constant 2 : index
    %c0_132 = arith.constant 0 : index
    %108 = vector.load %arg8[%c1_130, %c2_131, %c0_132] : memref<18x24x8xf32, #tpu.memory_space<vmem>>, vector<16x16x8xf32>
    %109 = vector.shape_cast %108 : vector<16x16x8xf32> to vector<256x8xf32>
    %c5_133 = arith.constant 5 : index
    %c0_134 = arith.constant 0 : index
    %c0_135 = arith.constant 0 : index
    %110 = vector.load %arg4[%c5_133, %c0_134, %c0_135] : memref<9x8x8xf32, #tpu.memory_space<vmem>>, vector<1x8x8xf32>
    %111 = vector.shape_cast %110 : vector<1x8x8xf32> to vector<8x8xf32>
    %cst_136 = arith.constant dense<0.000000e+00> : vector<256x8xf32>
    %112 = tpu.matmul %109, %111, %cst_136 {dimension_numbers = #tpu.dot_dimension_numbers<[1], [0], [0], [1], [0, 0, 1, 1], [], []>} : vector<256x8xf32>, vector<8x8xf32>, vector<256x8xf32> -> vector<256x8xf32>
    %113 = arith.addf %107, %112 : vector<256x8xf32>
    %c2_137 = arith.constant 2 : index
    %c0_138 = arith.constant 0 : index
    %c0_139 = arith.constant 0 : index
    %114 = vector.load %arg8[%c2_137, %c0_138, %c0_139] : memref<18x24x8xf32, #tpu.memory_space<vmem>>, vector<16x16x8xf32>
    %115 = vector.shape_cast %114 : vector<16x16x8xf32> to vector<256x8xf32>
    %c6_140 = arith.constant 6 : index
    %c0_141 = arith.constant 0 : index
    %c0_142 = arith.constant 0 : index
    %116 = vector.load %arg4[%c6_140, %c0_141, %c0_142] : memref<9x8x8xf32, #tpu.memory_space<vmem>>, vector<1x8x8xf32>
    %117 = vector.shape_cast %116 : vector<1x8x8xf32> to vector<8x8xf32>
    %cst_143 = arith.constant dense<0.000000e+00> : vector<256x8xf32>
    %118 = tpu.matmul %115, %117, %cst_143 {dimension_numbers = #tpu.dot_dimension_numbers<[1], [0], [0], [1], [0, 0, 1, 1], [], []>} : vector<256x8xf32>, vector<8x8xf32>, vector<256x8xf32> -> vector<256x8xf32>
    %119 = arith.addf %113, %118 : vector<256x8xf32>
    %c2_144 = arith.constant 2 : index
    %c1_145 = arith.constant 1 : index
    %c0_146 = arith.constant 0 : index
    %120 = vector.load %arg8[%c2_144, %c1_145, %c0_146] : memref<18x24x8xf32, #tpu.memory_space<vmem>>, vector<16x16x8xf32>
    %121 = vector.shape_cast %120 : vector<16x16x8xf32> to vector<256x8xf32>
    %c7_147 = arith.constant 7 : index
    %c0_148 = arith.constant 0 : index
    %c0_149 = arith.constant 0 : index
    %122 = vector.load %arg4[%c7_147, %c0_148, %c0_149] : memref<9x8x8xf32, #tpu.memory_space<vmem>>, vector<1x8x8xf32>
    %123 = vector.shape_cast %122 : vector<1x8x8xf32> to vector<8x8xf32>
    %cst_150 = arith.constant dense<0.000000e+00> : vector<256x8xf32>
    %124 = tpu.matmul %121, %123, %cst_150 {dimension_numbers = #tpu.dot_dimension_numbers<[1], [0], [0], [1], [0, 0, 1, 1], [], []>} : vector<256x8xf32>, vector<8x8xf32>, vector<256x8xf32> -> vector<256x8xf32>
    %125 = arith.addf %119, %124 : vector<256x8xf32>
    %c2_151 = arith.constant 2 : index
    %c2_152 = arith.constant 2 : index
    %c0_153 = arith.constant 0 : index
    %126 = vector.load %arg8[%c2_151, %c2_152, %c0_153] : memref<18x24x8xf32, #tpu.memory_space<vmem>>, vector<16x16x8xf32>
    %127 = vector.shape_cast %126 : vector<16x16x8xf32> to vector<256x8xf32>
    %c8_154 = arith.constant 8 : index
    %c0_155 = arith.constant 0 : index
    %c0_156 = arith.constant 0 : index
    %128 = vector.load %arg4[%c8_154, %c0_155, %c0_156] : memref<9x8x8xf32, #tpu.memory_space<vmem>>, vector<1x8x8xf32>
    %129 = vector.shape_cast %128 : vector<1x8x8xf32> to vector<8x8xf32>
    %cst_157 = arith.constant dense<0.000000e+00> : vector<256x8xf32>
    %130 = tpu.matmul %127, %129, %cst_157 {dimension_numbers = #tpu.dot_dimension_numbers<[1], [0], [0], [1], [0, 0, 1, 1], [], []>} : vector<256x8xf32>, vector<8x8xf32>, vector<256x8xf32> -> vector<256x8xf32>
    %131 = arith.addf %125, %130 : vector<256x8xf32>
    %c0_158 = arith.constant 0 : index
    %c0_159 = arith.constant 0 : index
    %132 = vector.load %arg5[%c0_158, %c0_159] : memref<1x8xf32, #tpu.memory_space<vmem>>, vector<1x8xf32>
    %133 = vector.broadcast %132 : vector<1x8xf32> to vector<256x8xf32>
    %134 = arith.addf %131, %133 : vector<256x8xf32>
    %cst_160 = arith.constant 0.000000e+00 : f32
    %135 = vector.broadcast %cst_160 : f32 to vector<256x8xf32>
    %136 = arith.maximumf %134, %135 : vector<256x8xf32>
    %137 = vector.shape_cast %136 : vector<256x8xf32> to vector<16x16x8xf32>
    %c0_161 = arith.constant 0 : index
    %c0_162 = arith.constant 0 : index
    %c0_163 = arith.constant 0 : index
    %c0_164 = arith.constant 0 : index
    %138 = vector.load %arg6[%c0_161, %c0_162, %c0_163, %c0_164] : memref<1x16x16x8xf32, #tpu.memory_space<vmem>>, vector<1x16x16x8xf32>
    %139 = vector.shape_cast %138 : vector<1x16x16x8xf32> to vector<16x16x8xf32>
    %140 = vector.shape_cast %137 : vector<16x16x8xf32> to vector<1x16x16x8xf32>
    tpu.vector_store %arg6[%c0_161, %c0_162, %c0_163, %c0_164], %140 {strides = array<i32>} : memref<1x16x16x8xf32, #tpu.memory_space<vmem>>, vector<1x16x16x8xf32>,
    return
  }
  func.func @transform_0(%arg0: i32) -> (i32, i32, i32, i32) {
    %c0_i32 = arith.constant 0 : i32
    %c0_i32_0 = arith.constant 0 : i32
    %c0_i32_1 = arith.constant 0 : i32
    %c0_i32_2 = arith.constant 0 : i32
    return %arg0, %c0_i32, %c0_i32_0, %c0_i32_1 : i32, i32, i32, i32
  }
  func.func @transform_1(%arg0: i32) -> (i32, i32, i32) {
    %c0_i32 = arith.constant 0 : i32
    %c0_i32_0 = arith.constant 0 : i32
    %c0_i32_1 = arith.constant 0 : i32
    %c0_i32_2 = arith.constant 0 : i32
    return %c0_i32, %c0_i32_0, %c0_i32_1 : i32, i32, i32
  }
  func.func @transform_2(%arg0: i32) -> (i32, i32) {
    %c0_i32 = arith.constant 0 : i32
    %c0_i32_0 = arith.constant 0 : i32
    %c0_i32_1 = arith.constant 0 : i32
    return %c0_i32, %c0_i32_0 : i32, i32
  }
  func.func @transform_3(%arg0: i32) -> (i32, i32, i32) {
    %c0_i32 = arith.constant 0 : i32
    %c0_i32_0 = arith.constant 0 : i32
    %c0_i32_1 = arith.constant 0 : i32
    %c0_i32_2 = arith.constant 0 : i32
    return %c0_i32, %c0_i32_0, %c0_i32_1 : i32, i32, i32
  }
  func.func @transform_4(%arg0: i32) -> (i32, i32) {
    %c0_i32 = arith.constant 0 : i32
    %c0_i32_0 = arith.constant 0 : i32
    %c0_i32_1 = arith.constant 0 : i32
    return %c0_i32, %c0_i32_0 : i32, i32
  }
  func.func @transform_5(%arg0: i32) -> (i32, i32, i32, i32) {
    %c0_i32 = arith.constant 0 : i32
    %c0_i32_0 = arith.constant 0 : i32
    %c0_i32_1 = arith.constant 0 : i32
    %c0_i32_2 = arith.constant 0 : i32
    return %arg0, %c0_i32, %c0_i32_0, %c0_i32_1 : i32, i32, i32, i32
  }
}

</mosaic_0001>

<bundles_post_ra>
// kernel: base_block_forward.1
= control target key start
LH: loop header
LB: loop body
LE: loop exit
PB: predicated region body
PF: predicated region fallthrough
CT: control target
= control target key end

     0   :  { %s10170_s18 = smov 0   ;;  %s12158_s0 = inlined_call_operand.vmem [shape: f32[2,16,16,4], index: 0, kind: input, shape index: {}]   ;;  %s12159_s1 = inlined_call_operand.vmem [shape: f32[9,4,8], index: 1, kind: input, shape index: {}]   ;;  %s12160_s2 = inlined_call_operand.vmem [shape: f32[1,8], index: 2, kind: input, shape index: {}]   ;;  %s12161_s3 = inlined_call_operand.vmem [shape: f32[9,8,8], index: 3, kind: input, shape index: {}]   ;;  %s12162_s4 = inlined_call_operand.vmem [shape: f32[1,8], index: 4, kind: input, shape index: {}]   ;;  %s12163_s5 = inlined_call_operand.vmem [shape: f32[2,16,16,8], index: 5, kind: output, shape index: {}]  }
   0x1 LB: > { %s7500_s19 = sadd.s32 4294967295, %s10137_s18   ;;  %p7504_p0 = scmp.ge.s32.totalorder %s10137_s18, 1  ;;  %s10137_s18 = sphi %s10170_s18, %s15_s18  }
   0x2   : > { %p187_p1 = scmp.lt.s32.totalorder %s10137_s18, 3 }
   0x4   : > { %p188_p2 = pnand %p7504_p0, %p187_p1 }
   0x6   : > { %191 = sbr.rel (%p188_p2) target bundleno = 1562 (0x61a), region = 40 }
   0xd   : > { %v7509_v0 = vld [vmem:[%s12159_s1 + $0x4] sm:$0xf]  ;;  %vm494_vm0 = vcmask 1043456   ;;  %vm225_vm1 = vcmask 31744   ;;  %p215_p3 = scmp.lt.s32.totalorder %s7500_s19, 1  ;;  %v12164_v1 = vmov 0.0  }
   0xe   : > { %8710 = vmatprep.subr.msk.mxu0 %vm494_vm0, %v7509_v0  ;;  %226 = vst.msk [vmem:[#allocation2] sm:$0xff] %vm225_vm1, %v12164_v1  ;;  %227 = vst.msk [vmem:[#allocation2 + $0x8] sm:$0xff] %vm225_vm1, %v12164_v1  ;;  %v10197_v2 = vld [vmem:[%s12159_s1] sm:$0xf]  ;;  %vm234_vm2 = vcmask 24576   ;;  %vm3849_vm3 = vcmask 64512  }
   0xf   : > { %228 = vst.msk [vmem:[#allocation2 + $0x10] sm:$0xff] %vm225_vm1, %v12164_v1  ;;  %230 = vst.msk [vmem:[#allocation2 + $0x198] sm:$0xff] %vm225_vm1, %v12164_v1  ;;  %8711 = vmatpush3.msk.msra.mxu0 %vm494_vm0, %v7509_v0  ;;  %s12410_s19 = smov (!%p215_p3, %s7500_s19), 1  ;;  %v10288_v9 = vld [vmem:[%s12159_s1 + $0x8] sm:$0xf]  ;;  %vm3858_vm4 = vcmask 57344  }
  0x10   : > { %231 = vst.msk [vmem:[#allocation2 + $0x1a0] sm:$0xff] %vm225_vm1, %v12164_v1  ;;  %232 = vst.msk [vmem:[#allocation2 + $0x1a8] sm:$0xff] %vm225_vm1, %v12164_v1  ;;  %8760 = vmatprep.subr.msk.mxu0 %vm494_vm0, %v10197_v2  ;;  %s8114_s24 = sshll.u32 %s12410_s19, 8 }
  0x11   : > { %235 = vst.msk [vmem:[#allocation2 + $0x18] sm:$0x1] %vm234_vm2, %v12164_v1  ;;  %236 = vst.msk [vmem:[#allocation2 + $0x30] sm:$0x1] %vm234_vm2, %v12164_v1  ;;  %s10274_s27 = scalar_lea.vmem %s12158_s0, %s8114_s24  ;;  %s12058_s21 = scalar_lea.vmem %s12163_s5, %s8114_s24 }
  0x12   : > { %237 = vst.msk [vmem:[#allocation2 + $0x48] sm:$0x1] %vm234_vm2, %v12164_v1  ;;  %238 = vst.msk [vmem:[#allocation2 + $0x60] sm:$0x1] %vm234_vm2, %v12164_v1  ;;  %v267_v3 = vld [vmem:[%s10274_s27] sm:$0xff]  ;;  %v268_v4 = vld [vmem:[%s10274_s27 + $0x8] sm:$0xff] }
  0x13   : > { %239 = vst.msk [vmem:[#allocation2 + $0x78] sm:$0x1] %vm234_vm2, %v12164_v1  ;;  %240 = vst.msk [vmem:[#allocation2 + $0x90] sm:$0x1] %vm234_vm2, %v12164_v1  ;;  %v269_v5 = vld [vmem:[%s10274_s27 + $0x10] sm:$0xff]  ;;  %v270_v6 = vld [vmem:[%s10274_s27 + $0x18] sm:$0xff] }
  0x14   : > { %241 = vst.msk [vmem:[#allocation2 + $0xa8] sm:$0x1] %vm234_vm2, %v12164_v1  ;;  %242 = vst.msk [vmem:[#allocation2 + $0xc0] sm:$0x1] %vm234_vm2, %v12164_v1  ;;  %v271_v7 = vld [vmem:[%s10274_s27 + $0x20] sm:$0xff]  ;;  %v272_v8 = vld [vmem:[%s10274_s27 + $0x28] sm:$0xff] }
  0x15   : > { %243 = vst.msk [vmem:[#allocation2 + $0xd8] sm:$0x1] %vm234_vm2, %v12164_v1  ;;  %244 = vst.msk [vmem:[#allocation2 + $0xf0] sm:$0x1] %vm234_vm2, %v12164_v1  ;;  %v364_v10 = vld [vmem:[#allocation2 + $0x1] sm:$0xff]  ;;  %v273_v12 = vld [vmem:[%s10274_s27 + $0x30] sm:$0xff] }
  0x16   : > { %245 = vst.msk [vmem:[#allocation2 + $0x108] sm:$0x1] %vm234_vm2, %v12164_v1  ;;  %246 = vst.msk [vmem:[#allocation2 + $0x120] sm:$0x1] %vm234_vm2, %v12164_v1  ;;  %v365_v11 = vld [vmem:[#allocation2 + $0x9] sm:$0xff]  ;;  %8712 = vmatprep.mubr.msk.f32.mxu0 %vm225_vm1, %v364_v10  ;;  %v274_v13 = vld [vmem:[%s10274_s27 + $0x38] sm:$0xff] }
  0x17   : > { %247 = vst.msk [vmem:[#allocation2 + $0x138] sm:$0x1] %vm234_vm2, %v12164_v1  ;;  %248 = vst.msk [vmem:[#allocation2 + $0x150] sm:$0x1] %vm234_vm2, %v12164_v1  ;;  %v275_v14 = vld [vmem:[%s10274_s27 + $0x40] sm:$0xff]  ;;  %v276_v15 = vld [vmem:[%s10274_s27 + $0x48] sm:$0xff]  ;;  %8713 = vmatmul.mubr.msk.f32.vlgmr.msra.gmra.mrb[0].mxu0 %vm225_vm1, %v365_v11 }
  0x18   : > { %249 = vst.msk [vmem:[#allocation2 + $0x168] sm:$0x1] %vm234_vm2, %v12164_v1  ;;  %250 = vst.msk [vmem:[#allocation2 + $0x180] sm:$0x1] %vm234_vm2, %v12164_v1  ;;  %v277_v16 = vld [vmem:[%s10274_s27 + $0x50] sm:$0xff]  ;;  %v278_v17 = vld [vmem:[%s10274_s27 + $0x58] sm:$0xff]  ;;  %8761 = vmatpush3.msk.msra.mxu0 %vm494_vm0, %v10197_v2 }
  0x19   : > { %251 = vst.msk [vmem:[#allocation2 + $0x29] sm:$0x1] %vm234_vm2, %v12164_v1  ;;  %252 = vst.msk [vmem:[#allocation2 + $0x41] sm:$0x1] %vm234_vm2, %v12164_v1  ;;  %v279_v18 = vld [vmem:[%s10274_s27 + $0x60] sm:$0xff]  ;;  %v280_v19 = vld [vmem:[%s10274_s27 + $0x68] sm:$0xff]  ;;  %8810 = vmatprep.subr.msk.mxu0 %vm494_vm0, %v10288_v9 }
  0x1a   : > { %253 = vst.msk [vmem:[#allocation2 + $0x59] sm:$0x1] %vm234_vm2, %v12164_v1  ;;  %254 = vst.msk [vmem:[#allocation2 + $0x71] sm:$0x1] %vm234_vm2, %v12164_v1  ;;  %v281_v20 = vld [vmem:[%s10274_s27 + $0x70] sm:$0xff]  ;;  %v282_v21 = vld [vmem:[%s10274_s27 + $0x78] sm:$0xff] }
  0x1b   : > { %255 = vst.msk [vmem:[#allocation2 + $0x89] sm:$0x1] %vm234_vm2, %v12164_v1  ;;  %256 = vst.msk [vmem:[#allocation2 + $0xa1] sm:$0x1] %vm234_vm2, %v12164_v1  ;;  %v283_v22 = vld [vmem:[%s10274_s27 + $0x80] sm:$0xff]  ;;  %v284_v23 = vld [vmem:[%s10274_s27 + $0x88] sm:$0xff] }
  0x1c   : > { %257 = vst.msk [vmem:[#allocation2 + $0xb9] sm:$0x1] %vm234_vm2, %v12164_v1  ;;  %258 = vst.msk [vmem:[#allocation2 + $0xd1] sm:$0x1] %vm234_vm2, %v12164_v1  ;;  %v285_v24 = vld [vmem:[%s10274_s27 + $0x90] sm:$0xff]  ;;  %v286_v25 = vld [vmem:[%s10274_s27 + $0x98] sm:$0xff] }
  0x1d   : > { %259 = vst.msk [vmem:[#allocation2 + $0xe9] sm:$0x1] %vm234_vm2, %v12164_v1  ;;  %260 = vst.msk [vmem:[#allocation2 + $0x101] sm:$0x1] %vm234_vm2, %v12164_v1  ;;  %v287_v26 = vld [vmem:[%s10274_s27 + $0xa0] sm:$0xff]  ;;  %v288_v27 = vld [vmem:[%s10274_s27 + $0xa8] sm:$0xff] }
  0x1e   : > { %261 = vst.msk [vmem:[#allocation2 + $0x119] sm:$0x1] %vm234_vm2, %v12164_v1  ;;  %262 = vst.msk [vmem:[#allocation2 + $0x131] sm:$0x1] %vm234_vm2, %v12164_v1  ;;  %v289_v31 = vld [vmem:[%s10274_s27 + $0xb0] sm:$0xff]  ;;  %v290_v32 = vld [vmem:[%s10274_s27 + $0xb8] sm:$0xff] }
  0x1f   : > { %263 = vst.msk [vmem:[#allocation2 + $0x149] sm:$0x1] %vm234_vm2, %v12164_v1  ;;  %264 = vst.msk [vmem:[#allocation2 + $0x161] sm:$0x1] %vm234_vm2, %v12164_v1  ;;  %v291_v37 = vld [vmem:[%s10274_s27 + $0xc0] sm:$0xff]  ;;  %v292_v38 = vld [vmem:[%s10274_s27 + $0xc8] sm:$0xff] }
  0x20   : > { %265 = vst.msk [vmem:[#allocation2 + $0x179] sm:$0x1] %vm234_vm2, %v12164_v1  ;;  %266 = vst.msk [vmem:[#allocation2 + $0x191] sm:$0x1] %vm234_vm2, %v12164_v1  ;;  %v293_v39 = vld [vmem:[%s10274_s27 + $0xd0] sm:$0xff]  ;;  %v294_v40 = vld [vmem:[%s10274_s27 + $0xd8] sm:$0xff] }
  0x21   : > { %299 = vst.msk [vmem:[#allocation2 + $0x19] sm:$0xff] %vm225_vm1, %v267_v3  ;;  %300 = vst.msk [vmem:[#allocation2 + $0x21] sm:$0xff] %vm225_vm1, %v268_v4  ;;  %v295_v41 = vld [vmem:[%s10274_s27 + $0xe0] sm:$0xff]  ;;  %v296_v42 = vld [vmem:[%s10274_s27 + $0xe8] sm:$0xff] }
  0x22   : > { %301 = vst.msk [vmem:[#allocation2 + $0x31] sm:$0xff] %vm225_vm1, %v269_v5  ;;  %302 = vst.msk [vmem:[#allocation2 + $0x39] sm:$0xff] %vm225_vm1, %v270_v6  ;;  %v331_v3 = vld [vmem:[#allocation2] sm:$0xff]  ;;  %v332_v4 = vld [vmem:[#allocation2 + $0x8] sm:$0xff] }
  0x23   : > { %303 = vst.msk [vmem:[#allocation2 + $0x49] sm:$0xff] %vm225_vm1, %v271_v7  ;;  %304 = vst.msk [vmem:[#allocation2 + $0x51] sm:$0xff] %vm225_vm1, %v272_v8  ;;  %v10473_v6 = vld [vmem:[%s12159_s1 + $0xc] sm:$0xf] }
  0x24   : > { %305 = vst.msk [vmem:[#allocation2 + $0x61] sm:$0xff] %vm225_vm1, %v273_v12  ;;  %306 = vst.msk [vmem:[#allocation2 + $0x69] sm:$0xff] %vm225_vm1, %v274_v13 }
  0x25   : > { %307 = vst.msk [vmem:[#allocation2 + $0x79] sm:$0xff] %vm225_vm1, %v275_v14  ;;  %308 = vst.msk [vmem:[#allocation2 + $0x81] sm:$0xff] %vm225_vm1, %v276_v15 }
  0x26   : > { %309 = vst.msk [vmem:[#allocation2 + $0x91] sm:$0xff] %vm225_vm1, %v277_v16  ;;  %310 = vst.msk [vmem:[#allocation2 + $0x99] sm:$0xff] %vm225_vm1, %v278_v17 }
  0x27   : > { %311 = vst.msk [vmem:[#allocation2 + $0xa9] sm:$0xff] %vm225_vm1, %v279_v18  ;;  %312 = vst.msk [vmem:[#allocation2 + $0xb1] sm:$0xff] %vm225_vm1, %v280_v19 }
  0x28   : > { %313 = vst.msk [vmem:[#allocation2 + $0xc1] sm:$0xff] %vm225_vm1, %v281_v20  ;;  %314 = vst.msk [vmem:[#allocation2 + $0xc9] sm:$0xff] %vm225_vm1, %v282_v21  ;;  %v10328_v28 = vld [vmem:[#allocation2 + $0x19] sm:$0xff]  ;;  %v10330_v29 = vld [vmem:[#allocation2 + $0x21] sm:$0xff] }
  0x29   : > { %315 = vst.msk [vmem:[#allocation2 + $0xd9] sm:$0xff] %vm225_vm1, %v283_v22  ;;  %316 = vst.msk [vmem:[#allocation2 + $0xe1] sm:$0xff] %vm225_vm1, %v284_v23  ;;  %v10332_v30 = vld [vmem:[#allocation2 + $0x31] sm:$0xff]  ;;  %8715 = vmatprep.mubr.msk.f32.mxu0 %vm225_vm1, %v10328_v28  ;;  %v10345_v33 = vld [vmem:[#allocation2 + $0x39] sm:$0xff] }
  0x2a   : > { %317 = vst.msk [vmem:[#allocation2 + $0xf1] sm:$0xff] %vm225_vm1, %v285_v24  ;;  %318 = vst.msk [vmem:[#allocation2 + $0xf9] sm:$0xff] %vm225_vm1, %v286_v25  ;;  %8716 = vmatmul.mubr.msk.f32.gmra.mrb[2].mxu0 %vm225_vm1, %v10330_v29  ;;  %v10349_v34 = vld [vmem:[#allocation2 + $0x49] sm:$0xff]  ;;  %v10355_v35 = vld [vmem:[#allocation2 + $0x51] sm:$0xff] }
  0x2b   : > { %319 = vst.msk [vmem:[#allocation2 + $0x109] sm:$0xff] %vm225_vm1, %v287_v26  ;;  %320 = vst.msk [vmem:[#allocation2 + $0x111] sm:$0xff] %vm225_vm1, %v288_v27  ;;  %8718 = vmatprep.mubr.msk.f32.mxu0 %vm225_vm1, %v10332_v30  ;;  %v10357_v36 = vld [vmem:[#allocation2 + $0x61] sm:$0xff]  ;;  %v10375_v43 = vld [vmem:[#allocation2 + $0x69] sm:$0xff] }
  0x2c   : > { %321 = vst.msk [vmem:[#allocation2 + $0x121] sm:$0xff] %vm225_vm1, %v289_v31  ;;  %322 = vst.msk [vmem:[#allocation2 + $0x129] sm:$0xff] %vm225_vm1, %v290_v32  ;;  %v10377_v44 = vld [vmem:[#allocation2 + $0x79] sm:$0xff]  ;;  %v10383_v45 = vld [vmem:[#allocation2 + $0x81] sm:$0xff] }
  0x2d   : > { %323 = vst.msk [vmem:[#allocation2 + $0x139] sm:$0xff] %vm225_vm1, %v291_v37  ;;  %324 = vst.msk [vmem:[#allocation2 + $0x141] sm:$0xff] %vm225_vm1, %v292_v38  ;;  %v10385_v46 = vld [vmem:[#allocation2 + $0x91] sm:$0xff]  ;;  %v10391_v47 = vld [vmem:[#allocation2 + $0x99] sm:$0xff] }
  0x2e   : > { %8719 = vmatmul.mubr.msk.f32.gmra.mrb[4].mxu0 %vm225_vm1, %v10345_v33  ;;  %325 = vst.msk [vmem:[#allocation2 + $0x151] sm:$0xff] %vm225_vm1, %v293_v39  ;;  %326 = vst.msk [vmem:[#allocation2 + $0x159] sm:$0xff] %vm225_vm1, %v294_v40  ;;  %v10393_v48 = vld [vmem:[#allocation2 + $0xa9] sm:$0xff]  ;;  %v10399_v49 = vld [vmem:[#allocation2 + $0xb1] sm:$0xff] }
  0x2f   : > { %8721 = vmatprep.mubr.msk.f32.mxu0 %vm225_vm1, %v10349_v34  ;;  %327 = vst.msk [vmem:[#allocation2 + $0x169] sm:$0xff] %vm225_vm1, %v295_v41  ;;  %328 = vst.msk [vmem:[#allocation2 + $0x171] sm:$0xff] %vm225_vm1, %v296_v42  ;;  %v10401_v50 = vld [vmem:[#allocation2 + $0xc1] sm:$0xff]  ;;  %v10407_v51 = vld [vmem:[#allocation2 + $0xc9] sm:$0xff] }
  0x30   : > { %v10409_v52 = vld [vmem:[#allocation2 + $0xd9] sm:$0xff]  ;;  %v10415_v53 = vld [vmem:[#allocation2 + $0xe1] sm:$0xff]  ;;  %v10482_v8 = vld [vmem:[#allocation2 + $0x30] sm:$0xff] }
  0x31   : > { %v10417_v54 = vld [vmem:[#allocation2 + $0xf1] sm:$0xff]  ;;  %v10423_v55 = vld [vmem:[#allocation2 + $0xf9] sm:$0xff]  ;;  %v10492_v11 = vld [vmem:[#allocation2 + $0x48] sm:$0xff] }
  0x32   : > { %8722 = vmatmul.mubr.msk.f32.gmra.mrb[6].mxu0 %vm225_vm1, %v10355_v35  ;;  %v10425_v56 = vld [vmem:[#allocation2 + $0x109] sm:$0xff]  ;;  %v10431_v57 = vld [vmem:[#allocation2 + $0x111] sm:$0xff]  ;;  %v10480_v7 = vld [vmem:[#allocation2 + $0x20] sm:$0xff] }
  0x33   : > { %8724 = vmatprep.mubr.msk.f32.mxu0 %vm225_vm1, %v10357_v36  ;;  %v10433_v58 = vld [vmem:[#allocation2 + $0x121] sm:$0xff]  ;;  %v10439_v59 = vld [vmem:[#allocation2 + $0x129] sm:$0xff]  ;;  %v10468_v5 = vld [vmem:[#allocation2 + $0x18] sm:$0xff] }
  0x34   : > { %v10441_v60 = vld [vmem:[#allocation2 + $0x139] sm:$0xff]  ;;  %v10447_v61 = vld [vmem:[#allocation2 + $0x141] sm:$0xff]  ;;  %v10516_v16 = vld [vmem:[#allocation2 + $0x90] sm:$0xff] }
  0x35   : > { %v10449_v62 = vld [vmem:[#allocation2 + $0x151] sm:$0xff]  ;;  %v10455_v63 = vld [vmem:[#allocation2 + $0x159] sm:$0xff]  ;;  %v10506_v13 = vld [vmem:[#allocation2 + $0x68] sm:$0xff] }
  0x36   : > { %8725 = vmatmul.mubr.msk.f32.gmra.mrb[8].mxu0 %vm225_vm1, %v10375_v43  ;;  %12276 = vst [vmem:[#allocation4_spill] sm:$0xff] %v10455_v63  ;;  %v10457_v0 = vld [vmem:[#allocation2 + $0x169] sm:$0xff]  ;;  %v10463_v2 = vld [vmem:[#allocation2 + $0x171] sm:$0xff]  ;;  %v10500_v12 = vld [vmem:[#allocation2 + $0x60] sm:$0xff] }
  0x37   : > { %8727 = vmatprep.mubr.msk.f32.mxu0 %vm225_vm1, %v10377_v44  ;;  %12277 = vst [vmem:[#allocation5_spill] sm:$0xff] %v10457_v0  ;;  %12278 = vst [vmem:[#allocation6_spill] sm:$0xff] %v10463_v2  ;;  %v10490_v10 = vld [vmem:[#allocation2 + $0x38] sm:$0xff]  ;;  %v10514_v15 = vld [vmem:[#allocation2 + $0x80] sm:$0xff] }
  0x38   : > { %v10508_v14 = vld [vmem:[#allocation2 + $0x78] sm:$0xff]  ;;  %v10524_v18 = vld [vmem:[#allocation2 + $0xa8] sm:$0xff]  ;;  %v10530_v19 = vld [vmem:[#allocation2 + $0xb0] sm:$0xff] }
  0x39   : > { %v10522_v17 = vld [vmem:[#allocation2 + $0x98] sm:$0xff]  ;;  %v10532_v20 = vld [vmem:[#allocation2 + $0xc0] sm:$0xff]  ;;  %v10538_v21 = vld [vmem:[#allocation2 + $0xc8] sm:$0xff] }
  0x3a   : > { %8728 = vmatmul.mubr.msk.f32.gmra.mrb[10].mxu0 %vm225_vm1, %v10383_v45  ;;  %v10540_v22 = vld [vmem:[#allocation2 + $0xd8] sm:$0xff]  ;;  %v10546_v23 = vld [vmem:[#allocation2 + $0xe0] sm:$0xff]  ;;  %v10548_v24 = vld [vmem:[#allocation2 + $0xf0] sm:$0xff] }
  0x3b   : > { %8730 = vmatprep.mubr.msk.f32.mxu0 %vm225_vm1, %v10385_v46  ;;  %v10554_v25 = vld [vmem:[#allocation2 + $0xf8] sm:$0xff]  ;;  %v10556_v26 = vld [vmem:[#allocation2 + $0x108] sm:$0xff]  ;;  %v10562_v27 = vld [vmem:[#allocation2 + $0x110] sm:$0xff] }
  0x3c   : > { %v10564_v31 = vld [vmem:[#allocation2 + $0x120] sm:$0xff]  ;;  %v10570_v32 = vld [vmem:[#allocation2 + $0x128] sm:$0xff]  ;;  %v10572_v37 = vld [vmem:[#allocation2 + $0x138] sm:$0xff] }
  0x3d   : > { %v10578_v38 = vld [vmem:[#allocation2 + $0x140] sm:$0xff]  ;;  %v10580_v39 = vld [vmem:[#allocation2 + $0x150] sm:$0xff]  ;;  %v298_v41 = vld [vmem:[%s10274_s27 + $0xf8] sm:$0xff] }
  0x3e   : > { %8731 = vmatmul.mubr.msk.f32.gmra.mrb[12].mxu0 %vm225_vm1, %v10391_v47  ;;  %v297_v40 = vld [vmem:[%s10274_s27 + $0xf0] sm:$0xff]  ;;  %330 = vst.msk [vmem:[#allocation2 + $0x189] sm:$0xff] %vm225_vm1, %v298_v41  ;;  %v10590_v42 = vld [vmem:[#allocation2 + $0x158] sm:$0xff] }
  0x3f   : > { %8733 = vmatprep.mubr.msk.f32.mxu0 %vm225_vm1, %v10393_v48  ;;  %329 = vst.msk [vmem:[#allocation2 + $0x181] sm:$0xff] %vm225_vm1, %v297_v40  ;;  %v1047_v40 = vld [vmem:[#allocation2 + $0x2] sm:$0xff]  ;;  %v1048_v41 = vld [vmem:[#allocation2 + $0xa] sm:$0xff]  ;;  %v10603_v1 = vld [vmem:[#allocation2 + $0x1a] sm:$0xff] }
  0x40   : > { %12279 = vst [vmem:[#allocation7_spill] sm:$0xff] %v10603_v1 }
  0x42   : > { %8734 = vmatmul.mubr.msk.f32.gmra.mrb[14].mxu0 %vm225_vm1, %v10399_v49 }
  0x43   : > { %8736 = vmatprep.mubr.msk.f32.mxu0 %vm225_vm1, %v10401_v50 }
  0x46   : > { %8737 = vmatmul.mubr.msk.f32.gmra.mrb[16].mxu0 %vm225_vm1, %v10407_v51 }
  0x47   : > { %8739 = vmatprep.mubr.msk.f32.mxu0 %vm225_vm1, %v10409_v52 }
  0x4a   : > { %8740 = vmatmul.mubr.msk.f32.gmra.mrb[18].mxu0 %vm225_vm1, %v10415_v53 }
  0x4b   : > { %8742 = vmatprep.mubr.msk.f32.mxu0 %vm225_vm1, %v10417_v54 }
  0x4e   : > { %8743 = vmatmul.mubr.msk.f32.gmra.mrb[20].mxu0 %vm225_vm1, %v10423_v55 }
  0x4f   : > { %8745 = vmatprep.mubr.msk.f32.mxu0 %vm225_vm1, %v10425_v56 }
  0x52   : > { %8746 = vmatmul.mubr.msk.f32.gmra.mrb[22].mxu0 %vm225_vm1, %v10431_v57 }
  0x53   : > { %8748 = vmatprep.mubr.msk.f32.mxu0 %vm225_vm1, %v10433_v58 }
  0x56   : > { %8749 = vmatmul.mubr.msk.f32.gmra.mrb[24].mxu0 %vm225_vm1, %v10439_v59 }
  0x57   : > { %8751 = vmatprep.mubr.msk.f32.mxu0 %vm225_vm1, %v10441_v60 }
  0x5a   : > { %8752 = vmatmul.mubr.msk.f32.gmra.mrb[26].mxu0 %vm225_vm1, %v10447_v61 }
  0x5b   : > { %8754 = vmatprep.mubr.msk.f32.mxu0 %vm225_vm1, %v10449_v62 }
  0x5e   : > { %8755 = vmatmul.mubr.msk.f32.gmra.mrb[28].mxu0 %vm225_vm1, %v10455_v63  ;;  %v10617_v63 = vld [vmem:[#allocation2 + $0x32] sm:$0xff] }
  0x5f   : > { %8757 = vmatprep.mubr.msk.f32.mxu0 %vm225_vm1, %v10457_v0  ;;  %v10615_v0 = vld [vmem:[#allocation2 + $0x22] sm:$0xff]  ;;  %12281 = vst [vmem:[#allocation9_spill] sm:$0xff] %v10617_v63 }
  0x60   : > { %12280 = vst [vmem:[#allocation8_spill] sm:$0xff] %v10615_v0 }
  0x62   : > { %8758 = vmatmul.mubr.msk.f32.gmra.mrb[30].mxu0 %vm225_vm1, %v10463_v2  ;;  %v10608_v2 = vld [vmem:[%s12159_s1 + $0x10] sm:$0xf] }
  0x63   : > { %8762 = vmatprep.mubr.msk.f32.mxu0 %vm225_vm1, %v331_v3  ;;  %v10592_v3 = vld [vmem:[#allocation2 + $0x168] sm:$0xff] }
  0x66   : > { %8763 = vmatmul.mubr.msk.f32.vlgmr.msra.gmra.mrb[0].mxu0 %vm225_vm1, %v332_v4  ;;  %v10598_v4 = vld [vmem:[#allocation2 + $0x170] sm:$0xff] }
  0x67   : > { %8811 = vmatpush3.msk.msra.mxu0 %vm494_vm0, %v10288_v9  ;;  %8765 = vmatprep.mubr.msk.f32.mxu0 %vm225_vm1, %v10468_v5  ;;  %v10498_v9 = vld [vmem:[#allocation2 + $0x50] sm:$0xff] }
  0x68   : > { %8860 = vmatprep.subr.msk.mxu0 %vm494_vm0, %v10473_v6 }
  0x6a   : > { %8766 = vmatmul.mubr.msk.f32.gmra.mrb[2].mxu0 %vm225_vm1, %v10480_v7 }
  0x6b   : > { %8768 = vmatprep.mubr.msk.f32.mxu0 %vm225_vm1, %v10482_v8 }
  0x6e   : > { %8769 = vmatmul.mubr.msk.f32.gmra.mrb[4].mxu0 %vm225_vm1, %v10490_v10 }
  0x6f   : > { %8771 = vmatprep.mubr.msk.f32.mxu0 %vm225_vm1, %v10492_v11 }
  0x72   : > { %8772 = vmatmul.mubr.msk.f32.gmra.mrb[6].mxu0 %vm225_vm1, %v10498_v9 }
  0x73   : > { %8774 = vmatprep.mubr.msk.f32.mxu0 %vm225_vm1, %v10500_v12 }
  0x76   : > { %8775 = vmatmul.mubr.msk.f32.gmra.mrb[8].mxu0 %vm225_vm1, %v10506_v13 }
  0x77   : > { %8777 = vmatprep.mubr.msk.f32.mxu0 %vm225_vm1, %v10508_v14 }
  0x7a   : > { %8778 = vmatmul.mubr.msk.f32.gmra.mrb[10].mxu0 %vm225_vm1, %v10514_v15 }
  0x7b   : > { %8780 = vmatprep.mubr.msk.f32.mxu0 %vm225_vm1, %v10516_v16 }
  0x7e   : > { %8781 = vmatmul.mubr.msk.f32.gmra.mrb[12].mxu0 %vm225_vm1, %v10522_v17 }
  0x7f   : > { %8783 = vmatprep.mubr.msk.f32.mxu0 %vm225_vm1, %v10524_v18 }
  0x82   : > { %8784 = vmatmul.mubr.msk.f32.gmra.mrb[14].mxu0 %vm225_vm1, %v10530_v19 }
  0x83   : > { %8786 = vmatprep.mubr.msk.f32.mxu0 %vm225_vm1, %v10532_v20 }
  0x86   : > { %8787 = vmatmul.mubr.msk.f32.gmra.mrb[16].mxu0 %vm225_vm1, %v10538_v21 }
  0x87   : > { %8789 = vmatprep.mubr.msk.f32.mxu0 %vm225_vm1, %v10540_v22 }
  0x8a   : > { %8790 = vmatmul.mubr.msk.f32.gmra.mrb[18].mxu0 %vm225_vm1, %v10546_v23 }
  0x8b   : > { %8792 = vmatprep.mubr.msk.f32.mxu0 %vm225_vm1, %v10548_v24 }
  0x8e   : > { %8793 = vmatmul.mubr.msk.f32.gmra.mrb[20].mxu0 %vm225_vm1, %v10554_v25 }
  0x8f   : > { %8795 = vmatprep.mubr.msk.f32.mxu0 %vm225_vm1, %v10556_v26 }
  0x92   : > { %8796 = vmatmul.mubr.msk.f32.gmra.mrb[22].mxu0 %vm225_vm1, %v10562_v27 }
  0x93   : > { %8798 = vmatprep.mubr.msk.f32.mxu0 %vm225_vm1, %v10564_v31 }
  0x96   : > { %8799 = vmatmul.mubr.msk.f32.gmra.mrb[24].mxu0 %vm225_vm1, %v10570_v32 }
  0x97   : > { %8801 = vmatprep.mubr.msk.f32.mxu0 %vm225_vm1, %v10572_v37 }
  0x9a   : > { %8802 = vmatmul.mubr.msk.f32.gmra.mrb[26].mxu0 %vm225_vm1, %v10578_v38 }
  0x9b   : > { %8804 = vmatprep.mubr.msk.f32.mxu0 %vm225_vm1, %v10580_v39 }
  0x9e   : > { %8805 = vmatmul.mubr.msk.f32.gmra.mrb[28].mxu0 %vm225_vm1, %v10590_v42 }
  0x9f   : > { %8807 = vmatprep.mubr.msk.f32.mxu0 %vm225_vm1, %v10592_v3 }
  0xa2   : > { %8808 = vmatmul.mubr.msk.f32.gmra.mrb[30].mxu0 %vm225_vm1, %v10598_v4 }
  0xa3   : > { %8812 = vmatprep.mubr.msk.f32.mxu0 %vm225_vm1, %v1047_v40  ;;  %v10625_v40 = vld [vmem:[#allocation2 + $0x3a] sm:$0xff] }
  0xa4   : > { %12282 = vst [vmem:[#allocation10_spill] sm:$0xff] %v10625_v40 }
  0xa6   : > { %8813 = vmatmul.mubr.msk.f32.vlgmr.msra.gmra.mrb[0].mxu0 %vm225_vm1, %v1048_v41  ;;  %v10627_v41 = vld [vmem:[#allocation2 + $0x4a] sm:$0xff] }
  0xa7   : > { %8861 = vmatpush3.msk.msra.mxu0 %vm494_vm0, %v10473_v6  ;;  %8815 = vmatprep.mubr.msk.f32.mxu0 %vm225_vm1, %v10603_v1  ;;  %12283 = vst [vmem:[#allocation11_spill] sm:$0xff] %v10627_v41  ;;  %v10633_v6 = vld [vmem:[#allocation2 + $0x52] sm:$0xff]  ;;  %v10635_v1 = vld [vmem:[#allocation2 + $0x62] sm:$0xff] }
  0xa8   : > { %8910 = vmatprep.subr.msk.mxu0 %vm494_vm0, %v10608_v2  ;;  %12284 = vst [vmem:[#allocation12_spill] sm:$0xff] %v10633_v6  ;;  %12285 = vst [vmem:[#allocation13_spill] sm:$0xff] %v10635_v1 }
  0xaa   : > { %8816 = vmatmul.mubr.msk.f32.gmra.mrb[2].mxu0 %vm225_vm1, %v10615_v0  ;;  %v10643_v0 = vld [vmem:[#allocation2 + $0x7a] sm:$0xff] }
  0xab   : > { %8818 = vmatprep.mubr.msk.f32.mxu0 %vm225_vm1, %v10617_v63  ;;  %v10641_v63 = vld [vmem:[#allocation2 + $0x6a] sm:$0xff]  ;;  %12287 = vst [vmem:[#allocation15_spill] sm:$0xff] %v10643_v0 }
  0xac   : > { %12286 = vst [vmem:[#allocation14_spill] sm:$0xff] %v10641_v63 }
  0xae   : > { %8819 = vmatmul.mubr.msk.f32.gmra.mrb[4].mxu0 %vm225_vm1, %v10625_v40  ;;  %v10651_v40 = vld [vmem:[#allocation2 + $0x92] sm:$0xff] }
  0xaf   : > { %8821 = vmatprep.mubr.msk.f32.mxu0 %vm225_vm1, %v10627_v41  ;;  %v10649_v41 = vld [vmem:[#allocation2 + $0x82] sm:$0xff]  ;;  %12289 = vst [vmem:[#allocation17_spill] sm:$0xff] %v10651_v40 }
  0xb0   : > { %12288 = vst [vmem:[#allocation16_spill] sm:$0xff] %v10649_v41 }
  0xb2   : > { %8822 = vmatmul.mubr.msk.f32.gmra.mrb[6].mxu0 %vm225_vm1, %v10633_v6  ;;  %v10659_v6 = vld [vmem:[#allocation2 + $0xaa] sm:$0xff] }
  0xb3   : > { %8824 = vmatprep.mubr.msk.f32.mxu0 %vm225_vm1, %v10635_v1  ;;  %v10657_v1 = vld [vmem:[#allocation2 + $0x9a] sm:$0xff]  ;;  %12291 = vst [vmem:[#allocation19_spill] sm:$0xff] %v10659_v6 }
  0xb4   : > { %12290 = vst [vmem:[#allocation18_spill] sm:$0xff] %v10657_v1 }
  0xb6   : > { %8825 = vmatmul.mubr.msk.f32.gmra.mrb[8].mxu0 %vm225_vm1, %v10641_v63  ;;  %v10667_v63 = vld [vmem:[#allocation2 + $0xc2] sm:$0xff] }
  0xb7   : > { %8827 = vmatprep.mubr.msk.f32.mxu0 %vm225_vm1, %v10643_v0  ;;  %v10665_v0 = vld [vmem:[#allocation2 + $0xb2] sm:$0xff]  ;;  %12293 = vst [vmem:[#allocation21_spill] sm:$0xff] %v10667_v63 }
  0xb8   : > { %12292 = vst [vmem:[#allocation20_spill] sm:$0xff] %v10665_v0 }
  0xba   : > { %8828 = vmatmul.mubr.msk.f32.gmra.mrb[10].mxu0 %vm225_vm1, %v10649_v41  ;;  %v10675_v41 = vld [vmem:[#allocation2 + $0xda] sm:$0xff] }
  0xbb   : > { %8830 = vmatprep.mubr.msk.f32.mxu0 %vm225_vm1, %v10651_v40  ;;  %v10673_v40 = vld [vmem:[#allocation2 + $0xca] sm:$0xff]  ;;  %12295 = vst [vmem:[#allocation23_spill] sm:$0xff] %v10675_v41 }
  0xbc   : > { %12294 = vst [vmem:[#allocation22_spill] sm:$0xff] %v10673_v40 }
  0xbe   : > { %8831 = vmatmul.mubr.msk.f32.gmra.mrb[12].mxu0 %vm225_vm1, %v10657_v1  ;;  %v10683_v1 = vld [vmem:[#allocation2 + $0xf2] sm:$0xff] }
  0xbf   : > { %8833 = vmatprep.mubr.msk.f32.mxu0 %vm225_vm1, %v10659_v6  ;;  %v10681_v6 = vld [vmem:[#allocation2 + $0xe2] sm:$0xff]  ;;  %12297 = vst [vmem:[#allocation25_spill] sm:$0xff] %v10683_v1 }
  0xc0   : > { %12296 = vst [vmem:[#allocation24_spill] sm:$0xff] %v10681_v6 }
  0xc2   : > { %8834 = vmatmul.mubr.msk.f32.gmra.mrb[14].mxu0 %vm225_vm1, %v10665_v0  ;;  %v10691_v0 = vld [vmem:[#allocation2 + $0x10a] sm:$0xff] }
  0xc3   : > { %8836 = vmatprep.mubr.msk.f32.mxu0 %vm225_vm1, %v10667_v63  ;;  %v10689_v63 = vld [vmem:[#allocation2 + $0xfa] sm:$0xff]  ;;  %12299 = vst [vmem:[#allocation27_spill] sm:$0xff] %v10691_v0 }
  0xc4   : > { %12298 = vst [vmem:[#allocation26_spill] sm:$0xff] %v10689_v63 }
  0xc6   : > { %8837 = vmatmul.mubr.msk.f32.gmra.mrb[16].mxu0 %vm225_vm1, %v10673_v40  ;;  %v10699_v40 = vld [vmem:[#allocation2 + $0x122] sm:$0xff] }
  0xc7   : > { %8839 = vmatprep.mubr.msk.f32.mxu0 %vm225_vm1, %v10675_v41  ;;  %v10697_v41 = vld [vmem:[#allocation2 + $0x112] sm:$0xff]  ;;  %12301 = vst [vmem:[#allocation29_spill] sm:$0xff] %v10699_v40 }
  0xc8   : > { %12300 = vst [vmem:[#allocation28_spill] sm:$0xff] %v10697_v41 }
  0xca   : > { %8840 = vmatmul.mubr.msk.f32.gmra.mrb[18].mxu0 %vm225_vm1, %v10681_v6  ;;  %v10707_v6 = vld [vmem:[#allocation2 + $0x13a] sm:$0xff] }
  0xcb   : > { %8842 = vmatprep.mubr.msk.f32.mxu0 %vm225_vm1, %v10683_v1  ;;  %v10705_v1 = vld [vmem:[#allocation2 + $0x12a] sm:$0xff]  ;;  %12302 = vst [vmem:[#allocation30_spill] sm:$0xff] %v10707_v6 }
  0xce   : > { %8843 = vmatmul.mubr.msk.f32.gmra.mrb[20].mxu0 %vm225_vm1, %v10689_v63  ;;  %v10715_v63 = vld [vmem:[#allocation2 + $0x152] sm:$0xff] }
  0xcf   : > { %8845 = vmatprep.mubr.msk.f32.mxu0 %vm225_vm1, %v10691_v0  ;;  %v10713_v0 = vld [vmem:[#allocation2 + $0x142] sm:$0xff]  ;;  %12303 = vst [vmem:[#allocation31_spill] sm:$0xff] %v10715_v63 }
  0xd2   : > { %8846 = vmatmul.mubr.msk.f32.gmra.mrb[22].mxu0 %vm225_vm1, %v10697_v41  ;;  %v10723_v41 = vld [vmem:[#allocation2 + $0x16a] sm:$0xff] }
  0xd3   : > { %8848 = vmatprep.mubr.msk.f32.mxu0 %vm225_vm1, %v10699_v40  ;;  %v10721_v40 = vld [vmem:[#allocation2 + $0x15a] sm:$0xff]  ;;  %12304 = vst [vmem:[#allocation32_spill] sm:$0xff] %v10723_v41 }
  0xd6   : > { %8849 = vmatmul.mubr.msk.f32.gmra.mrb[24].mxu0 %vm225_vm1, %v10705_v1 }
  0xd7   : > { %8851 = vmatprep.mubr.msk.f32.mxu0 %vm225_vm1, %v10707_v6  ;;  %v10729_v6 = vld [vmem:[#allocation2 + $0x172] sm:$0xff] }
  0xda   : > { %8852 = vmatmul.mubr.msk.f32.gmra.mrb[26].mxu0 %vm225_vm1, %v10713_v0 }
  0xdb   : > { %8854 = vmatprep.mubr.msk.f32.mxu0 %vm225_vm1, %v10715_v63  ;;  %v7678_v63 = vld [vmem:[%s12159_s1 + $0x14] sm:$0xf] }
  0xde   : > { %8855 = vmatmul.mubr.msk.f32.gmra.mrb[28].mxu0 %vm225_vm1, %v10721_v40 }
  0xdf   : > { %8857 = vmatprep.mubr.msk.f32.mxu0 %vm225_vm1, %v10723_v41 }
  0xe2   : > { %8858 = vmatmul.mubr.msk.f32.gmra.mrb[30].mxu0 %vm225_vm1, %v10729_v6 }
  0xe3   : > { %8862 = vmatprep.mubr.msk.f32.mxu0 %vm225_vm1, %v10468_v5  ;;  %v10803_v5 = vld [vmem:[#allocation2 + $0x188] sm:$0xff] }
  0xe6   : > { %8863 = vmatmul.mubr.msk.f32.vlgmr.msra.gmra.mrb[0].mxu0 %vm225_vm1, %v10480_v7  ;;  %v7712_v7 = vld [vmem:[%s12159_s1 + $0x18] sm:$0xf] }
  0xe7   : > { %8911 = vmatpush3.msk.msra.mxu0 %vm494_vm0, %v10608_v2  ;;  %8865 = vmatprep.mubr.msk.f32.mxu0 %vm225_vm1, %v10482_v8  ;;  %v10797_v2 = vld [vmem:[#allocation2 + $0x180] sm:$0xff] }
  0xe8   : > { %8960 = vmatprep.subr.msk.mxu0 %vm494_vm0, %v7678_v63 }
  0xea   : > { %8866 = vmatmul.mubr.msk.f32.gmra.mrb[2].mxu0 %vm225_vm1, %v10490_v10 }
  0xeb   : > { %8868 = vmatprep.mubr.msk.f32.mxu0 %vm225_vm1, %v10492_v11 }
  0xee   : > { %8869 = vmatmul.mubr.msk.f32.gmra.mrb[4].mxu0 %vm225_vm1, %v10498_v9 }
  0xef   : > { %8871 = vmatprep.mubr.msk.f32.mxu0 %vm225_vm1, %v10500_v12 }
  0xf2   : > { %8872 = vmatmul.mubr.msk.f32.gmra.mrb[6].mxu0 %vm225_vm1, %v10506_v13 }
  0xf3   : > { %8874 = vmatprep.mubr.msk.f32.mxu0 %vm225_vm1, %v10508_v14 }
  0xf6   : > { %8875 = vmatmul.mubr.msk.f32.gmra.mrb[8].mxu0 %vm225_vm1, %v10514_v15 }
  0xf7   : > { %8877 = vmatprep.mubr.msk.f32.mxu0 %vm225_vm1, %v10516_v16 }
  0xfa   : > { %8878 = vmatmul.mubr.msk.f32.gmra.mrb[10].mxu0 %vm225_vm1, %v10522_v17 }
  0xfb   : > { %8880 = vmatprep.mubr.msk.f32.mxu0 %vm225_vm1, %v10524_v18 }
  0xfe   : > { %8881 = vmatmul.mubr.msk.f32.gmra.mrb[12].mxu0 %vm225_vm1, %v10530_v19 }
  0xff   : > { %8883 = vmatprep.mubr.msk.f32.mxu0 %vm225_vm1, %v10532_v20 }
 0x102   : > { %8884 = vmatmul.mubr.msk.f32.gmra.mrb[14].mxu0 %vm225_vm1, %v10538_v21 }
 0x103   : > { %8886 = vmatprep.mubr.msk.f32.mxu0 %vm225_vm1, %v10540_v22 }
 0x106   : > { %8887 = vmatmul.mubr.msk.f32.gmra.mrb[16].mxu0 %vm225_vm1, %v10546_v23 }
 0x107   : > { %8889 = vmatprep.mubr.msk.f32.mxu0 %vm225_vm1, %v10548_v24 }
 0x10a   : > { %8890 = vmatmul.mubr.msk.f32.gmra.mrb[18].mxu0 %vm225_vm1, %v10554_v25 }
 0x10b   : > { %8892 = vmatprep.mubr.msk.f32.mxu0 %vm225_vm1, %v10556_v26 }
 0x10e   : > { %8893 = vmatmul.mubr.msk.f32.gmra.mrb[20].mxu0 %vm225_vm1, %v10562_v27 }
 0x10f   : > { %8895 = vmatprep.mubr.msk.f32.mxu0 %vm225_vm1, %v10564_v31 }
 0x112   : > { %8896 = vmatmul.mubr.msk.f32.gmra.mrb[22].mxu0 %vm225_vm1, %v10570_v32 }
 0x113   : > { %8898 = vmatprep.mubr.msk.f32.mxu0 %vm225_vm1, %v10572_v37 }
 0x116   : > { %8899 = vmatmul.mubr.msk.f32.gmra.mrb[24].mxu0 %vm225_vm1, %v10578_v38 }
 0x117   : > { %8901 = vmatprep.mubr.msk.f32.mxu0 %vm225_vm1, %v10580_v39 }
 0x11a   : > { %8902 = vmatmul.mubr.msk.f32.gmra.mrb[26].mxu0 %vm225_vm1, %v10590_v42 }
 0x11b   : > { %8904 = vmatprep.mubr.msk.f32.mxu0 %vm225_vm1, %v10592_v3 }
 0x11e   : > { %8905 = vmatmul.mubr.msk.f32.gmra.mrb[28].mxu0 %vm225_vm1, %v10598_v4 }
 0x11f   : > { %8907 = vmatprep.mubr.msk.f32.mxu0 %vm225_vm1, %v10797_v2 }
 0x122   : > { %8908 = vmatmul.mubr.msk.f32.gmra.mrb[30].mxu0 %vm225_vm1, %v10803_v5 }
 0x123   : > { %8912 = vmatprep.mubr.msk.f32.mxu0 %vm225_vm1, %v10328_v28  ;;  %v12305_v28 = vld [vmem:[#allocation4_spill] sm:$0xff] }
 0x126   : > { %8913 = vmatmul.mubr.msk.f32.vlgmr.msra.gmra.mrb[0].mxu0 %vm225_vm1, %v10330_v29  ;;  %v12306_v29 = vld [vmem:[#allocation5_spill] sm:$0xff] }
 0x127   : > { %8961 = vmatpush3.msk.msra.mxu0 %vm494_vm0, %v7678_v63  ;;  %8915 = vmatprep.mubr.msk.f32.mxu0 %vm225_vm1, %v10332_v30  ;;  %v10870_v30 = vld [vmem:[#allocation2 + $0x181] sm:$0xff]  ;;  %v12324_v63 = vld [vmem:[#allocation23_spill] sm:$0xff] }
 0x128   : > { %9010 = vmatprep.subr.msk.mxu0 %vm494_vm0, %v7712_v7 }
 0x12a   : > { %8916 = vmatmul.mubr.msk.f32.gmra.mrb[2].mxu0 %vm225_vm1, %v10345_v33  ;;  %v12307_v33 = vld [vmem:[#allocation6_spill] sm:$0xff] }
 0x12b   : > { %8918 = vmatprep.mubr.msk.f32.mxu0 %vm225_vm1, %v10349_v34  ;;  %v10876_v34 = vld [vmem:[#allocation2 + $0x189] sm:$0xff] }
 0x12e   : > { %8919 = vmatmul.mubr.msk.f32.gmra.mrb[4].mxu0 %vm225_vm1, %v10355_v35  ;;  %v12308_v35 = vld [vmem:[#allocation7_spill] sm:$0xff] }
 0x12f   : > { %8921 = vmatprep.mubr.msk.f32.mxu0 %vm225_vm1, %v10357_v36  ;;  %v7746_v36 = vld [vmem:[%s12159_s1 + $0x1c] sm:$0xf] }
 0x132   : > { %8922 = vmatmul.mubr.msk.f32.gmra.mrb[6].mxu0 %vm225_vm1, %v10375_v43  ;;  %v12309_v43 = vld [vmem:[#allocation8_spill] sm:$0xff] }
 0x133   : > { %8924 = vmatprep.mubr.msk.f32.mxu0 %vm225_vm1, %v10377_v44  ;;  %v12310_v44 = vld [vmem:[#allocation9_spill] sm:$0xff] }
 0x136   : > { %8925 = vmatmul.mubr.msk.f32.gmra.mrb[8].mxu0 %vm225_vm1, %v10383_v45  ;;  %v12311_v45 = vld [vmem:[#allocation10_spill] sm:$0xff] }
 0x137   : > { %8927 = vmatprep.mubr.msk.f32.mxu0 %vm225_vm1, %v10385_v46  ;;  %v12312_v46 = vld [vmem:[#allocation11_spill] sm:$0xff] }
 0x13a   : > { %8928 = vmatmul.mubr.msk.f32.gmra.mrb[10].mxu0 %vm225_vm1, %v10391_v47  ;;  %v12313_v47 = vld [vmem:[#allocation12_spill] sm:$0xff] }
 0x13b   : > { %8930 = vmatprep.mubr.msk.f32.mxu0 %vm225_vm1, %v10393_v48  ;;  %v12314_v48 = vld [vmem:[#allocation13_spill] sm:$0xff] }
 0x13e   : > { %8931 = vmatmul.mubr.msk.f32.gmra.mrb[12].mxu0 %vm225_vm1, %v10399_v49  ;;  %v12315_v49 = vld [vmem:[#allocation14_spill] sm:$0xff] }
 0x13f   : > { %8933 = vmatprep.mubr.msk.f32.mxu0 %vm225_vm1, %v10401_v50  ;;  %v12316_v50 = vld [vmem:[#allocation15_spill] sm:$0xff] }
 0x142   : > { %8934 = vmatmul.mubr.msk.f32.gmra.mrb[14].mxu0 %vm225_vm1, %v10407_v51  ;;  %v12317_v51 = vld [vmem:[#allocation16_spill] sm:$0xff] }
 0x143   : > { %8936 = vmatprep.mubr.msk.f32.mxu0 %vm225_vm1, %v10409_v52  ;;  %v12318_v52 = vld [vmem:[#allocation17_spill] sm:$0xff] }
 0x146   : > { %8937 = vmatmul.mubr.msk.f32.gmra.mrb[16].mxu0 %vm225_vm1, %v10415_v53  ;;  %v12319_v53 = vld [vmem:[#allocation18_spill] sm:$0xff] }
 0x147   : > { %8939 = vmatprep.mubr.msk.f32.mxu0 %vm225_vm1, %v10417_v54  ;;  %v12320_v54 = vld [vmem:[#allocation19_spill] sm:$0xff] }
 0x14a   : > { %8940 = vmatmul.mubr.msk.f32.gmra.mrb[18].mxu0 %vm225_vm1, %v10423_v55  ;;  %v12321_v55 = vld [vmem:[#allocation20_spill] sm:$0xff] }
 0x14b   : > { %8942 = vmatprep.mubr.msk.f32.mxu0 %vm225_vm1, %v10425_v56  ;;  %v12322_v56 = vld [vmem:[#allocation21_spill] sm:$0xff] }
 0x14e   : > { %8943 = vmatmul.mubr.msk.f32.gmra.mrb[20].mxu0 %vm225_vm1, %v10431_v57  ;;  %v12323_v57 = vld [vmem:[#allocation22_spill] sm:$0xff] }
 0x14f   : > { %8945 = vmatprep.mubr.msk.f32.mxu0 %vm225_vm1, %v10433_v58 }
 0x152   : > { %8946 = vmatmul.mubr.msk.f32.gmra.mrb[22].mxu0 %vm225_vm1, %v10439_v59 }
 0x153   : > { %8948 = vmatprep.mubr.msk.f32.mxu0 %vm225_vm1, %v10441_v60 }
 0x156   : > { %8949 = vmatmul.mubr.msk.f32.gmra.mrb[24].mxu0 %vm225_vm1, %v10447_v61 }
 0x157   : > { %8951 = vmatprep.mubr.msk.f32.mxu0 %vm225_vm1, %v10449_v62 }
 0x15a   : > { %8952 = vmatmul.mubr.msk.f32.gmra.mrb[26].mxu0 %vm225_vm1, %v12305_v28 }
 0x15b   : > { %8954 = vmatprep.mubr.msk.f32.mxu0 %vm225_vm1, %v12306_v29 }
 0x15e   : > { %8955 = vmatmul.mubr.msk.f32.gmra.mrb[28].mxu0 %vm225_vm1, %v12307_v33 }
 0x15f   : > { %8957 = vmatprep.mubr.msk.f32.mxu0 %vm225_vm1, %v10870_v30 }
 0x162   : > { %8958 = vmatmul.mubr.msk.f32.gmra.mrb[30].mxu0 %vm225_vm1, %v10876_v34 }
 0x163   : > { %8962 = vmatprep.mubr.msk.f32.mxu0 %vm225_vm1, %v12308_v35  ;;  %v12326_v35 = vld [vmem:[#allocation25_spill] sm:$0xff] }
 0x166   : > { %8963 = vmatmul.mubr.msk.f32.vlgmr.msra.gmra.mrb[0].mxu0 %vm225_vm1, %v12309_v43  ;;  %v12327_v43 = vld [vmem:[#allocation26_spill] sm:$0xff] }
 0x167   : > { %9011 = vmatpush3.msk.msra.mxu0 %vm494_vm0, %v7712_v7  ;;  %8965 = vmatprep.mubr.msk.f32.mxu0 %vm225_vm1, %v12310_v44  ;;  %v12325_v7 = vld [vmem:[#allocation24_spill] sm:$0xff] }
 0x168   : > { %9060 = vmatprep.subr.msk.mxu0 %vm494_vm0, %v7746_v36 }
 0x16a   : > { %8966 = vmatmul.mubr.msk.f32.gmra.mrb[2].mxu0 %vm225_vm1, %v12311_v45 }
 0x16b   : > { %8968 = vmatprep.mubr.msk.f32.mxu0 %vm225_vm1, %v12312_v46 }
 0x16e   : > { %8969 = vmatmul.mubr.msk.f32.gmra.mrb[4].mxu0 %vm225_vm1, %v12313_v47 }
 0x16f   : > { %8971 = vmatprep.mubr.msk.f32.mxu0 %vm225_vm1, %v12314_v48 }
 0x172   : > { %8972 = vmatmul.mubr.msk.f32.gmra.mrb[6].mxu0 %vm225_vm1, %v12315_v49 }
 0x173   : > { %8974 = vmatprep.mubr.msk.f32.mxu0 %vm225_vm1, %v12316_v50 }
 0x176   : > { %8975 = vmatmul.mubr.msk.f32.gmra.mrb[8].mxu0 %vm225_vm1, %v12317_v51 }
 0x177   : > { %8977 = vmatprep.mubr.msk.f32.mxu0 %vm225_vm1, %v12318_v52 }
 0x17a   : > { %8978 = vmatmul.mubr.msk.f32.gmra.mrb[10].mxu0 %vm225_vm1, %v12319_v53 }
 0x17b   : > { %8980 = vmatprep.mubr.msk.f32.mxu0 %vm225_vm1, %v12320_v54  ;;  %v12328_v54 = vld [vmem:[#allocation27_spill] sm:$0xff] }
 0x17e   : > { %8981 = vmatmul.mubr.msk.f32.gmra.mrb[12].mxu0 %vm225_vm1, %v12321_v55  ;;  %v12329_v55 = vld [vmem:[#allocation28_spill] sm:$0xff] }
 0x17f   : > { %8983 = vmatprep.mubr.msk.f32.mxu0 %vm225_vm1, %v12322_v56  ;;  %v12330_v56 = vld [vmem:[#allocation29_spill] sm:$0xff] }
 0x182   : > { %8984 = vmatmul.mubr.msk.f32.gmra.mrb[14].mxu0 %vm225_vm1, %v12323_v57 }
 0x183   : > { %8986 = vmatprep.mubr.msk.f32.mxu0 %vm225_vm1, %v12324_v63  ;;  %v12331_v63 = vld [vmem:[#allocation30_spill] sm:$0xff] }
 0x186   : > { %8987 = vmatmul.mubr.msk.f32.gmra.mrb[16].mxu0 %vm225_vm1, %v12325_v7 }
 0x187   : > { %8989 = vmatprep.mubr.msk.f32.mxu0 %vm225_vm1, %v12326_v35  ;;  %v12332_v35 = vld [vmem:[#allocation31_spill] sm:$0xff] }
 0x18a   : > { %8990 = vmatmul.mubr.msk.f32.gmra.mrb[18].mxu0 %vm225_vm1, %v12327_v43 }
 0x18b   : > { %8992 = vmatprep.mubr.msk.f32.mxu0 %vm225_vm1, %v12328_v54 }
 0x18e   : > { %8993 = vmatmul.mubr.msk.f32.gmra.mrb[20].mxu0 %vm225_vm1, %v12329_v55  ;;  %v10943_v55 = vld [vmem:[#allocation2 + $0x182] sm:$0xff] }
 0x18f   : > { %8995 = vmatprep.mubr.msk.f32.mxu0 %vm225_vm1, %v12330_v56 }
 0x192   : > { %8996 = vmatmul.mubr.msk.f32.gmra.mrb[22].mxu0 %vm225_vm1, %v10705_v1 }
 0x193   : > { %8998 = vmatprep.mubr.msk.f32.mxu0 %vm225_vm1, %v12331_v63  ;;  %v10949_v63 = vld [vmem:[#allocation2 + $0x18a] sm:$0xff] }
 0x196   : > { %8999 = vmatmul.mubr.msk.f32.gmra.mrb[24].mxu0 %vm225_vm1, %v10713_v0 }
 0x197   : > { %9001 = vmatprep.mubr.msk.f32.mxu0 %vm225_vm1, %v12332_v35 }
 0x19a   : > { %9002 = vmatmul.mubr.msk.f32.gmra.mrb[26].mxu0 %vm225_vm1, %v10721_v40 }
 0x19b   : > { %9004 = vmatprep.mubr.msk.f32.mxu0 %vm225_vm1, %v10723_v41  ;;  %v7780_v41 = vld [vmem:[%s12159_s1 + $0x20] sm:$0xf] }
 0x19e   : > { %9005 = vmatmul.mubr.msk.f32.gmra.mrb[28].mxu0 %vm225_vm1, %v10729_v6 }
 0x19f   : > { %9007 = vmatprep.mubr.msk.f32.mxu0 %vm225_vm1, %v10943_v55 }
 0x1a2   : > { %9008 = vmatmul.mubr.msk.f32.gmra.mrb[30].mxu0 %vm225_vm1, %v10949_v63 }
 0x1a3   : > { %9012 = vmatprep.mubr.msk.f32.mxu0 %vm225_vm1, %v10482_v8  ;;  %v2638_v8 = vld [vmem:[#allocation2 + $0x198] sm:$0xff] }
 0x1a6   : > { %9013 = vmatmul.mubr.msk.f32.vlgmr.msra.gmra.mrb[0].mxu0 %vm225_vm1, %v10490_v10  ;;  %v2639_v10 = vld [vmem:[#allocation2 + $0x1a0] sm:$0xff] }
 0x1a7   : > { %9061 = vmatpush3.msk.msra.mxu0 %vm494_vm0, %v7746_v36  ;;  %9015 = vmatprep.mubr.msk.f32.mxu0 %vm225_vm1, %v10492_v11  ;;  %v2998_v11 = vld [vmem:[#allocation2 + $0x31] sm:$0xff] }
 0x1a8   : > { %9110 = vmatprep.subr.msk.mxu0 %vm494_vm0, %v7780_v41 }
 0x1aa   : > { %9016 = vmatmul.mubr.msk.f32.gmra.mrb[2].mxu0 %vm225_vm1, %v10498_v9  ;;  %v2999_v9 = vld [vmem:[#allocation2 + $0x39] sm:$0xff] }
 0x1ab   : > { %9018 = vmatprep.mubr.msk.f32.mxu0 %vm225_vm1, %v10500_v12  ;;  %v3000_v12 = vld [vmem:[#allocation2 + $0x49] sm:$0xff] }
 0x1ae   : > { %9019 = vmatmul.mubr.msk.f32.gmra.mrb[4].mxu0 %vm225_vm1, %v10506_v13  ;;  %v3001_v13 = vld [vmem:[#allocation2 + $0x51] sm:$0xff] }
 0x1af   : > { %9021 = vmatprep.mubr.msk.f32.mxu0 %vm225_vm1, %v10508_v14  ;;  %v3002_v14 = vld [vmem:[#allocation2 + $0x61] sm:$0xff] }
 0x1b2   : > { %9022 = vmatmul.mubr.msk.f32.gmra.mrb[6].mxu0 %vm225_vm1, %v10514_v15  ;;  %v3003_v15 = vld [vmem:[#allocation2 + $0x69] sm:$0xff] }
 0x1b3   : > { %9024 = vmatprep.mubr.msk.f32.mxu0 %vm225_vm1, %v10516_v16  ;;  %v3004_v16 = vld [vmem:[#allocation2 + $0x79] sm:$0xff] }
 0x1b6   : > { %9025 = vmatmul.mubr.msk.f32.gmra.mrb[8].mxu0 %vm225_vm1, %v10522_v17  ;;  %v3005_v17 = vld [vmem:[#allocation2 + $0x81] sm:$0xff] }
 0x1b7   : > { %9027 = vmatprep.mubr.msk.f32.mxu0 %vm225_vm1, %v10524_v18  ;;  %v3006_v18 = vld [vmem:[#allocation2 + $0x91] sm:$0xff] }
 0x1ba   : > { %9028 = vmatmul.mubr.msk.f32.gmra.mrb[10].mxu0 %vm225_vm1, %v10530_v19  ;;  %v3007_v19 = vld [vmem:[#allocation2 + $0x99] sm:$0xff] }
 0x1bb   : > { %9030 = vmatprep.mubr.msk.f32.mxu0 %vm225_vm1, %v10532_v20  ;;  %v3008_v20 = vld [vmem:[#allocation2 + $0xa9] sm:$0xff] }
 0x1be   : > { %9031 = vmatmul.mubr.msk.f32.gmra.mrb[12].mxu0 %vm225_vm1, %v10538_v21  ;;  %v3009_v21 = vld [vmem:[#allocation2 + $0xb1] sm:$0xff] }
 0x1bf   : > { %9033 = vmatprep.mubr.msk.f32.mxu0 %vm225_vm1, %v10540_v22  ;;  %v3010_v22 = vld [vmem:[#allocation2 + $0xc1] sm:$0xff] }
 0x1c2   : > { %9034 = vmatmul.mubr.msk.f32.gmra.mrb[14].mxu0 %vm225_vm1, %v10546_v23  ;;  %v3011_v23 = vld [vmem:[#allocation2 + $0xc9] sm:$0xff] }
 0x1c3   : > { %9036 = vmatprep.mubr.msk.f32.mxu0 %vm225_vm1, %v10548_v24  ;;  %v3012_v24 = vld [vmem:[#allocation2 + $0xd9] sm:$0xff] }
 0x1c6   : > { %9037 = vmatmul.mubr.msk.f32.gmra.mrb[16].mxu0 %vm225_vm1, %v10554_v25  ;;  %v3013_v25 = vld [vmem:[#allocation2 + $0xe1] sm:$0xff] }
 0x1c7   : > { %9039 = vmatprep.mubr.msk.f32.mxu0 %vm225_vm1, %v10556_v26  ;;  %v3014_v26 = vld [vmem:[#allocation2 + $0xf1] sm:$0xff] }
 0x1ca   : > { %9040 = vmatmul.mubr.msk.f32.gmra.mrb[18].mxu0 %vm225_vm1, %v10562_v27  ;;  %v3015_v27 = vld [vmem:[#allocation2 + $0xf9] sm:$0xff] }
 0x1cb   : > { %9042 = vmatprep.mubr.msk.f32.mxu0 %vm225_vm1, %v10564_v31  ;;  %v3016_v31 = vld [vmem:[#allocation2 + $0x109] sm:$0xff] }
 0x1ce   : > { %9043 = vmatmul.mubr.msk.f32.gmra.mrb[20].mxu0 %vm225_vm1, %v10570_v32  ;;  %v3017_v32 = vld [vmem:[#allocation2 + $0x111] sm:$0xff] }
 0x1cf   : > { %9045 = vmatprep.mubr.msk.f32.mxu0 %vm225_vm1, %v10572_v37  ;;  %v12336_v37 = vld [vmem:[#allocation23_spill] sm:$0xff] }
 0x1d2   : > { %9046 = vmatmul.mubr.msk.f32.gmra.mrb[22].mxu0 %vm225_vm1, %v10578_v38  ;;  %v12337_v38 = vld [vmem:[#allocation25_spill] sm:$0xff] }
 0x1d3   : > { %9048 = vmatprep.mubr.msk.f32.mxu0 %vm225_vm1, %v10580_v39  ;;  %v12338_v39 = vld [vmem:[#allocation28_spill] sm:$0xff] }
 0x1d6   : > { %9049 = vmatmul.mubr.msk.f32.gmra.mrb[24].mxu0 %vm225_vm1, %v10590_v42  ;;  %v12339_v42 = vld [vmem:[#allocation30_spill] sm:$0xff] }
 0x1d7   : > { %9051 = vmatprep.mubr.msk.f32.mxu0 %vm225_vm1, %v10592_v3  ;;  %v12340_v3 = vld [vmem:[#allocation32_spill] sm:$0xff] }
 0x1da   : > { %9052 = vmatmul.mubr.msk.f32.gmra.mrb[26].mxu0 %vm225_vm1, %v10598_v4  ;;  %v12341_v4 = vmov 0.0  }
 0x1db   : > { %9054 = vmatprep.mubr.msk.f32.mxu0 %vm225_vm1, %v10797_v2  ;;  %3850 = vst.msk [vmem:[#allocation3] sm:$0xff] %vm3849_vm3, %v12341_v4  ;;  %3851 = vst.msk [vmem:[#allocation3 + $0x8] sm:$0xff] %vm3849_vm3, %v12341_v4  ;;  %v3955_v2 = vld [vmem:[%s12161_s3] sm:$0xff] }
 0x1dc   : > { %3852 = vst.msk [vmem:[#allocation3 + $0x10] sm:$0xff] %vm3849_vm3, %v12341_v4  ;;  %3854 = vst.msk [vmem:[#allocation3 + $0x198] sm:$0xff] %vm3849_vm3, %v12341_v4 }
 0x1dd   : > { %3855 = vst.msk [vmem:[#allocation3 + $0x1a0] sm:$0xff] %vm3849_vm3, %v12341_v4  ;;  %3856 = vst.msk [vmem:[#allocation3 + $0x1a8] sm:$0xff] %vm3849_vm3, %v12341_v4 }
 0x1de   : > { %9055 = vmatmul.mubr.msk.f32.gmra.mrb[28].mxu0 %vm225_vm1, %v10803_v5  ;;  %3859 = vst.msk [vmem:[#allocation3 + $0x18] sm:$0x1] %vm3858_vm4, %v12341_v4  ;;  %3860 = vst.msk [vmem:[#allocation3 + $0x30] sm:$0x1] %vm3858_vm4, %v12341_v4  ;;  %v11212_v5 = vld [vmem:[%s12161_s3 + $0x10] sm:$0xff] }
 0x1df   : > { %9057 = vmatprep.mubr.msk.f32.mxu0 %vm225_vm1, %v2638_v8  ;;  %3861 = vst.msk [vmem:[#allocation3 + $0x48] sm:$0x1] %vm3858_vm4, %v12341_v4  ;;  %3862 = vst.msk [vmem:[#allocation3 + $0x60] sm:$0x1] %vm3858_vm4, %v12341_v4 }
 0x1e0   : > { %3863 = vst.msk [vmem:[#allocation3 + $0x78] sm:$0x1] %vm3858_vm4, %v12341_v4  ;;  %3864 = vst.msk [vmem:[#allocation3 + $0x90] sm:$0x1] %vm3858_vm4, %v12341_v4 }
 0x1e1   : > { %3865 = vst.msk [vmem:[#allocation3 + $0xa8] sm:$0x1] %vm3858_vm4, %v12341_v4  ;;  %3866 = vst.msk [vmem:[#allocation3 + $0xc0] sm:$0x1] %vm3858_vm4, %v12341_v4 }
 0x1e2   : > { %9058 = vmatmul.mubr.msk.f32.gmra.mrb[30].mxu0 %vm225_vm1, %v2639_v10  ;;  %3867 = vst.msk [vmem:[#allocation3 + $0xd8] sm:$0x1] %vm3858_vm4, %v12341_v4  ;;  %3868 = vst.msk [vmem:[#allocation3 + $0xf0] sm:$0x1] %vm3858_vm4, %v12341_v4 }
 0x1e3   : > { %9062 = vmatprep.mubr.msk.f32.mxu0 %vm225_vm1, %v2998_v11  ;;  %3869 = vst.msk [vmem:[#allocation3 + $0x108] sm:$0x1] %vm3858_vm4, %v12341_v4  ;;  %3870 = vst.msk [vmem:[#allocation3 + $0x120] sm:$0x1] %vm3858_vm4, %v12341_v4 }
 0x1e4   : > { %3871 = vst.msk [vmem:[#allocation3 + $0x138] sm:$0x1] %vm3858_vm4, %v12341_v4  ;;  %3872 = vst.msk [vmem:[#allocation3 + $0x150] sm:$0x1] %vm3858_vm4, %v12341_v4 }
 0x1e5   : > { %3873 = vst.msk [vmem:[#allocation3 + $0x168] sm:$0x1] %vm3858_vm4, %v12341_v4  ;;  %3874 = vst.msk [vmem:[#allocation3 + $0x180] sm:$0x1] %vm3858_vm4, %v12341_v4 }
 0x1e6   : > { %9063 = vmatmul.mubr.msk.f32.vlgmr.msra.gmra.mrb[0].mxu0 %vm225_vm1, %v2999_v9  ;;  %3875 = vst.msk [vmem:[#allocation3 + $0x29] sm:$0x1] %vm3858_vm4, %v12341_v4  ;;  %3876 = vst.msk [vmem:[#allocation3 + $0x41] sm:$0x1] %vm3858_vm4, %v12341_v4 }
 0x1e7   : > { %9111 = vmatpush3.msk.msra.mxu0 %vm494_vm0, %v7780_v41  ;;  %9065 = vmatprep.mubr.msk.f32.mxu0 %vm225_vm1, %v3000_v12  ;;  %3877 = vst.msk [vmem:[#allocation3 + $0x59] sm:$0x1] %vm3858_vm4, %v12341_v4  ;;  %3878 = vst.msk [vmem:[#allocation3 + $0x71] sm:$0x1] %vm3858_vm4, %v12341_v4  ;;  %v3956_v41 = vld [vmem:[#allocation3 + $0x1] sm:$0xff] }
 0x1e8   : > { %3879 = vst.msk [vmem:[#allocation3 + $0x89] sm:$0x1] %vm3858_vm4, %v12341_v4  ;;  %3880 = vst.msk [vmem:[#allocation3 + $0xa1] sm:$0x1] %vm3858_vm4, %v12341_v4  ;;  %9162 = vmatprep.mubr.msk.f32.mxu1 %vm3849_vm3, %v3956_v41 }
 0x1e9   : > { %3881 = vst.msk [vmem:[#allocation3 + $0xb9] sm:$0x1] %vm3858_vm4, %v12341_v4  ;;  %3882 = vst.msk [vmem:[#allocation3 + $0xd1] sm:$0x1] %vm3858_vm4, %v12341_v4 }
 0x1ea   : > { %9066 = vmatmul.mubr.msk.f32.gmra.mrb[2].mxu0 %vm225_vm1, %v3001_v13  ;;  %3883 = vst.msk [vmem:[#allocation3 + $0xe9] sm:$0x1] %vm3858_vm4, %v12341_v4  ;;  %3884 = vst.msk [vmem:[#allocation3 + $0x101] sm:$0x1] %vm3858_vm4, %v12341_v4 }
 0x1eb   : > { %9068 = vmatprep.mubr.msk.f32.mxu0 %vm225_vm1, %v3002_v14  ;;  %3885 = vst.msk [vmem:[#allocation3 + $0x119] sm:$0x1] %vm3858_vm4, %v12341_v4  ;;  %3886 = vst.msk [vmem:[#allocation3 + $0x131] sm:$0x1] %vm3858_vm4, %v12341_v4 }
 0x1ec   : > { %3887 = vst.msk [vmem:[#allocation3 + $0x149] sm:$0x1] %vm3858_vm4, %v12341_v4  ;;  %3888 = vst.msk [vmem:[#allocation3 + $0x161] sm:$0x1] %vm3858_vm4, %v12341_v4 }
 0x1ed   : > { %3889 = vst.msk [vmem:[#allocation3 + $0x179] sm:$0x1] %vm3858_vm4, %v12341_v4  ;;  %3890 = vst.msk [vmem:[#allocation3 + $0x191] sm:$0x1] %vm3858_vm4, %v12341_v4 }
 0x1ee   : > { %9069 = vmatmul.mubr.msk.f32.gmra.mrb[4].mxu0 %vm225_vm1, %v3003_v15 }
 0x1ef   : > { %9071 = vmatprep.mubr.msk.f32.mxu0 %vm225_vm1, %v3004_v16 }
 0x1f2   : > { %9072 = vmatmul.mubr.msk.f32.gmra.mrb[6].mxu0 %vm225_vm1, %v3005_v17 }
 0x1f3   : > { %9074 = vmatprep.mubr.msk.f32.mxu0 %vm225_vm1, %v3006_v18 }
 0x1f6   : > { %9075 = vmatmul.mubr.msk.f32.gmra.mrb[8].mxu0 %vm225_vm1, %v3007_v19 }
 0x1f7   : > { %9077 = vmatprep.mubr.msk.f32.mxu0 %vm225_vm1, %v3008_v20 }
 0x1fa   : > { %9078 = vmatmul.mubr.msk.f32.gmra.mrb[10].mxu0 %vm225_vm1, %v3009_v21 }
 0x1fb   : > { %9080 = vmatprep.mubr.msk.f32.mxu0 %vm225_vm1, %v3010_v22 }
 0x1fe   : > { %9081 = vmatmul.mubr.msk.f32.gmra.mrb[12].mxu0 %vm225_vm1, %v3011_v23 }
 0x1ff   : > { %9083 = vmatprep.mubr.msk.f32.mxu0 %vm225_vm1, %v3012_v24 }
 0x202   : > { %9084 = vmatmul.mubr.msk.f32.gmra.mrb[14].mxu0 %vm225_vm1, %v3013_v25 }
 0x203   : > { %9086 = vmatprep.mubr.msk.f32.mxu0 %vm225_vm1, %v3014_v26 }
 0x206   : > { %9087 = vmatmul.mubr.msk.f32.gmra.mrb[16].mxu0 %vm225_vm1, %v3015_v27 }
 0x207   : > { %9089 = vmatprep.mubr.msk.f32.mxu0 %vm225_vm1, %v3016_v31 }
 0x20a   : > { %9090 = vmatmul.mubr.msk.f32.gmra.mrb[18].mxu0 %vm225_vm1, %v3017_v32 }
 0x20b   : > { %9092 = vmatprep.mubr.msk.f32.mxu0 %vm225_vm1, %v10433_v58  ;;  %v3028_v58 = vld [vmem:[#allocation2 + $0x199] sm:$0xff] }
 0x20e   : > { %9093 = vmatmul.mubr.msk.f32.gmra.mrb[20].mxu0 %vm225_vm1, %v10439_v59  ;;  %v3029_v59 = vld [vmem:[#allocation2 + $0x1a1] sm:$0xff] }
 0x20f   : > { %9095 = vmatprep.mubr.msk.f32.mxu0 %vm225_vm1, %v10441_v60  ;;  %v12333_v60 = vld [vmem:[#allocation19_spill] sm:$0xff] }
 0x212   : > { %9096 = vmatmul.mubr.msk.f32.gmra.mrb[22].mxu0 %vm225_vm1, %v10447_v61  ;;  %v12334_v61 = vld [vmem:[#allocation20_spill] sm:$0xff] }
 0x213   : > { %9098 = vmatprep.mubr.msk.f32.mxu0 %vm225_vm1, %v10449_v62  ;;  %v12335_v62 = vld [vmem:[#allocation21_spill] sm:$0xff] }
 0x216   : > { %9099 = vmatmul.mubr.msk.f32.gmra.mrb[24].mxu0 %vm225_vm1, %v12305_v28  ;;  %v11218_v28 = vld [vmem:[%s12160_s2] ss:$0 sm:$0xff] }
 0x217   : > { %9101 = vmatprep.mubr.msk.f32.mxu0 %vm225_vm1, %v12306_v29 }
 0x21a   : > { %9102 = vmatmul.mubr.msk.f32.gmra.mrb[26].mxu0 %vm225_vm1, %v12307_v33 }
 0x21b   : > { %9104 = vmatprep.mubr.msk.f32.mxu0 %vm225_vm1, %v10870_v30 }
 0x21e   : > { %9105 = vmatmul.mubr.msk.f32.gmra.mrb[28].mxu0 %vm225_vm1, %v10876_v34 }
 0x21f   : > { %9107 = vmatprep.mubr.msk.f32.mxu0 %vm225_vm1, %v3028_v58 }
 0x222   : > { %9108 = vmatmul.mubr.msk.f32.gmra.mrb[30].mxu0 %vm225_vm1, %v3029_v59 }
 0x223   : > { %9112 = vmatprep.mubr.msk.f32.mxu0 %vm225_vm1, %v12310_v44 }
 0x226   : > { %9113 = vmatmul.mubr.msk.f32.vlgmr.msra.gmra.mrb[0].mxu0 %vm225_vm1, %v12311_v45 }
 0x227   : > { %9115 = vmatprep.mubr.msk.f32.mxu0 %vm225_vm1, %v12312_v46 }
 0x22a   : > { %9116 = vmatmul.mubr.msk.f32.gmra.mrb[2].mxu0 %vm225_vm1, %v12313_v47 }
 0x22b   : > { %9118 = vmatprep.mubr.msk.f32.mxu0 %vm225_vm1, %v12314_v48 }
 0x22e   : > { %9119 = vmatmul.mubr.msk.f32.gmra.mrb[4].mxu0 %vm225_vm1, %v12315_v49 }
 0x22f   : > { %9121 = vmatprep.mubr.msk.f32.mxu0 %vm225_vm1, %v12316_v50 }
 0x232   : > { %9122 = vmatmul.mubr.msk.f32.gmra.mrb[6].mxu0 %vm225_vm1, %v12317_v51 }
 0x233   : > { %9124 = vmatprep.mubr.msk.f32.mxu0 %vm225_vm1, %v12318_v52 }
 0x236   : > { %9125 = vmatmul.mubr.msk.f32.gmra.mrb[8].mxu0 %vm225_vm1, %v12319_v53 }
 0x237   : > { %9127 = vmatprep.mubr.msk.f32.mxu0 %vm225_vm1, %v12333_v60 }
 0x23a   : > { %9128 = vmatmul.mubr.msk.f32.gmra.mrb[10].mxu0 %vm225_vm1, %v12334_v61 }
 0x23b   : > { %9130 = vmatprep.mubr.msk.f32.mxu0 %vm225_vm1, %v12335_v62 }
 0x23e   : > { %9131 = vmatmul.mubr.msk.f32.gmra.mrb[12].mxu0 %vm225_vm1, %v12323_v57 }
 0x23f   : > { %9133 = vmatprep.mubr.msk.f32.mxu0 %vm225_vm1, %v12336_v37 }
 0x242   : > { %9134 = vmatmul.mubr.msk.f32.gmra.mrb[14].mxu0 %vm225_vm1, %v12325_v7 }
 0x243   : > { %9136 = vmatprep.mubr.msk.f32.mxu0 %vm225_vm1, %v12337_v38 }
 0x246   : > { %9137 = vmatmul.mubr.msk.f32.gmra.mrb[16].mxu0 %vm225_vm1, %v12327_v43 }
 0x247   : > { %9139 = vmatprep.mubr.msk.f32.mxu0 %vm225_vm1, %v12328_v54 }
 0x24a   : > { %9140 = vmatmul.mubr.msk.f32.gmra.mrb[18].mxu0 %vm225_vm1, %v12338_v39 }
 0x24b   : > { %9142 = vmatprep.mubr.msk.f32.mxu0 %vm225_vm1, %v12330_v56 }
 0x24e   : > { %9143 = vmatmul.mubr.msk.f32.gmra.mrb[20].mxu0 %vm225_vm1, %v10705_v1  ;;  %v3418_v1 = vld [vmem:[#allocation2 + $0x19a] sm:$0xff] }
 0x24f   : > { %9145 = vmatprep.mubr.msk.f32.mxu0 %vm225_vm1, %v12339_v42 }
 0x252   : > { %9146 = vmatmul.mubr.msk.f32.gmra.mrb[22].mxu0 %vm225_vm1, %v10713_v0  ;;  %v3419_v0 = vld [vmem:[#allocation2 + $0x1a2] sm:$0xff] }
 0x253   : > { %9148 = vmatprep.mubr.msk.f32.mxu0 %vm225_vm1, %v12332_v35 }
 0x256   : > { %9149 = vmatmul.mubr.msk.f32.gmra.mrb[24].mxu0 %vm225_vm1, %v10721_v40  ;;  %v7815_v40 = vld [vmem:[%s12161_s3 + $0x8] sm:$0xff] }
 0x257   : > { %9151 = vmatprep.mubr.msk.f32.mxu0 %vm225_vm1, %v12340_v3  ;;  %9160 = vmatprep.subr.mxu1 %v7815_v40 }
 0x258   : > { %9161 = vmatpush3.msra.mxu1 %v7815_v40 }
 0x259   : > { %9210 = vmatprep.subr.mxu1 %v3955_v2 }
 0x25a   : > { %9152 = vmatmul.mubr.msk.f32.gmra.mrb[26].mxu0 %vm225_vm1, %v10729_v6  ;;  %v3957_v6 = vld [vmem:[#allocation3 + $0x9] sm:$0xff] }
 0x25b   : > { %9154 = vmatprep.mubr.msk.f32.mxu0 %vm225_vm1, %v10943_v55  ;;  %9163 = vmatmul.mubr.msk.f32.vlgmr.msra.gmra.mrb[0].mxu1 %vm3849_vm3, %v3957_v6 }
 0x25c   : > { %9211 = vmatpush3.msra.mxu1 %v3955_v2 }
 0x25d   : > { %9260 = vmatprep.subr.mxu1 %v11212_v5 }
 0x25e   : > { %9155 = vmatmul.mubr.msk.f32.gmra.mrb[28].mxu0 %vm225_vm1, %v10949_v63 }
 0x25f   : > { %9157 = vmatprep.mubr.msk.f32.mxu0 %vm225_vm1, %v3418_v1 }
 0x262   : > { %9158 = vmatmul.mubr.msk.f32.gmra.mrb[30].mxu0 %vm225_vm1, %v3419_v0 }
 0x2f9   : > { %v9114_v29 = vpop.f32.mrb[0].mxu0 }
 0x2fa   : > { %v3786_v30 = vadd.f32 %v9114_v29, %v11218_v28  ;;  %v3587_v33 = vpop.f32.mrb[1].mxu0 }
 0x2fb   : > { %v3785_v34 = vadd.f32 %v11218_v28, %v3587_v33 }
 0x2fc   : > { %v3818_v36 = vmax.f32 %v3786_v30, 0.0 }
 0x2fd   : > { %v3817_v44 = vmax.f32 %v3785_v34, 0.0  ;;  %v9117_v45 = vpop.f32.mrb[2].mxu0 }
 0x2fe   : > { %3892 = vst.msk [vmem:[#allocation3 + $0x21] sm:$0xff] %vm3849_vm3, %v3818_v36  ;;  %v3788_v46 = vadd.f32 %v9117_v45, %v11218_v28  ;;  %v3597_v47 = vpop.f32.mrb[3].mxu0 }
 0x2ff   : > { %3891 = vst.msk [vmem:[#allocation3 + $0x19] sm:$0xff] %vm3849_vm3, %v3817_v44  ;;  %v3787_v48 = vadd.f32 %v11218_v28, %v3597_v47 }
 0x300   : > { %v3820_v49 = vmax.f32 %v3788_v46, 0.0 }
 0x301   : > { %v3819_v50 = vmax.f32 %v3787_v48, 0.0  ;;  %v9120_v51 = vpop.f32.mrb[4].mxu0 }
 0x302   : > { %3894 = vst.msk [vmem:[#allocation3 + $0x39] sm:$0xff] %vm3849_vm3, %v3820_v49  ;;  %v3790_v52 = vadd.f32 %v9120_v51, %v11218_v28  ;;  %v3607_v53 = vpop.f32.mrb[5].mxu0 }
 0x303   : > { %3893 = vst.msk [vmem:[#allocation3 + $0x31] sm:$0xff] %vm3849_vm3, %v3819_v50  ;;  %v3789_v54 = vadd.f32 %v11218_v28, %v3607_v53 }
 0x304   : > { %v3822_v55 = vmax.f32 %v3790_v52, 0.0 }
 0x305   : > { %v3821_v56 = vmax.f32 %v3789_v54, 0.0  ;;  %v9123_v57 = vpop.f32.mrb[6].mxu0  ;;  %v11238_v8 = vld [vmem:[#allocation3 + $0x21] sm:$0xff] }
 0x306   : > { %3896 = vst.msk [vmem:[#allocation3 + $0x51] sm:$0xff] %vm3849_vm3, %v3822_v55  ;;  %v3792_v63 = vadd.f32 %v9123_v57, %v11218_v28  ;;  %v3617_v7 = vpop.f32.mrb[7].mxu0  ;;  %v11232_v35 = vld [vmem:[#allocation3 + $0x19] sm:$0xff] }
 0x307   : > { %3895 = vst.msk [vmem:[#allocation3 + $0x49] sm:$0xff] %vm3849_vm3, %v3821_v56  ;;  %v3791_v43 = vadd.f32 %v11218_v28, %v3617_v7  ;;  %9165 = vmatprep.mubr.msk.f32.mxu1 %vm3849_vm3, %v11232_v35 }
 0x308   : > { %v3824_v10 = vmax.f32 %v3792_v63, 0.0  ;;  %9166 = vmatmul.mubr.msk.f32.gmra.mrb[2].mxu1 %vm3849_vm3, %v11238_v8 }
 0x309   : > { %v3823_v11 = vmax.f32 %v3791_v43, 0.0  ;;  %v9126_v9 = vpop.f32.mrb[8].mxu0  ;;  %v11250_v16 = vld [vmem:[#allocation3 + $0x39] sm:$0xff] }
 0x30a   : > { %3898 = vst.msk [vmem:[#allocation3 + $0x69] sm:$0xff] %vm3849_vm3, %v3824_v10  ;;  %v3794_v12 = vadd.f32 %v9126_v9, %v11218_v28  ;;  %v3627_v13 = vpop.f32.mrb[9].mxu0  ;;  %v11244_v14 = vld [vmem:[#allocation3 + $0x31] sm:$0xff] }
 0x30b   : > { %3897 = vst.msk [vmem:[#allocation3 + $0x61] sm:$0xff] %vm3849_vm3, %v3823_v11  ;;  %v3793_v15 = vadd.f32 %v11218_v28, %v3627_v13  ;;  %9168 = vmatprep.mubr.msk.f32.mxu1 %vm3849_vm3, %v11244_v14 }
 0x30c   : > { %v3826_v17 = vmax.f32 %v3794_v12, 0.0  ;;  %9169 = vmatmul.mubr.msk.f32.gmra.mrb[4].mxu1 %vm3849_vm3, %v11250_v16 }
 0x30d   : > { %v3825_v18 = vmax.f32 %v3793_v15, 0.0  ;;  %v9129_v19 = vpop.f32.mrb[10].mxu0  ;;  %v11262_v24 = vld [vmem:[#allocation3 + $0x51] sm:$0xff] }
 0x30e   : > { %3900 = vst.msk [vmem:[#allocation3 + $0x81] sm:$0xff] %vm3849_vm3, %v3826_v17  ;;  %v3796_v20 = vadd.f32 %v9129_v19, %v11218_v28  ;;  %v3637_v21 = vpop.f32.mrb[11].mxu0  ;;  %v11256_v22 = vld [vmem:[#allocation3 + $0x49] sm:$0xff] }
 0x30f   : > { %3899 = vst.msk [vmem:[#allocation3 + $0x79] sm:$0xff] %vm3849_vm3, %v3825_v18  ;;  %v3795_v23 = vadd.f32 %v11218_v28, %v3637_v21  ;;  %9171 = vmatprep.mubr.msk.f32.mxu1 %vm3849_vm3, %v11256_v22 }
 0x310   : > { %v3828_v25 = vmax.f32 %v3796_v20, 0.0  ;;  %9172 = vmatmul.mubr.msk.f32.gmra.mrb[6].mxu1 %vm3849_vm3, %v11262_v24 }
 0x311   : > { %v3827_v26 = vmax.f32 %v3795_v23, 0.0  ;;  %v9132_v27 = vpop.f32.mrb[12].mxu0  ;;  %v11274_v60 = vld [vmem:[#allocation3 + $0x69] sm:$0xff] }
 0x312   : > { %3902 = vst.msk [vmem:[#allocation3 + $0x99] sm:$0xff] %vm3849_vm3, %v3828_v25  ;;  %v3798_v31 = vadd.f32 %v9132_v27, %v11218_v28  ;;  %v3647_v32 = vpop.f32.mrb[13].mxu0  ;;  %v11268_v58 = vld [vmem:[#allocation3 + $0x61] sm:$0xff] }
 0x313   : > { %3901 = vst.msk [vmem:[#allocation3 + $0x91] sm:$0xff] %vm3849_vm3, %v3827_v26  ;;  %v3797_v59 = vadd.f32 %v11218_v28, %v3647_v32  ;;  %9174 = vmatprep.mubr.msk.f32.mxu1 %vm3849_vm3, %v11268_v58 }
 0x314   : > { %v3830_v61 = vmax.f32 %v3798_v31, 0.0  ;;  %9175 = vmatmul.mubr.msk.f32.gmra.mrb[8].mxu1 %vm3849_vm3, %v11274_v60 }
 0x315   : > { %v3829_v62 = vmax.f32 %v3797_v59, 0.0  ;;  %v9135_v37 = vpop.f32.mrb[14].mxu0  ;;  %v11286_v1 = vld [vmem:[#allocation3 + $0x81] sm:$0xff] }
 0x316   : > { %3904 = vst.msk [vmem:[#allocation3 + $0xb1] sm:$0xff] %vm3849_vm3, %v3830_v61  ;;  %v3800_v38 = vadd.f32 %v9135_v37, %v11218_v28  ;;  %v3657_v39 = vpop.f32.mrb[15].mxu0  ;;  %v11280_v42 = vld [vmem:[#allocation3 + $0x79] sm:$0xff] }
 0x317   : > { %3903 = vst.msk [vmem:[#allocation3 + $0xa9] sm:$0xff] %vm3849_vm3, %v3829_v62  ;;  %v3799_v3 = vadd.f32 %v11218_v28, %v3657_v39  ;;  %9177 = vmatprep.mubr.msk.f32.mxu1 %vm3849_vm3, %v11280_v42 }
 0x318   : > { %v3832_v0 = vmax.f32 %v3800_v38, 0.0  ;;  %9178 = vmatmul.mubr.msk.f32.gmra.mrb[10].mxu1 %vm3849_vm3, %v11286_v1 }
 0x319   : > { %v3831_v4 = vmax.f32 %v3799_v3, 0.0  ;;  %v9138_v40 = vpop.f32.mrb[16].mxu0  ;;  %v11298_v30 = vld [vmem:[#allocation3 + $0x99] sm:$0xff] }
 0x31a   : > { %3906 = vst.msk [vmem:[#allocation3 + $0xc9] sm:$0xff] %vm3849_vm3, %v3832_v0  ;;  %v3802_v41 = vadd.f32 %v9138_v40, %v11218_v28  ;;  %v3667_v6 = vpop.f32.mrb[17].mxu0  ;;  %v11292_v2 = vld [vmem:[#allocation3 + $0x91] sm:$0xff] }
 0x31b   : > { %3905 = vst.msk [vmem:[#allocation3 + $0xc1] sm:$0xff] %vm3849_vm3, %v3831_v4  ;;  %v3801_v29 = vadd.f32 %v11218_v28, %v3667_v6  ;;  %9180 = vmatprep.mubr.msk.f32.mxu1 %vm3849_vm3, %v11292_v2 }
 0x31c   : > { %v3834_v33 = vmax.f32 %v3802_v41, 0.0  ;;  %9181 = vmatmul.mubr.msk.f32.gmra.mrb[12].mxu1 %vm3849_vm3, %v11298_v30 }
 0x31d   : > { %v3833_v34 = vmax.f32 %v3801_v29, 0.0  ;;  %v9141_v36 = vpop.f32.mrb[18].mxu0  ;;  %v11310_v48 = vld [vmem:[#allocation3 + $0xb1] sm:$0xff] }
 0x31e   : > { %3908 = vst.msk [vmem:[#allocation3 + $0xe1] sm:$0xff] %vm3849_vm3, %v3834_v33  ;;  %v3804_v44 = vadd.f32 %v9141_v36, %v11218_v28  ;;  %v3677_v45 = vpop.f32.mrb[19].mxu0  ;;  %v11304_v46 = vld [vmem:[#allocation3 + $0xa9] sm:$0xff] }
 0x31f   : > { %3907 = vst.msk [vmem:[#allocation3 + $0xd9] sm:$0xff] %vm3849_vm3, %v3833_v34  ;;  %v3803_v47 = vadd.f32 %v11218_v28, %v3677_v45  ;;  %9183 = vmatprep.mubr.msk.f32.mxu1 %vm3849_vm3, %v11304_v46 }
 0x320   : > { %v3836_v49 = vmax.f32 %v3804_v44, 0.0  ;;  %9184 = vmatmul.mubr.msk.f32.gmra.mrb[14].mxu1 %vm3849_vm3, %v11310_v48 }
 0x321   : > { %v3835_v50 = vmax.f32 %v3803_v47, 0.0  ;;  %v9144_v51 = vpop.f32.mrb[20].mxu0  ;;  %v11322_v56 = vld [vmem:[#allocation3 + $0xc9] sm:$0xff] }
 0x322   : > { %3910 = vst.msk [vmem:[#allocation3 + $0xf9] sm:$0xff] %vm3849_vm3, %v3836_v49  ;;  %v3806_v52 = vadd.f32 %v9144_v51, %v11218_v28  ;;  %v3687_v53 = vpop.f32.mrb[21].mxu0  ;;  %v11316_v54 = vld [vmem:[#allocation3 + $0xc1] sm:$0xff] }
 0x323   : > { %3909 = vst.msk [vmem:[#allocation3 + $0xf1] sm:$0xff] %vm3849_vm3, %v3835_v50  ;;  %v3805_v55 = vadd.f32 %v11218_v28, %v3687_v53  ;;  %9186 = vmatprep.mubr.msk.f32.mxu1 %vm3849_vm3, %v11316_v54  ;;  %v3923_v53 = vld [vmem:[#allocation3] sm:$0xff] }
 0x324   : > { %v3838_v57 = vmax.f32 %v3806_v52, 0.0  ;;  %9187 = vmatmul.mubr.msk.f32.gmra.mrb[16].mxu1 %vm3849_vm3, %v11322_v56 }
 0x325   : > { %v3837_v63 = vmax.f32 %v3805_v55, 0.0  ;;  %v9147_v7 = vpop.f32.mrb[22].mxu0  ;;  %v11334_v12 = vld [vmem:[#allocation3 + $0xe1] sm:$0xff] }
 0x326   : > { %3912 = vst.msk [vmem:[#allocation3 + $0x111] sm:$0xff] %vm3849_vm3, %v3838_v57  ;;  %v3808_v43 = vadd.f32 %v9147_v7, %v11218_v28  ;;  %v3697_v10 = vpop.f32.mrb[23].mxu0  ;;  %v11328_v11 = vld [vmem:[#allocation3 + $0xd9] sm:$0xff]  ;;  %v3924_v57 = vld [vmem:[#allocation3 + $0x8] sm:$0xff] }
 0x327   : > { %3911 = vst.msk [vmem:[#allocation3 + $0x109] sm:$0xff] %vm3849_vm3, %v3837_v63  ;;  %v3807_v9 = vadd.f32 %v11218_v28, %v3697_v10  ;;  %9189 = vmatprep.mubr.msk.f32.mxu1 %vm3849_vm3, %v11328_v11  ;;  %v11408_v63 = vld [vmem:[%s12161_s3 + $0x18] sm:$0xff]  ;;  %v11411_v7 = vld [vmem:[#allocation3 + $0x18] sm:$0xff]  ;;  %v11421_v10 = vld [vmem:[#allocation3 + $0x30] sm:$0xff] }
 0x328   : > { %v3840_v13 = vmax.f32 %v3808_v43, 0.0  ;;  %9190 = vmatmul.mubr.msk.f32.gmra.mrb[18].mxu1 %vm3849_vm3, %v11334_v12  ;;  %v11417_v43 = vld [vmem:[#allocation3 + $0x20] sm:$0xff] }
 0x329   : > { %v3839_v15 = vmax.f32 %v3807_v9, 0.0  ;;  %v9150_v17 = vpop.f32.mrb[24].mxu0  ;;  %v11346_v23 = vld [vmem:[#allocation3 + $0xf9] sm:$0xff] }
 0x32a   : > { %3914 = vst.msk [vmem:[#allocation3 + $0x129] sm:$0xff] %vm3849_vm3, %v3840_v13  ;;  %v3810_v18 = vadd.f32 %v9150_v17, %v11218_v28  ;;  %v3707_v19 = vpop.f32.mrb[25].mxu0  ;;  %v11340_v20 = vld [vmem:[#allocation3 + $0xf1] sm:$0xff]  ;;  %v11441_v17 = vld [vmem:[#allocation3 + $0x68] sm:$0xff] }
 0x32b   : > { %3913 = vst.msk [vmem:[#allocation3 + $0x121] sm:$0xff] %vm3849_vm3, %v3839_v15  ;;  %v3809_v21 = vadd.f32 %v11218_v28, %v3707_v19  ;;  %9192 = vmatprep.mubr.msk.f32.mxu1 %vm3849_vm3, %v11340_v20  ;;  %v11425_v9 = vld [vmem:[#allocation3 + $0x38] sm:$0xff]  ;;  %v11433_v13 = vld [vmem:[#allocation3 + $0x50] sm:$0xff]  ;;  %v11437_v15 = vld [vmem:[#allocation3 + $0x60] sm:$0xff] }
 0x32c   : > { %v3842_v25 = vmax.f32 %v3810_v18, 0.0  ;;  %9193 = vmatmul.mubr.msk.f32.gmra.mrb[20].mxu1 %vm3849_vm3, %v11346_v23  ;;  %v11445_v18 = vld [vmem:[#allocation3 + $0x78] sm:$0xff]  ;;  %v11449_v19 = vld [vmem:[#allocation3 + $0x80] sm:$0xff] }
 0x32d   : > { %v3841_v26 = vmax.f32 %v3809_v21, 0.0  ;;  %v9153_v27 = vpop.f32.mrb[26].mxu0  ;;  %v11358_v62 = vld [vmem:[#allocation3 + $0x111] sm:$0xff] }
 0x32e   : > { %3916 = vst.msk [vmem:[#allocation3 + $0x141] sm:$0xff] %vm3849_vm3, %v3842_v25  ;;  %v3812_v31 = vadd.f32 %v9153_v27, %v11218_v28  ;;  %v3717_v32 = vpop.f32.mrb[27].mxu0  ;;  %v11352_v59 = vld [vmem:[#allocation3 + $0x109] sm:$0xff]  ;;  %v11457_v25 = vld [vmem:[#allocation3 + $0x98] sm:$0xff] }
 0x32f   : > { %3915 = vst.msk [vmem:[#allocation3 + $0x139] sm:$0xff] %vm3849_vm3, %v3841_v26  ;;  %v3811_v61 = vadd.f32 %v11218_v28, %v3717_v32  ;;  %9195 = vmatprep.mubr.msk.f32.mxu1 %vm3849_vm3, %v11352_v59  ;;  %v11453_v21 = vld [vmem:[#allocation3 + $0x90] sm:$0xff]  ;;  %v11461_v26 = vld [vmem:[#allocation3 + $0xa8] sm:$0xff] }
 0x330   : > { %v3844_v37 = vmax.f32 %v3812_v31, 0.0  ;;  %9196 = vmatmul.mubr.msk.f32.gmra.mrb[22].mxu1 %vm3849_vm3, %v11358_v62  ;;  %v11465_v27 = vld [vmem:[#allocation3 + $0xb0] sm:$0xff]  ;;  %v11469_v31 = vld [vmem:[#allocation3 + $0xc0] sm:$0xff]  ;;  %v11473_v32 = vld [vmem:[#allocation3 + $0xc8] sm:$0xff] }
 0x331   : > { %v3843_v38 = vmax.f32 %v3811_v61, 0.0  ;;  %v9156_v39 = vpop.f32.mrb[28].mxu0  ;;  %v11370_v41 = vld [vmem:[#allocation3 + $0x129] sm:$0xff]  ;;  %v11477_v61 = vld [vmem:[#allocation3 + $0xd8] sm:$0xff] }
 0x332   : > { %3918 = vst.msk [vmem:[#allocation3 + $0x159] sm:$0xff] %vm3849_vm3, %v3844_v37  ;;  %v3814_v3 = vadd.f32 %v9156_v39, %v11218_v28  ;;  %v3727_v0 = vpop.f32.mrb[29].mxu0  ;;  %v11364_v4 = vld [vmem:[#allocation3 + $0x121] sm:$0xff]  ;;  %v11489_v39 = vld [vmem:[#allocation3 + $0xf8] sm:$0xff] }
 0x333   : > { %3917 = vst.msk [vmem:[#allocation3 + $0x151] sm:$0xff] %vm3849_vm3, %v3843_v38  ;;  %v3813_v40 = vadd.f32 %v11218_v28, %v3727_v0  ;;  %9198 = vmatprep.mubr.msk.f32.mxu1 %vm3849_vm3, %v11364_v4  ;;  %v11481_v37 = vld [vmem:[#allocation3 + $0xe0] sm:$0xff]  ;;  %v11485_v38 = vld [vmem:[#allocation3 + $0xf0] sm:$0xff] }
 0x334   : > { %v3846_v6 = vmax.f32 %v3814_v3, 0.0  ;;  %9199 = vmatmul.mubr.msk.f32.gmra.mrb[24].mxu1 %vm3849_vm3, %v11370_v41  ;;  %v11493_v3 = vld [vmem:[#allocation3 + $0x108] sm:$0xff]  ;;  %v11497_v0 = vld [vmem:[#allocation3 + $0x110] sm:$0xff] }
 0x335   : > { %v3845_v29 = vmax.f32 %v3813_v40, 0.0  ;;  %v9159_v33 = vpop.f32.mrb[30].mxu0  ;;  %v11382_v47 = vld [vmem:[#allocation3 + $0x141] sm:$0xff] }
 0x336   : > { %3920 = vst.msk [vmem:[#allocation3 + $0x171] sm:$0xff] %vm3849_vm3, %v3846_v6  ;;  %v3816_v34 = vadd.f32 %v9159_v33, %v11218_v28  ;;  %v3737_v36 = vpop.f32.mrb[31].mxu0  ;;  %v11376_v44 = vld [vmem:[#allocation3 + $0x139] sm:$0xff]  ;;  %v11505_v6 = vld [vmem:[#allocation3 + $0x128] sm:$0xff] }
 0x337   : > { %3919 = vst.msk [vmem:[#allocation3 + $0x169] sm:$0xff] %vm3849_vm3, %v3845_v29  ;;  %v3815_v45 = vadd.f32 %v11218_v28, %v3737_v36  ;;  %9201 = vmatprep.mubr.msk.f32.mxu1 %vm3849_vm3, %v11376_v44  ;;  %v11501_v40 = vld [vmem:[#allocation3 + $0x120] sm:$0xff]  ;;  %v11509_v29 = vld [vmem:[#allocation3 + $0x138] sm:$0xff] }
 0x338   : > { %v3848_v49 = vmax.f32 %v3816_v34, 0.0  ;;  %9202 = vmatmul.mubr.msk.f32.gmra.mrb[26].mxu1 %vm3849_vm3, %v11382_v47  ;;  %v11513_v33 = vld [vmem:[#allocation3 + $0x140] sm:$0xff] }
 0x339   : > { %v3847_v50 = vmax.f32 %v3815_v45, 0.0  ;;  %v11392_v28 = vld [vmem:[#allocation3 + $0x159] sm:$0xff] }
 0x33a   : > { %3922 = vst.msk [vmem:[#allocation3 + $0x189] sm:$0xff] %vm3849_vm3, %v3848_v49  ;;  %v11387_v51 = vld [vmem:[#allocation3 + $0x151] sm:$0xff]  ;;  %v4632_v49 = vld [vmem:[#allocation3 + $0x2] sm:$0xff] }
 0x33b   : > { %3921 = vst.msk [vmem:[#allocation3 + $0x181] sm:$0xff] %vm3849_vm3, %v3847_v50  ;;  %9204 = vmatprep.mubr.msk.f32.mxu1 %vm3849_vm3, %v11387_v51  ;;  %v11517_v34 = vld [vmem:[#allocation3 + $0x150] sm:$0xff]  ;;  %v11521_v36 = vld [vmem:[#allocation3 + $0x158] sm:$0xff] }
 0x33c   : > { %9205 = vmatmul.mubr.msk.f32.gmra.mrb[28].mxu1 %vm3849_vm3, %v11392_v28 }
 0x33d   : > { %v11400_v55 = vld [vmem:[#allocation3 + $0x171] sm:$0xff] }
 0x33e   : > { %v11396_v52 = vld [vmem:[#allocation3 + $0x169] sm:$0xff]  ;;  %12343 = vst [vmem:[#allocation5_spill] sm:$0xff] %v11400_v55 }
 0x33f   : > { %12342 = vst [vmem:[#allocation4_spill] sm:$0xff] %v11396_v52  ;;  %9207 = vmatprep.mubr.msk.f32.mxu1 %vm3849_vm3, %v11396_v52  ;;  %v11525_v45 = vld [vmem:[#allocation3 + $0x168] sm:$0xff]  ;;  %v11529_v50 = vld [vmem:[#allocation3 + $0x170] sm:$0xff] }
 0x340   : > { %9208 = vmatmul.mubr.msk.f32.gmra.mrb[30].mxu1 %vm3849_vm3, %v11400_v55  ;;  %v11540_v55 = vld [vmem:[#allocation3 + $0x1a] sm:$0xff]  ;;  %v11546_v52 = vld [vmem:[#allocation3 + $0x22] sm:$0xff] }
 0x341   : > { %9212 = vmatprep.mubr.msk.f32.mxu1 %vm3849_vm3, %v3923_v53  ;;  %v4633_v53 = vld [vmem:[#allocation3 + $0xa] sm:$0xff]  ;;  %12344 = vst [vmem:[#allocation6_spill] sm:$0xff] %v11540_v55  ;;  %12345 = vst [vmem:[#allocation7_spill] sm:$0xff] %v11546_v52 }
 0x344   : > { %9213 = vmatmul.mubr.msk.f32.vlgmr.msra.gmra.mrb[0].mxu1 %vm3849_vm3, %v3924_v57  ;;  %v11537_v57 = vld [vmem:[%s12161_s3 + $0x20] sm:$0xff] }
 0x345   : > { %9261 = vmatpush3.msra.mxu1 %v11212_v5  ;;  %9215 = vmatprep.mubr.msk.f32.mxu1 %vm3849_vm3, %v11411_v7  ;;  %v11429_v5 = vld [vmem:[#allocation3 + $0x48] sm:$0xff] }
 0x346   : > { %9310 = vmatprep.subr.mxu1 %v11408_v63 }
 0x348   : > { %9216 = vmatmul.mubr.msk.f32.gmra.mrb[2].mxu1 %vm3849_vm3, %v11417_v43 }
 0x349   : > { %9218 = vmatprep.mubr.msk.f32.mxu1 %vm3849_vm3, %v11421_v10 }
 0x34c   : > { %9219 = vmatmul.mubr.msk.f32.gmra.mrb[4].mxu1 %vm3849_vm3, %v11425_v9 }
 0x34d   : > { %9221 = vmatprep.mubr.msk.f32.mxu1 %vm3849_vm3, %v11429_v5 }
 0x350   : > { %9222 = vmatmul.mubr.msk.f32.gmra.mrb[6].mxu1 %vm3849_vm3, %v11433_v13 }
 0x351   : > { %9224 = vmatprep.mubr.msk.f32.mxu1 %vm3849_vm3, %v11437_v15 }
 0x354   : > { %9225 = vmatmul.mubr.msk.f32.gmra.mrb[8].mxu1 %vm3849_vm3, %v11441_v17 }
 0x355   : > { %9227 = vmatprep.mubr.msk.f32.mxu1 %vm3849_vm3, %v11445_v18 }
 0x358   : > { %9228 = vmatmul.mubr.msk.f32.gmra.mrb[10].mxu1 %vm3849_vm3, %v11449_v19 }
 0x359   : > { %9230 = vmatprep.mubr.msk.f32.mxu1 %vm3849_vm3, %v11453_v21 }
 0x35c   : > { %9231 = vmatmul.mubr.msk.f32.gmra.mrb[12].mxu1 %vm3849_vm3, %v11457_v25 }
 0x35d   : > { %9233 = vmatprep.mubr.msk.f32.mxu1 %vm3849_vm3, %v11461_v26 }
 0x360   : > { %9234 = vmatmul.mubr.msk.f32.gmra.mrb[14].mxu1 %vm3849_vm3, %v11465_v27 }
 0x361   : > { %9236 = vmatprep.mubr.msk.f32.mxu1 %vm3849_vm3, %v11469_v31 }
 0x364   : > { %9237 = vmatmul.mubr.msk.f32.gmra.mrb[16].mxu1 %vm3849_vm3, %v11473_v32 }
 0x365   : > { %9239 = vmatprep.mubr.msk.f32.mxu1 %vm3849_vm3, %v11477_v61 }
 0x368   : > { %9240 = vmatmul.mubr.msk.f32.gmra.mrb[18].mxu1 %vm3849_vm3, %v11481_v37 }
 0x369   : > { %9242 = vmatprep.mubr.msk.f32.mxu1 %vm3849_vm3, %v11485_v38 }
 0x36c   : > { %9243 = vmatmul.mubr.msk.f32.gmra.mrb[20].mxu1 %vm3849_vm3, %v11489_v39 }
 0x36d   : > { %9245 = vmatprep.mubr.msk.f32.mxu1 %vm3849_vm3, %v11493_v3 }
 0x370   : > { %9246 = vmatmul.mubr.msk.f32.gmra.mrb[22].mxu1 %vm3849_vm3, %v11497_v0 }
 0x371   : > { %9248 = vmatprep.mubr.msk.f32.mxu1 %vm3849_vm3, %v11501_v40 }
 0x374   : > { %9249 = vmatmul.mubr.msk.f32.gmra.mrb[24].mxu1 %vm3849_vm3, %v11505_v6 }
 0x375   : > { %9251 = vmatprep.mubr.msk.f32.mxu1 %vm3849_vm3, %v11509_v29 }
 0x378   : > { %9252 = vmatmul.mubr.msk.f32.gmra.mrb[26].mxu1 %vm3849_vm3, %v11513_v33 }
 0x379   : > { %9254 = vmatprep.mubr.msk.f32.mxu1 %vm3849_vm3, %v11517_v34 }
 0x37c   : > { %9255 = vmatmul.mubr.msk.f32.gmra.mrb[28].mxu1 %vm3849_vm3, %v11521_v36 }
 0x37d   : > { %9257 = vmatprep.mubr.msk.f32.mxu1 %vm3849_vm3, %v11525_v45 }
 0x380   : > { %9258 = vmatmul.mubr.msk.f32.gmra.mrb[30].mxu1 %vm3849_vm3, %v11529_v50 }
 0x381   : > { %9262 = vmatprep.mubr.msk.f32.mxu1 %vm3849_vm3, %v4632_v49  ;;  %v11550_v49 = vld [vmem:[#allocation3 + $0x32] sm:$0xff] }
 0x382   : > { %12346 = vst [vmem:[#allocation8_spill] sm:$0xff] %v11550_v49 }
 0x384   : > { %9263 = vmatmul.mubr.msk.f32.vlgmr.msra.gmra.mrb[0].mxu1 %vm3849_vm3, %v4633_v53  ;;  %v11554_v53 = vld [vmem:[#allocation3 + $0x3a] sm:$0xff] }
 0x385   : > { %9311 = vmatpush3.msra.mxu1 %v11408_v63  ;;  %9265 = vmatprep.mubr.msk.f32.mxu1 %vm3849_vm3, %v11540_v55  ;;  %12347 = vst [vmem:[#allocation9_spill] sm:$0xff] %v11554_v53  ;;  %v11558_v63 = vld [vmem:[#allocation3 + $0x4a] sm:$0xff]  ;;  %v11562_v55 = vld [vmem:[#allocation3 + $0x52] sm:$0xff] }
 0x386   : > { %9360 = vmatprep.subr.mxu1 %v11537_v57  ;;  %12348 = vst [vmem:[#allocation10_spill] sm:$0xff] %v11558_v63  ;;  %12349 = vst [vmem:[#allocation11_spill] sm:$0xff] %v11562_v55 }
 0x388   : > { %9266 = vmatmul.mubr.msk.f32.gmra.mrb[2].mxu1 %vm3849_vm3, %v11546_v52  ;;  %v11566_v52 = vld [vmem:[#allocation3 + $0x62] sm:$0xff] }
 0x389   : > { %9268 = vmatprep.mubr.msk.f32.mxu1 %vm3849_vm3, %v11550_v49  ;;  %12350 = vst [vmem:[#allocation12_spill] sm:$0xff] %v11566_v52  ;;  %v11570_v49 = vld [vmem:[#allocation3 + $0x6a] sm:$0xff] }
 0x38a   : > { %12351 = vst [vmem:[#allocation13_spill] sm:$0xff] %v11570_v49 }
 0x38c   : > { %9269 = vmatmul.mubr.msk.f32.gmra.mrb[4].mxu1 %vm3849_vm3, %v11554_v53  ;;  %v11574_v53 = vld [vmem:[#allocation3 + $0x7a] sm:$0xff] }
 0x38d   : > { %9271 = vmatprep.mubr.msk.f32.mxu1 %vm3849_vm3, %v11558_v63  ;;  %12352 = vst [vmem:[#allocation14_spill] sm:$0xff] %v11574_v53  ;;  %v11578_v63 = vld [vmem:[#allocation3 + $0x82] sm:$0xff] }
 0x38e   : > { %12353 = vst [vmem:[#allocation15_spill] sm:$0xff] %v11578_v63 }
 0x390   : > { %9272 = vmatmul.mubr.msk.f32.gmra.mrb[6].mxu1 %vm3849_vm3, %v11562_v55  ;;  %v11582_v55 = vld [vmem:[#allocation3 + $0x92] sm:$0xff] }
 0x391   : > { %9274 = vmatprep.mubr.msk.f32.mxu1 %vm3849_vm3, %v11566_v52  ;;  %12354 = vst [vmem:[#allocation16_spill] sm:$0xff] %v11582_v55  ;;  %v11586_v52 = vld [vmem:[#allocation3 + $0x9a] sm:$0xff] }
 0x392   : > { %12355 = vst [vmem:[#allocation17_spill] sm:$0xff] %v11586_v52 }
 0x394   : > { %9275 = vmatmul.mubr.msk.f32.gmra.mrb[8].mxu1 %vm3849_vm3, %v11570_v49  ;;  %v11590_v49 = vld [vmem:[#allocation3 + $0xaa] sm:$0xff] }
 0x395   : > { %9277 = vmatprep.mubr.msk.f32.mxu1 %vm3849_vm3, %v11574_v53  ;;  %12356 = vst [vmem:[#allocation18_spill] sm:$0xff] %v11590_v49  ;;  %v11594_v53 = vld [vmem:[#allocation3 + $0xb2] sm:$0xff] }
 0x396   : > { %12357 = vst [vmem:[#allocation22_spill] sm:$0xff] %v11594_v53 }
 0x398   : > { %9278 = vmatmul.mubr.msk.f32.gmra.mrb[10].mxu1 %vm3849_vm3, %v11578_v63  ;;  %v11598_v63 = vld [vmem:[#allocation3 + $0xc2] sm:$0xff] }
 0x399   : > { %9280 = vmatprep.mubr.msk.f32.mxu1 %vm3849_vm3, %v11582_v55  ;;  %12358 = vst [vmem:[#allocation24_spill] sm:$0xff] %v11598_v63  ;;  %v11602_v55 = vld [vmem:[#allocation3 + $0xca] sm:$0xff] }
 0x39a   : > { %12359 = vst [vmem:[#allocation26_spill] sm:$0xff] %v11602_v55 }
 0x39c   : > { %9281 = vmatmul.mubr.msk.f32.gmra.mrb[12].mxu1 %vm3849_vm3, %v11586_v52  ;;  %v11606_v52 = vld [vmem:[#allocation3 + $0xda] sm:$0xff] }
 0x39d   : > { %9283 = vmatprep.mubr.msk.f32.mxu1 %vm3849_vm3, %v11590_v49  ;;  %12360 = vst [vmem:[#allocation27_spill] sm:$0xff] %v11606_v52  ;;  %v11610_v49 = vld [vmem:[#allocation3 + $0xe2] sm:$0xff] }
 0x39e   : > { %12361 = vst [vmem:[#allocation29_spill] sm:$0xff] %v11610_v49 }
 0x3a0   : > { %9284 = vmatmul.mubr.msk.f32.gmra.mrb[14].mxu1 %vm3849_vm3, %v11594_v53  ;;  %v11614_v53 = vld [vmem:[#allocation3 + $0xf2] sm:$0xff] }
 0x3a1   : > { %9286 = vmatprep.mubr.msk.f32.mxu1 %vm3849_vm3, %v11598_v63  ;;  %12362 = vst [vmem:[#allocation31_spill] sm:$0xff] %v11614_v53  ;;  %v11618_v63 = vld [vmem:[#allocation3 + $0xfa] sm:$0xff] }
 0x3a2   : > { %12363 = vst [vmem:[#allocation19_spill] sm:$0xff] %v11618_v63 }
 0x3a4   : > { %9287 = vmatmul.mubr.msk.f32.gmra.mrb[16].mxu1 %vm3849_vm3, %v11602_v55  ;;  %v11622_v55 = vld [vmem:[#allocation3 + $0x10a] sm:$0xff] }
 0x3a5   : > { %9289 = vmatprep.mubr.msk.f32.mxu1 %vm3849_vm3, %v11606_v52  ;;  %12364 = vst [vmem:[#allocation20_spill] sm:$0xff] %v11622_v55  ;;  %v11626_v52 = vld [vmem:[#allocation3 + $0x112] sm:$0xff] }
 0x3a6   : > { %12365 = vst [vmem:[#allocation21_spill] sm:$0xff] %v11626_v52 }
 0x3a8   : > { %9290 = vmatmul.mubr.msk.f32.gmra.mrb[18].mxu1 %vm3849_vm3, %v11610_v49  ;;  %v11630_v49 = vld [vmem:[#allocation3 + $0x122] sm:$0xff] }
 0x3a9   : > { %9292 = vmatprep.mubr.msk.f32.mxu1 %vm3849_vm3, %v11614_v53  ;;  %12366 = vst [vmem:[#allocation23_spill] sm:$0xff] %v11630_v49  ;;  %v11634_v53 = vld [vmem:[#allocation3 + $0x12a] sm:$0xff] }
 0x3aa   : > { %12367 = vst [vmem:[#allocation25_spill] sm:$0xff] %v11634_v53 }
 0x3ac   : > { %9293 = vmatmul.mubr.msk.f32.gmra.mrb[20].mxu1 %vm3849_vm3, %v11618_v63  ;;  %v11638_v63 = vld [vmem:[#allocation3 + $0x13a] sm:$0xff] }
 0x3ad   : > { %9295 = vmatprep.mubr.msk.f32.mxu1 %vm3849_vm3, %v11622_v55  ;;  %12368 = vst [vmem:[#allocation28_spill] sm:$0xff] %v11638_v63  ;;  %v11642_v55 = vld [vmem:[#allocation3 + $0x142] sm:$0xff] }
 0x3b0   : > { %9296 = vmatmul.mubr.msk.f32.gmra.mrb[22].mxu1 %vm3849_vm3, %v11626_v52  ;;  %v11646_v52 = vld [vmem:[#allocation3 + $0x152] sm:$0xff] }
 0x3b1   : > { %9298 = vmatprep.mubr.msk.f32.mxu1 %vm3849_vm3, %v11630_v49  ;;  %12369 = vst [vmem:[#allocation30_spill] sm:$0xff] %v11646_v52  ;;  %v11650_v49 = vld [vmem:[#allocation3 + $0x15a] sm:$0xff] }
 0x3b4   : > { %9299 = vmatmul.mubr.msk.f32.gmra.mrb[24].mxu1 %vm3849_vm3, %v11634_v53  ;;  %v11654_v53 = vld [vmem:[#allocation3 + $0x16a] sm:$0xff] }
 0x3b5   : > { %9301 = vmatprep.mubr.msk.f32.mxu1 %vm3849_vm3, %v11638_v63  ;;  %12370 = vst [vmem:[#allocation32_spill] sm:$0xff] %v11654_v53  ;;  %v11658_v63 = vld [vmem:[#allocation3 + $0x172] sm:$0xff] }
 0x3b8   : > { %9302 = vmatmul.mubr.msk.f32.gmra.mrb[26].mxu1 %vm3849_vm3, %v11642_v55 }
 0x3b9   : > { %9304 = vmatprep.mubr.msk.f32.mxu1 %vm3849_vm3, %v11646_v52  ;;  %v7979_v52 = vld [vmem:[%s12161_s3 + $0x28] sm:$0xff] }
 0x3bc   : > { %9305 = vmatmul.mubr.msk.f32.gmra.mrb[28].mxu1 %vm3849_vm3, %v11650_v49 }
 0x3bd   : > { %9307 = vmatprep.mubr.msk.f32.mxu1 %vm3849_vm3, %v11654_v53 }
 0x3c0   : > { %9308 = vmatmul.mubr.msk.f32.gmra.mrb[30].mxu1 %vm3849_vm3, %v11658_v63 }
 0x3c1   : > { %9312 = vmatprep.mubr.msk.f32.mxu1 %vm3849_vm3, %v11411_v7  ;;  %v11726_v7 = vld [vmem:[#allocation3 + $0x180] sm:$0xff] }
 0x3c4   : > { %9313 = vmatmul.mubr.msk.f32.vlgmr.msra.gmra.mrb[0].mxu1 %vm3849_vm3, %v11417_v43  ;;  %v11730_v43 = vld [vmem:[#allocation3 + $0x188] sm:$0xff] }
 0x3c5   : > { %9361 = vmatpush3.msra.mxu1 %v11537_v57  ;;  %9315 = vmatprep.mubr.msk.f32.mxu1 %vm3849_vm3, %v11421_v10  ;;  %v8012_v57 = vld [vmem:[%s12161_s3 + $0x30] sm:$0xff] }
 0x3c6   : > { %9410 = vmatprep.subr.mxu1 %v7979_v52 }
 0x3c8   : > { %9316 = vmatmul.mubr.msk.f32.gmra.mrb[2].mxu1 %vm3849_vm3, %v11425_v9 }
 0x3c9   : > { %9318 = vmatprep.mubr.msk.f32.mxu1 %vm3849_vm3, %v11429_v5 }
 0x3cc   : > { %9319 = vmatmul.mubr.msk.f32.gmra.mrb[4].mxu1 %vm3849_vm3, %v11433_v13 }
 0x3cd   : > { %9321 = vmatprep.mubr.msk.f32.mxu1 %vm3849_vm3, %v11437_v15 }
 0x3d0   : > { %9322 = vmatmul.mubr.msk.f32.gmra.mrb[6].mxu1 %vm3849_vm3, %v11441_v17 }
 0x3d1   : > { %9324 = vmatprep.mubr.msk.f32.mxu1 %vm3849_vm3, %v11445_v18 }
 0x3d4   : > { %9325 = vmatmul.mubr.msk.f32.gmra.mrb[8].mxu1 %vm3849_vm3, %v11449_v19 }
 0x3d5   : > { %9327 = vmatprep.mubr.msk.f32.mxu1 %vm3849_vm3, %v11453_v21 }
 0x3d8   : > { %9328 = vmatmul.mubr.msk.f32.gmra.mrb[10].mxu1 %vm3849_vm3, %v11457_v25 }
 0x3d9   : > { %9330 = vmatprep.mubr.msk.f32.mxu1 %vm3849_vm3, %v11461_v26 }
 0x3dc   : > { %9331 = vmatmul.mubr.msk.f32.gmra.mrb[12].mxu1 %vm3849_vm3, %v11465_v27 }
 0x3dd   : > { %9333 = vmatprep.mubr.msk.f32.mxu1 %vm3849_vm3, %v11469_v31 }
 0x3e0   : > { %9334 = vmatmul.mubr.msk.f32.gmra.mrb[14].mxu1 %vm3849_vm3, %v11473_v32 }
 0x3e1   : > { %9336 = vmatprep.mubr.msk.f32.mxu1 %vm3849_vm3, %v11477_v61 }
 0x3e4   : > { %9337 = vmatmul.mubr.msk.f32.gmra.mrb[16].mxu1 %vm3849_vm3, %v11481_v37 }
 0x3e5   : > { %9339 = vmatprep.mubr.msk.f32.mxu1 %vm3849_vm3, %v11485_v38 }
 0x3e8   : > { %9340 = vmatmul.mubr.msk.f32.gmra.mrb[18].mxu1 %vm3849_vm3, %v11489_v39 }
 0x3e9   : > { %9342 = vmatprep.mubr.msk.f32.mxu1 %vm3849_vm3, %v11493_v3 }
 0x3ec   : > { %9343 = vmatmul.mubr.msk.f32.gmra.mrb[20].mxu1 %vm3849_vm3, %v11497_v0 }
 0x3ed   : > { %9345 = vmatprep.mubr.msk.f32.mxu1 %vm3849_vm3, %v11501_v40 }
 0x3f0   : > { %9346 = vmatmul.mubr.msk.f32.gmra.mrb[22].mxu1 %vm3849_vm3, %v11505_v6 }
 0x3f1   : > { %9348 = vmatprep.mubr.msk.f32.mxu1 %vm3849_vm3, %v11509_v29 }
 0x3f4   : > { %9349 = vmatmul.mubr.msk.f32.gmra.mrb[24].mxu1 %vm3849_vm3, %v11513_v33 }
 0x3f5   : > { %9351 = vmatprep.mubr.msk.f32.mxu1 %vm3849_vm3, %v11517_v34 }
 0x3f8   : > { %9352 = vmatmul.mubr.msk.f32.gmra.mrb[26].mxu1 %vm3849_vm3, %v11521_v36 }
 0x3f9   : > { %9354 = vmatprep.mubr.msk.f32.mxu1 %vm3849_vm3, %v11525_v45 }
 0x3fc   : > { %9355 = vmatmul.mubr.msk.f32.gmra.mrb[28].mxu1 %vm3849_vm3, %v11529_v50 }
 0x3fd   : > { %9357 = vmatprep.mubr.msk.f32.mxu1 %vm3849_vm3, %v11726_v7 }
 0x400   : > { %9358 = vmatmul.mubr.msk.f32.gmra.mrb[30].mxu1 %vm3849_vm3, %v11730_v43 }
 0x401   : > { %9362 = vmatprep.mubr.msk.f32.mxu1 %vm3849_vm3, %v11232_v35  ;;  %v12371_v35 = vld [vmem:[#allocation4_spill] sm:$0xff] }
 0x404   : > { %9363 = vmatmul.mubr.msk.f32.vlgmr.msra.gmra.mrb[0].mxu1 %vm3849_vm3, %v11238_v8  ;;  %v12372_v8 = vld [vmem:[#allocation5_spill] sm:$0xff] }
 0x405   : > { %9411 = vmatpush3.msra.mxu1 %v7979_v52  ;;  %9365 = vmatprep.mubr.msk.f32.mxu1 %vm3849_vm3, %v11244_v14  ;;  %v11797_v14 = vld [vmem:[#allocation3 + $0x181] sm:$0xff] }
 0x406   : > { %9460 = vmatprep.subr.mxu1 %v8012_v57  ;;  %v12388_v52 = vld [vmem:[#allocation26_spill] sm:$0xff] }
 0x408   : > { %9366 = vmatmul.mubr.msk.f32.gmra.mrb[2].mxu1 %vm3849_vm3, %v11250_v16  ;;  %v11801_v16 = vld [vmem:[#allocation3 + $0x189] sm:$0xff] }
 0x409   : > { %9368 = vmatprep.mubr.msk.f32.mxu1 %vm3849_vm3, %v11256_v22  ;;  %v12373_v22 = vld [vmem:[#allocation6_spill] sm:$0xff] }
 0x40c   : > { %9369 = vmatmul.mubr.msk.f32.gmra.mrb[4].mxu1 %vm3849_vm3, %v11262_v24  ;;  %v8045_v24 = vld [vmem:[%s12161_s3 + $0x38] sm:$0xff] }
 0x40d   : > { %9371 = vmatprep.mubr.msk.f32.mxu1 %vm3849_vm3, %v11268_v58  ;;  %v12374_v58 = vld [vmem:[#allocation7_spill] sm:$0xff] }
 0x410   : > { %9372 = vmatmul.mubr.msk.f32.gmra.mrb[6].mxu1 %vm3849_vm3, %v11274_v60  ;;  %v12375_v60 = vld [vmem:[#allocation8_spill] sm:$0xff] }
 0x411   : > { %9374 = vmatprep.mubr.msk.f32.mxu1 %vm3849_vm3, %v11280_v42  ;;  %v12376_v42 = vld [vmem:[#allocation9_spill] sm:$0xff] }
 0x414   : > { %9375 = vmatmul.mubr.msk.f32.gmra.mrb[8].mxu1 %vm3849_vm3, %v11286_v1  ;;  %v12377_v1 = vld [vmem:[#allocation10_spill] sm:$0xff] }
 0x415   : > { %9377 = vmatprep.mubr.msk.f32.mxu1 %vm3849_vm3, %v11292_v2  ;;  %v12378_v2 = vld [vmem:[#allocation11_spill] sm:$0xff] }
 0x418   : > { %9378 = vmatmul.mubr.msk.f32.gmra.mrb[10].mxu1 %vm3849_vm3, %v11298_v30  ;;  %v12379_v30 = vld [vmem:[#allocation12_spill] sm:$0xff] }
 0x419   : > { %9380 = vmatprep.mubr.msk.f32.mxu1 %vm3849_vm3, %v11304_v46  ;;  %v12380_v46 = vld [vmem:[#allocation13_spill] sm:$0xff] }
 0x41c   : > { %9381 = vmatmul.mubr.msk.f32.gmra.mrb[12].mxu1 %vm3849_vm3, %v11310_v48  ;;  %v12381_v48 = vld [vmem:[#allocation14_spill] sm:$0xff] }
 0x41d   : > { %9383 = vmatprep.mubr.msk.f32.mxu1 %vm3849_vm3, %v11316_v54  ;;  %v12382_v54 = vld [vmem:[#allocation15_spill] sm:$0xff] }
 0x420   : > { %9384 = vmatmul.mubr.msk.f32.gmra.mrb[14].mxu1 %vm3849_vm3, %v11322_v56  ;;  %v12383_v56 = vld [vmem:[#allocation16_spill] sm:$0xff] }
 0x421   : > { %9386 = vmatprep.mubr.msk.f32.mxu1 %vm3849_vm3, %v11328_v11  ;;  %v12384_v11 = vld [vmem:[#allocation17_spill] sm:$0xff] }
 0x424   : > { %9387 = vmatmul.mubr.msk.f32.gmra.mrb[16].mxu1 %vm3849_vm3, %v11334_v12  ;;  %v12385_v12 = vld [vmem:[#allocation18_spill] sm:$0xff] }
 0x425   : > { %9389 = vmatprep.mubr.msk.f32.mxu1 %vm3849_vm3, %v11340_v20  ;;  %v12386_v20 = vld [vmem:[#allocation22_spill] sm:$0xff] }
 0x428   : > { %9390 = vmatmul.mubr.msk.f32.gmra.mrb[18].mxu1 %vm3849_vm3, %v11346_v23  ;;  %v12387_v23 = vld [vmem:[#allocation24_spill] sm:$0xff] }
 0x429   : > { %9392 = vmatprep.mubr.msk.f32.mxu1 %vm3849_vm3, %v11352_v59 }
 0x42c   : > { %9393 = vmatmul.mubr.msk.f32.gmra.mrb[20].mxu1 %vm3849_vm3, %v11358_v62 }
 0x42d   : > { %9395 = vmatprep.mubr.msk.f32.mxu1 %vm3849_vm3, %v11364_v4 }
 0x430   : > { %9396 = vmatmul.mubr.msk.f32.gmra.mrb[22].mxu1 %vm3849_vm3, %v11370_v41 }
 0x431   : > { %9398 = vmatprep.mubr.msk.f32.mxu1 %vm3849_vm3, %v11376_v44 }
 0x434   : > { %9399 = vmatmul.mubr.msk.f32.gmra.mrb[24].mxu1 %vm3849_vm3, %v11382_v47 }
 0x435   : > { %9401 = vmatprep.mubr.msk.f32.mxu1 %vm3849_vm3, %v11387_v51 }
 0x438   : > { %9402 = vmatmul.mubr.msk.f32.gmra.mrb[26].mxu1 %vm3849_vm3, %v11392_v28 }
 0x439   : > { %9404 = vmatprep.mubr.msk.f32.mxu1 %vm3849_vm3, %v12371_v35 }
 0x43c   : > { %9405 = vmatmul.mubr.msk.f32.gmra.mrb[28].mxu1 %vm3849_vm3, %v12372_v8 }
 0x43d   : > { %9407 = vmatprep.mubr.msk.f32.mxu1 %vm3849_vm3, %v11797_v14 }
 0x440   : > { %9408 = vmatmul.mubr.msk.f32.gmra.mrb[30].mxu1 %vm3849_vm3, %v11801_v16 }
 0x441   : > { %9412 = vmatprep.mubr.msk.f32.mxu1 %vm3849_vm3, %v12373_v22  ;;  %v12390_v22 = vld [vmem:[#allocation29_spill] sm:$0xff] }
 0x444   : > { %9413 = vmatmul.mubr.msk.f32.vlgmr.msra.gmra.mrb[0].mxu1 %vm3849_vm3, %v12374_v58  ;;  %v12391_v58 = vld [vmem:[#allocation31_spill] sm:$0xff] }
 0x445   : > { %9461 = vmatpush3.msra.mxu1 %v8012_v57  ;;  %9415 = vmatprep.mubr.msk.f32.mxu1 %vm3849_vm3, %v12375_v60  ;;  %v12389_v57 = vld [vmem:[#allocation27_spill] sm:$0xff] }
 0x446   : > { %9510 = vmatprep.subr.mxu1 %v8045_v24 }
 0x448   : > { %9416 = vmatmul.mubr.msk.f32.gmra.mrb[2].mxu1 %vm3849_vm3, %v12376_v42 }
 0x449   : > { %9418 = vmatprep.mubr.msk.f32.mxu1 %vm3849_vm3, %v12377_v1 }
 0x44c   : > { %9419 = vmatmul.mubr.msk.f32.gmra.mrb[4].mxu1 %vm3849_vm3, %v12378_v2 }
 0x44d   : > { %9421 = vmatprep.mubr.msk.f32.mxu1 %vm3849_vm3, %v12379_v30 }
 0x450   : > { %9422 = vmatmul.mubr.msk.f32.gmra.mrb[6].mxu1 %vm3849_vm3, %v12380_v46 }
 0x451   : > { %9424 = vmatprep.mubr.msk.f32.mxu1 %vm3849_vm3, %v12381_v48 }
 0x454   : > { %9425 = vmatmul.mubr.msk.f32.gmra.mrb[8].mxu1 %vm3849_vm3, %v12382_v54 }
 0x455   : > { %9427 = vmatprep.mubr.msk.f32.mxu1 %vm3849_vm3, %v12383_v56 }
 0x458   : > { %9428 = vmatmul.mubr.msk.f32.gmra.mrb[10].mxu1 %vm3849_vm3, %v12384_v11  ;;  %v12392_v11 = vld [vmem:[#allocation19_spill] sm:$0xff] }
 0x459   : > { %9430 = vmatprep.mubr.msk.f32.mxu1 %vm3849_vm3, %v12385_v12  ;;  %v12393_v12 = vld [vmem:[#allocation20_spill] sm:$0xff] }
 0x45c   : > { %9431 = vmatmul.mubr.msk.f32.gmra.mrb[12].mxu1 %vm3849_vm3, %v12386_v20  ;;  %v12394_v20 = vld [vmem:[#allocation21_spill] sm:$0xff] }
 0x45d   : > { %9433 = vmatprep.mubr.msk.f32.mxu1 %vm3849_vm3, %v12387_v23  ;;  %v12395_v23 = vld [vmem:[#allocation23_spill] sm:$0xff] }
 0x460   : > { %9434 = vmatmul.mubr.msk.f32.gmra.mrb[14].mxu1 %vm3849_vm3, %v12388_v52  ;;  %v12396_v52 = vld [vmem:[#allocation25_spill] sm:$0xff] }
 0x461   : > { %9436 = vmatprep.mubr.msk.f32.mxu1 %vm3849_vm3, %v12389_v57  ;;  %v12397_v57 = vld [vmem:[#allocation28_spill] sm:$0xff] }
 0x464   : > { %9437 = vmatmul.mubr.msk.f32.gmra.mrb[16].mxu1 %vm3849_vm3, %v12390_v22 }
 0x465   : > { %9439 = vmatprep.mubr.msk.f32.mxu1 %vm3849_vm3, %v12391_v58  ;;  %v12398_v58 = vld [vmem:[#allocation30_spill] sm:$0xff] }
 0x468   : > { %9440 = vmatmul.mubr.msk.f32.gmra.mrb[18].mxu1 %vm3849_vm3, %v12392_v11 }
 0x469   : > { %9442 = vmatprep.mubr.msk.f32.mxu1 %vm3849_vm3, %v12393_v12 }
 0x46c   : > { %9443 = vmatmul.mubr.msk.f32.gmra.mrb[20].mxu1 %vm3849_vm3, %v12394_v20 }
 0x46d   : > { %9445 = vmatprep.mubr.msk.f32.mxu1 %vm3849_vm3, %v12395_v23  ;;  %v11868_v23 = vld [vmem:[#allocation3 + $0x182] sm:$0xff] }
 0x470   : > { %9446 = vmatmul.mubr.msk.f32.gmra.mrb[22].mxu1 %vm3849_vm3, %v12396_v52 }
 0x471   : > { %9448 = vmatprep.mubr.msk.f32.mxu1 %vm3849_vm3, %v12397_v57  ;;  %v11872_v57 = vld [vmem:[#allocation3 + $0x18a] sm:$0xff] }
 0x474   : > { %9449 = vmatmul.mubr.msk.f32.gmra.mrb[24].mxu1 %vm3849_vm3, %v11642_v55 }
 0x475   : > { %9451 = vmatprep.mubr.msk.f32.mxu1 %vm3849_vm3, %v12398_v58 }
 0x478   : > { %9452 = vmatmul.mubr.msk.f32.gmra.mrb[26].mxu1 %vm3849_vm3, %v11650_v49 }
 0x479   : > { %9454 = vmatprep.mubr.msk.f32.mxu1 %vm3849_vm3, %v11654_v53  ;;  %v8078_v53 = vld [vmem:[%s12161_s3 + $0x40] sm:$0xff] }
 0x47c   : > { %9455 = vmatmul.mubr.msk.f32.gmra.mrb[28].mxu1 %vm3849_vm3, %v11658_v63 }
 0x47d   : > { %9457 = vmatprep.mubr.msk.f32.mxu1 %vm3849_vm3, %v11868_v23 }
 0x480   : > { %9458 = vmatmul.mubr.msk.f32.gmra.mrb[30].mxu1 %vm3849_vm3, %v11872_v57 }
 0x481   : > { %9462 = vmatprep.mubr.msk.f32.mxu1 %vm3849_vm3, %v11421_v10  ;;  %v6211_v10 = vld [vmem:[#allocation3 + $0x198] sm:$0xff] }
 0x484   : > { %9463 = vmatmul.mubr.msk.f32.vlgmr.msra.gmra.mrb[0].mxu1 %vm3849_vm3, %v11425_v9  ;;  %v6212_v9 = vld [vmem:[#allocation3 + $0x1a0] sm:$0xff] }
 0x485   : > { %9511 = vmatpush3.msra.mxu1 %v8045_v24  ;;  %9465 = vmatprep.mubr.msk.f32.mxu1 %vm3849_vm3, %v11429_v5  ;;  %v6568_v5 = vld [vmem:[#allocation3 + $0x31] sm:$0xff] }
 0x486   : > { %9560 = vmatprep.subr.mxu1 %v8078_v53 }
 0x488   : > { %9466 = vmatmul.mubr.msk.f32.gmra.mrb[2].mxu1 %vm3849_vm3, %v11433_v13  ;;  %v6569_v13 = vld [vmem:[#allocation3 + $0x39] sm:$0xff] }
 0x489   : > { %9468 = vmatprep.mubr.msk.f32.mxu1 %vm3849_vm3, %v11437_v15  ;;  %v6570_v15 = vld [vmem:[#allocation3 + $0x49] sm:$0xff] }
 0x48c   : > { %9469 = vmatmul.mubr.msk.f32.gmra.mrb[4].mxu1 %vm3849_vm3, %v11441_v17  ;;  %v6571_v17 = vld [vmem:[#allocation3 + $0x51] sm:$0xff] }
 0x48d   : > { %9471 = vmatprep.mubr.msk.f32.mxu1 %vm3849_vm3, %v11445_v18  ;;  %v6572_v18 = vld [vmem:[#allocation3 + $0x61] sm:$0xff] }
 0x490   : > { %9472 = vmatmul.mubr.msk.f32.gmra.mrb[6].mxu1 %vm3849_vm3, %v11449_v19  ;;  %v6573_v19 = vld [vmem:[#allocation3 + $0x69] sm:$0xff] }
 0x491   : > { %9474 = vmatprep.mubr.msk.f32.mxu1 %vm3849_vm3, %v11453_v21  ;;  %v6574_v21 = vld [vmem:[#allocation3 + $0x79] sm:$0xff] }
 0x494   : > { %9475 = vmatmul.mubr.msk.f32.gmra.mrb[8].mxu1 %vm3849_vm3, %v11457_v25  ;;  %v6575_v25 = vld [vmem:[#allocation3 + $0x81] sm:$0xff] }
 0x495   : > { %9477 = vmatprep.mubr.msk.f32.mxu1 %vm3849_vm3, %v11461_v26  ;;  %v6576_v26 = vld [vmem:[#allocation3 + $0x91] sm:$0xff] }
 0x498   : > { %9478 = vmatmul.mubr.msk.f32.gmra.mrb[10].mxu1 %vm3849_vm3, %v11465_v27  ;;  %v6577_v27 = vld [vmem:[#allocation3 + $0x99] sm:$0xff] }
 0x499   : > { %9480 = vmatprep.mubr.msk.f32.mxu1 %vm3849_vm3, %v11469_v31  ;;  %v6578_v31 = vld [vmem:[#allocation3 + $0xa9] sm:$0xff] }
 0x49c   : > { %9481 = vmatmul.mubr.msk.f32.gmra.mrb[12].mxu1 %vm3849_vm3, %v11473_v32  ;;  %v6579_v32 = vld [vmem:[#allocation3 + $0xb1] sm:$0xff] }
 0x49d   : > { %9483 = vmatprep.mubr.msk.f32.mxu1 %vm3849_vm3, %v11477_v61  ;;  %v6580_v61 = vld [vmem:[#allocation3 + $0xc1] sm:$0xff] }
 0x4a0   : > { %9484 = vmatmul.mubr.msk.f32.gmra.mrb[14].mxu1 %vm3849_vm3, %v11481_v37  ;;  %v6581_v37 = vld [vmem:[#allocation3 + $0xc9] sm:$0xff] }
 0x4a1   : > { %9486 = vmatprep.mubr.msk.f32.mxu1 %vm3849_vm3, %v11485_v38  ;;  %v6582_v38 = vld [vmem:[#allocation3 + $0xd9] sm:$0xff] }
 0x4a4   : > { %9487 = vmatmul.mubr.msk.f32.gmra.mrb[16].mxu1 %vm3849_vm3, %v11489_v39  ;;  %v6583_v39 = vld [vmem:[#allocation3 + $0xe1] sm:$0xff] }
 0x4a5   : > { %9489 = vmatprep.mubr.msk.f32.mxu1 %vm3849_vm3, %v11493_v3  ;;  %v6584_v3 = vld [vmem:[#allocation3 + $0xf1] sm:$0xff] }
 0x4a8   : > { %9490 = vmatmul.mubr.msk.f32.gmra.mrb[18].mxu1 %vm3849_vm3, %v11497_v0  ;;  %v6585_v0 = vld [vmem:[#allocation3 + $0xf9] sm:$0xff] }
 0x4a9   : > { %9492 = vmatprep.mubr.msk.f32.mxu1 %vm3849_vm3, %v11501_v40  ;;  %v12405_v40 = vld [vmem:[#allocation31_spill] sm:$0xff] }
 0x4ac   : > { %9493 = vmatmul.mubr.msk.f32.gmra.mrb[20].mxu1 %vm3849_vm3, %v11505_v6  ;;  %v12406_v6 = vld [vmem:[#allocation23_spill] sm:$0xff] }
 0x4ad   : > { %9495 = vmatprep.mubr.msk.f32.mxu1 %vm3849_vm3, %v11509_v29  ;;  %v12407_v29 = vld [vmem:[#allocation28_spill] sm:$0xff] }
 0x4b0   : > { %9496 = vmatmul.mubr.msk.f32.gmra.mrb[22].mxu1 %vm3849_vm3, %v11513_v33  ;;  %v12408_v33 = vld [vmem:[#allocation32_spill] sm:$0xff] }
 0x4b1   : > { %9498 = vmatprep.mubr.msk.f32.mxu1 %vm3849_vm3, %v11517_v34  ;;  %v6985_v34 = vld [vmem:[#allocation3 + $0x19a] sm:$0xff] }
 0x4b4   : > { %9499 = vmatmul.mubr.msk.f32.gmra.mrb[24].mxu1 %vm3849_vm3, %v11521_v36  ;;  %v12050_v36 = vld [vmem:[%s12162_s4] ss:$0 sm:$0xff] }
 0x4b5   : > { %9501 = vmatprep.mubr.msk.f32.mxu1 %vm3849_vm3, %v11525_v45 }
 0x4b8   : > { %9502 = vmatmul.mubr.msk.f32.gmra.mrb[26].mxu1 %vm3849_vm3, %v11529_v50 }
 0x4b9   : > { %9504 = vmatprep.mubr.msk.f32.mxu1 %vm3849_vm3, %v11726_v7 }
 0x4bc   : > { %9505 = vmatmul.mubr.msk.f32.gmra.mrb[28].mxu1 %vm3849_vm3, %v11730_v43 }
 0x4bd   : > { %9507 = vmatprep.mubr.msk.f32.mxu1 %vm3849_vm3, %v6211_v10 }
 0x4c0   : > { %9508 = vmatmul.mubr.msk.f32.gmra.mrb[30].mxu1 %vm3849_vm3, %v6212_v9 }
 0x4c1   : > { %9512 = vmatprep.mubr.msk.f32.mxu1 %vm3849_vm3, %v6568_v5 }
 0x4c4   : > { %9513 = vmatmul.mubr.msk.f32.vlgmr.msra.gmra.mrb[0].mxu1 %vm3849_vm3, %v6569_v13 }
 0x4c5   : > { %9561 = vmatpush3.msra.mxu1 %v8078_v53  ;;  %9515 = vmatprep.mubr.msk.f32.mxu1 %vm3849_vm3, %v6570_v15 }
 0x4c8   : > { %9516 = vmatmul.mubr.msk.f32.gmra.mrb[2].mxu1 %vm3849_vm3, %v6571_v17 }
 0x4c9   : > { %9518 = vmatprep.mubr.msk.f32.mxu1 %vm3849_vm3, %v6572_v18 }
 0x4cc   : > { %9519 = vmatmul.mubr.msk.f32.gmra.mrb[4].mxu1 %vm3849_vm3, %v6573_v19 }
 0x4cd   : > { %9521 = vmatprep.mubr.msk.f32.mxu1 %vm3849_vm3, %v6574_v21 }
 0x4d0   : > { %9522 = vmatmul.mubr.msk.f32.gmra.mrb[6].mxu1 %vm3849_vm3, %v6575_v25 }
 0x4d1   : > { %9524 = vmatprep.mubr.msk.f32.mxu1 %vm3849_vm3, %v6576_v26 }
 0x4d4   : > { %9525 = vmatmul.mubr.msk.f32.gmra.mrb[8].mxu1 %vm3849_vm3, %v6577_v27 }
 0x4d5   : > { %9527 = vmatprep.mubr.msk.f32.mxu1 %vm3849_vm3, %v6578_v31 }
 0x4d8   : > { %9528 = vmatmul.mubr.msk.f32.gmra.mrb[10].mxu1 %vm3849_vm3, %v6579_v32 }
 0x4d9   : > { %9530 = vmatprep.mubr.msk.f32.mxu1 %vm3849_vm3, %v6580_v61 }
 0x4dc   : > { %9531 = vmatmul.mubr.msk.f32.gmra.mrb[12].mxu1 %vm3849_vm3, %v6581_v37 }
 0x4dd   : > { %9533 = vmatprep.mubr.msk.f32.mxu1 %vm3849_vm3, %v6582_v38 }
 0x4e0   : > { %9534 = vmatmul.mubr.msk.f32.gmra.mrb[14].mxu1 %vm3849_vm3, %v6583_v39 }
 0x4e1   : > { %9536 = vmatprep.mubr.msk.f32.mxu1 %vm3849_vm3, %v6584_v3 }
 0x4e4   : > { %9537 = vmatmul.mubr.msk.f32.gmra.mrb[16].mxu1 %vm3849_vm3, %v6585_v0 }
 0x4e5   : > { %9539 = vmatprep.mubr.msk.f32.mxu1 %vm3849_vm3, %v11352_v59  ;;  %v6598_v59 = vld [vmem:[#allocation3 + $0x199] sm:$0xff] }
 0x4e8   : > { %9540 = vmatmul.mubr.msk.f32.gmra.mrb[18].mxu1 %vm3849_vm3, %v11358_v62  ;;  %v6599_v62 = vld [vmem:[#allocation3 + $0x1a1] sm:$0xff] }
 0x4e9   : > { %9542 = vmatprep.mubr.msk.f32.mxu1 %vm3849_vm3, %v11364_v4  ;;  %v12399_v4 = vld [vmem:[#allocation17_spill] sm:$0xff] }
 0x4ec   : > { %9543 = vmatmul.mubr.msk.f32.gmra.mrb[20].mxu1 %vm3849_vm3, %v11370_v41  ;;  %v12400_v41 = vld [vmem:[#allocation18_spill] sm:$0xff] }
 0x4ed   : > { %9545 = vmatprep.mubr.msk.f32.mxu1 %vm3849_vm3, %v11376_v44  ;;  %v12401_v44 = vld [vmem:[#allocation22_spill] sm:$0xff] }
 0x4f0   : > { %9546 = vmatmul.mubr.msk.f32.gmra.mrb[22].mxu1 %vm3849_vm3, %v11382_v47  ;;  %v12402_v47 = vld [vmem:[#allocation24_spill] sm:$0xff] }
 0x4f1   : > { %9548 = vmatprep.mubr.msk.f32.mxu1 %vm3849_vm3, %v11387_v51  ;;  %v12403_v51 = vld [vmem:[#allocation26_spill] sm:$0xff] }
 0x4f4   : > { %9549 = vmatmul.mubr.msk.f32.gmra.mrb[24].mxu1 %vm3849_vm3, %v11392_v28  ;;  %v12404_v28 = vld [vmem:[#allocation27_spill] sm:$0xff] }
 0x4f5   : > { %9551 = vmatprep.mubr.msk.f32.mxu1 %vm3849_vm3, %v12371_v35 }
 0x4f8   : > { %9552 = vmatmul.mubr.msk.f32.gmra.mrb[26].mxu1 %vm3849_vm3, %v12372_v8 }
 0x4f9   : > { %9554 = vmatprep.mubr.msk.f32.mxu1 %vm3849_vm3, %v11797_v14 }
 0x4fc   : > { %9555 = vmatmul.mubr.msk.f32.gmra.mrb[28].mxu1 %vm3849_vm3, %v11801_v16 }
 0x4fd   : > { %9557 = vmatprep.mubr.msk.f32.mxu1 %vm3849_vm3, %v6598_v59 }
 0x500   : > { %9558 = vmatmul.mubr.msk.f32.gmra.mrb[30].mxu1 %vm3849_vm3, %v6599_v62 }
 0x501   : > { %9562 = vmatprep.mubr.msk.f32.mxu1 %vm3849_vm3, %v12375_v60 }
 0x504   : > { %9563 = vmatmul.mubr.msk.f32.vlgmr.msra.gmra.mrb[0].mxu1 %vm3849_vm3, %v12376_v42 }
 0x505   : > { %9565 = vmatprep.mubr.msk.f32.mxu1 %vm3849_vm3, %v12377_v1 }
 0x508   : > { %9566 = vmatmul.mubr.msk.f32.gmra.mrb[2].mxu1 %vm3849_vm3, %v12378_v2 }
 0x509   : > { %9568 = vmatprep.mubr.msk.f32.mxu1 %vm3849_vm3, %v12379_v30 }
 0x50c   : > { %9569 = vmatmul.mubr.msk.f32.gmra.mrb[4].mxu1 %vm3849_vm3, %v12380_v46 }
 0x50d   : > { %9571 = vmatprep.mubr.msk.f32.mxu1 %vm3849_vm3, %v12381_v48 }
 0x510   : > { %9572 = vmatmul.mubr.msk.f32.gmra.mrb[6].mxu1 %vm3849_vm3, %v12382_v54 }
 0x511   : > { %9574 = vmatprep.mubr.msk.f32.mxu1 %vm3849_vm3, %v12383_v56 }
 0x514   : > { %9575 = vmatmul.mubr.msk.f32.gmra.mrb[8].mxu1 %vm3849_vm3, %v12399_v4 }
 0x515   : > { %9577 = vmatprep.mubr.msk.f32.mxu1 %vm3849_vm3, %v12400_v41 }
 0x518   : > { %9578 = vmatmul.mubr.msk.f32.gmra.mrb[10].mxu1 %vm3849_vm3, %v12401_v44 }
 0x519   : > { %9580 = vmatprep.mubr.msk.f32.mxu1 %vm3849_vm3, %v12402_v47 }
 0x51c   : > { %9581 = vmatmul.mubr.msk.f32.gmra.mrb[12].mxu1 %vm3849_vm3, %v12403_v51 }
 0x51d   : > { %9583 = vmatprep.mubr.msk.f32.mxu1 %vm3849_vm3, %v12404_v28 }
 0x520   : > { %9584 = vmatmul.mubr.msk.f32.gmra.mrb[14].mxu1 %vm3849_vm3, %v12390_v22 }
 0x521   : > { %9586 = vmatprep.mubr.msk.f32.mxu1 %vm3849_vm3, %v12405_v40 }
 0x524   : > { %9587 = vmatmul.mubr.msk.f32.gmra.mrb[16].mxu1 %vm3849_vm3, %v12392_v11 }
 0x525   : > { %9589 = vmatprep.mubr.msk.f32.mxu1 %vm3849_vm3, %v12393_v12 }
 0x528   : > { %9590 = vmatmul.mubr.msk.f32.gmra.mrb[18].mxu1 %vm3849_vm3, %v12394_v20 }
 0x529   : > { %9592 = vmatprep.mubr.msk.f32.mxu1 %vm3849_vm3, %v12406_v6 }
 0x52c   : > { %9593 = vmatmul.mubr.msk.f32.gmra.mrb[20].mxu1 %vm3849_vm3, %v12396_v52 }
 0x52d   : > { %9595 = vmatprep.mubr.msk.f32.mxu1 %vm3849_vm3, %v12407_v29 }
 0x530   : > { %9596 = vmatmul.mubr.msk.f32.gmra.mrb[22].mxu1 %vm3849_vm3, %v11642_v55  ;;  %v6986_v55 = vld [vmem:[#allocation3 + $0x1a2] sm:$0xff] }
 0x531   : > { %9598 = vmatprep.mubr.msk.f32.mxu1 %vm3849_vm3, %v12398_v58 }
 0x534   : > { %9599 = vmatmul.mubr.msk.f32.gmra.mrb[24].mxu1 %vm3849_vm3, %v11650_v49 }
 0x535   : > { %9601 = vmatprep.mubr.msk.f32.mxu1 %vm3849_vm3, %v12408_v33 }
 0x538   : > { %9602 = vmatmul.mubr.msk.f32.gmra.mrb[26].mxu1 %vm3849_vm3, %v11658_v63 }
 0x539   : > { %9604 = vmatprep.mubr.msk.f32.mxu1 %vm3849_vm3, %v11868_v23 }
 0x53c   : > { %9605 = vmatmul.mubr.msk.f32.gmra.mrb[28].mxu1 %vm3849_vm3, %v11872_v57 }
 0x53d   : > { %9607 = vmatprep.mubr.msk.f32.mxu1 %vm3849_vm3, %v6985_v34 }
 0x540   : > { %9608 = vmatmul.mubr.msk.f32.gmra.mrb[30].mxu1 %vm3849_vm3, %v6986_v55 }
 0x5d7   : > { %v9564_v45 = vpop.f32.mrb[0].mxu1 }
 0x5d8   : > { %v7350_v50 = vadd.f32 %v9564_v45, %v12050_v36  ;;  %v7151_v49 = vpop.f32.mrb[1].mxu1 }
 0x5d9   : > { %v7349_v53 = vadd.f32 %v12050_v36, %v7151_v49 }
 0x5da   : > { %v7382_v63 = vmax.f32 %v7350_v50, 0.0 }
 0x5db   : > { %v7381_v7 = vmax.f32 %v7349_v53, 0.0  ;;  %v9567_v43 = vpop.f32.mrb[2].mxu1 }
 0x5dc   : > { %7414 = vst.msk [vmem:[%s12058_s21 + $0x8] sm:$0xff] %vm3849_vm3, %v7382_v63  ;;  %v7352_v35 = vadd.f32 %v9567_v43, %v12050_v36  ;;  %v7161_v8 = vpop.f32.mrb[3].mxu1 }
 0x5dd   : > { %7413 = vst.msk [vmem:[%s12058_s21] sm:$0xff] %vm3849_vm3, %v7381_v7  ;;  %v7351_v14 = vadd.f32 %v12050_v36, %v7161_v8 }
 0x5de   : > { %v7384_v16 = vmax.f32 %v7352_v35, 0.0 }
 0x5df   : > { %v7383_v24 = vmax.f32 %v7351_v14, 0.0  ;;  %v9570_v60 = vpop.f32.mrb[4].mxu1 }
 0x5e0   : > { %7416 = vst.msk [vmem:[%s12058_s21 + $0x18] sm:$0xff] %vm3849_vm3, %v7384_v16  ;;  %v7354_v42 = vadd.f32 %v9570_v60, %v12050_v36  ;;  %v7171_v1 = vpop.f32.mrb[5].mxu1 }
 0x5e1   : > { %7415 = vst.msk [vmem:[%s12058_s21 + $0x10] sm:$0xff] %vm3849_vm3, %v7383_v24  ;;  %v7353_v2 = vadd.f32 %v12050_v36, %v7171_v1 }
 0x5e2   : > { %v7386_v30 = vmax.f32 %v7354_v42, 0.0 }
 0x5e3   : > { %v7385_v46 = vmax.f32 %v7353_v2, 0.0  ;;  %v9573_v48 = vpop.f32.mrb[6].mxu1 }
 0x5e4   : > { %7418 = vst.msk [vmem:[%s12058_s21 + $0x28] sm:$0xff] %vm3849_vm3, %v7386_v30  ;;  %v7356_v54 = vadd.f32 %v9573_v48, %v12050_v36  ;;  %v7181_v56 = vpop.f32.mrb[7].mxu1 }
 0x5e5   : > { %7417 = vst.msk [vmem:[%s12058_s21 + $0x20] sm:$0xff] %vm3849_vm3, %v7385_v46  ;;  %v7355_v11 = vadd.f32 %v12050_v36, %v7181_v56 }
 0x5e6   : > { %v7388_v12 = vmax.f32 %v7356_v54, 0.0 }
 0x5e7   : > { %v7387_v20 = vmax.f32 %v7355_v11, 0.0  ;;  %v9576_v23 = vpop.f32.mrb[8].mxu1 }
 0x5e8   : > { %7420 = vst.msk [vmem:[%s12058_s21 + $0x38] sm:$0xff] %vm3849_vm3, %v7388_v12  ;;  %v7358_v52 = vadd.f32 %v9576_v23, %v12050_v36  ;;  %v7191_v57 = vpop.f32.mrb[9].mxu1 }
 0x5e9   : > { %7419 = vst.msk [vmem:[%s12058_s21 + $0x30] sm:$0xff] %vm3849_vm3, %v7387_v20  ;;  %v7357_v22 = vadd.f32 %v12050_v36, %v7191_v57 }
 0x5ea   : > { %v7390_v58 = vmax.f32 %v7358_v52, 0.0 }
 0x5eb   : > { %v7389_v10 = vmax.f32 %v7357_v22, 0.0  ;;  %v9579_v9 = vpop.f32.mrb[10].mxu1 }
 0x5ec   : > { %7422 = vst.msk [vmem:[%s12058_s21 + $0x48] sm:$0xff] %vm3849_vm3, %v7390_v58  ;;  %v7360_v5 = vadd.f32 %v9579_v9, %v12050_v36  ;;  %v7201_v13 = vpop.f32.mrb[11].mxu1 }
 0x5ed   : > { %7421 = vst.msk [vmem:[%s12058_s21 + $0x40] sm:$0xff] %vm3849_vm3, %v7389_v10  ;;  %v7359_v15 = vadd.f32 %v12050_v36, %v7201_v13 }
 0x5ee   : > { %v7392_v17 = vmax.f32 %v7360_v5, 0.0 }
 0x5ef   : > { %v7391_v18 = vmax.f32 %v7359_v15, 0.0  ;;  %v9582_v19 = vpop.f32.mrb[12].mxu1 }
 0x5f0   : > { %7424 = vst.msk [vmem:[%s12058_s21 + $0x58] sm:$0xff] %vm3849_vm3, %v7392_v17  ;;  %v7362_v21 = vadd.f32 %v9582_v19, %v12050_v36  ;;  %v7211_v25 = vpop.f32.mrb[13].mxu1 }
 0x5f1   : > { %7423 = vst.msk [vmem:[%s12058_s21 + $0x50] sm:$0xff] %vm3849_vm3, %v7391_v18  ;;  %v7361_v26 = vadd.f32 %v12050_v36, %v7211_v25 }
 0x5f2   : > { %v7394_v27 = vmax.f32 %v7362_v21, 0.0 }
 0x5f3   : > { %v7393_v31 = vmax.f32 %v7361_v26, 0.0  ;;  %v9585_v32 = vpop.f32.mrb[14].mxu1 }
 0x5f4   : > { %7426 = vst.msk [vmem:[%s12058_s21 + $0x68] sm:$0xff] %vm3849_vm3, %v7394_v27  ;;  %v7364_v61 = vadd.f32 %v9585_v32, %v12050_v36  ;;  %v7221_v37 = vpop.f32.mrb[15].mxu1 }
 0x5f5   : > { %7425 = vst.msk [vmem:[%s12058_s21 + $0x60] sm:$0xff] %vm3849_vm3, %v7393_v31  ;;  %v7363_v38 = vadd.f32 %v12050_v36, %v7221_v37 }
 0x5f6   : > { %v7396_v39 = vmax.f32 %v7364_v61, 0.0 }
 0x5f7   : > { %v7395_v3 = vmax.f32 %v7363_v38, 0.0  ;;  %v9588_v0 = vpop.f32.mrb[16].mxu1 }
 0x5f8   : > { %7428 = vst.msk [vmem:[%s12058_s21 + $0x78] sm:$0xff] %vm3849_vm3, %v7396_v39  ;;  %v7366_v59 = vadd.f32 %v9588_v0, %v12050_v36  ;;  %v7231_v62 = vpop.f32.mrb[17].mxu1 }
 0x5f9   : > { %7427 = vst.msk [vmem:[%s12058_s21 + $0x70] sm:$0xff] %vm3849_vm3, %v7395_v3  ;;  %v7365_v4 = vadd.f32 %v12050_v36, %v7231_v62 }
 0x5fa   : > { %v7398_v41 = vmax.f32 %v7366_v59, 0.0 }
 0x5fb   : > { %v7397_v44 = vmax.f32 %v7365_v4, 0.0  ;;  %v9591_v47 = vpop.f32.mrb[18].mxu1 }
 0x5fc   : > { %7430 = vst.msk [vmem:[%s12058_s21 + $0x88] sm:$0xff] %vm3849_vm3, %v7398_v41  ;;  %v7368_v51 = vadd.f32 %v9591_v47, %v12050_v36  ;;  %v7241_v28 = vpop.f32.mrb[19].mxu1 }
 0x5fd   : > { %7429 = vst.msk [vmem:[%s12058_s21 + $0x80] sm:$0xff] %vm3849_vm3, %v7397_v44  ;;  %v7367_v40 = vadd.f32 %v12050_v36, %v7241_v28 }
 0x5fe   : > { %v7400_v6 = vmax.f32 %v7368_v51, 0.0 }
 0x5ff   : > { %v7399_v29 = vmax.f32 %v7367_v40, 0.0  ;;  %v9594_v33 = vpop.f32.mrb[20].mxu1 }
 0x600   : > { %7432 = vst.msk [vmem:[%s12058_s21 + $0x98] sm:$0xff] %vm3849_vm3, %v7400_v6  ;;  %v7370_v34 = vadd.f32 %v9594_v33, %v12050_v36  ;;  %v7251_v55 = vpop.f32.mrb[21].mxu1 }
 0x601   : > { %7431 = vst.msk [vmem:[%s12058_s21 + $0x90] sm:$0xff] %vm3849_vm3, %v7399_v29  ;;  %v7369_v45 = vadd.f32 %v12050_v36, %v7251_v55 }
 0x602   : > { %v7402_v50 = vmax.f32 %v7370_v34, 0.0 }
 0x603   : > { %v7401_v49 = vmax.f32 %v7369_v45, 0.0  ;;  %v9597_v53 = vpop.f32.mrb[22].mxu1 }
 0x604   : > { %7434 = vst.msk [vmem:[%s12058_s21 + $0xa8] sm:$0xff] %vm3849_vm3, %v7402_v50  ;;  %v7372_v63 = vadd.f32 %v9597_v53, %v12050_v36  ;;  %v7261_v7 = vpop.f32.mrb[23].mxu1 }
 0x605   : > { %7433 = vst.msk [vmem:[%s12058_s21 + $0xa0] sm:$0xff] %vm3849_vm3, %v7401_v49  ;;  %v7371_v43 = vadd.f32 %v12050_v36, %v7261_v7 }
 0x606   : > { %v7404_v35 = vmax.f32 %v7372_v63, 0.0 }
 0x607   : > { %v7403_v8 = vmax.f32 %v7371_v43, 0.0  ;;  %v9600_v14 = vpop.f32.mrb[24].mxu1 }
 0x608   : > { %7436 = vst.msk [vmem:[%s12058_s21 + $0xb8] sm:$0xff] %vm3849_vm3, %v7404_v35  ;;  %v7374_v16 = vadd.f32 %v9600_v14, %v12050_v36  ;;  %v7271_v24 = vpop.f32.mrb[25].mxu1 }
 0x609   : > { %7435 = vst.msk [vmem:[%s12058_s21 + $0xb0] sm:$0xff] %vm3849_vm3, %v7403_v8  ;;  %v7373_v60 = vadd.f32 %v12050_v36, %v7271_v24 }
 0x60a   : > { %v7406_v42 = vmax.f32 %v7374_v16, 0.0 }
 0x60b   : > { %v7405_v1 = vmax.f32 %v7373_v60, 0.0  ;;  %v9603_v2 = vpop.f32.mrb[26].mxu1 }
 0x60c   : > { %7438 = vst.msk [vmem:[%s12058_s21 + $0xc8] sm:$0xff] %vm3849_vm3, %v7406_v42  ;;  %v7376_v30 = vadd.f32 %v9603_v2, %v12050_v36  ;;  %v7281_v46 = vpop.f32.mrb[27].mxu1 }
 0x60d   : > { %7437 = vst.msk [vmem:[%s12058_s21 + $0xc0] sm:$0xff] %vm3849_vm3, %v7405_v1  ;;  %v7375_v48 = vadd.f32 %v12050_v36, %v7281_v46 }
 0x60e   : > { %v7408_v54 = vmax.f32 %v7376_v30, 0.0 }
 0x60f   : > { %v7407_v56 = vmax.f32 %v7375_v48, 0.0  ;;  %v9606_v11 = vpop.f32.mrb[28].mxu1 }
 0x610   : > { %7440 = vst.msk [vmem:[%s12058_s21 + $0xd8] sm:$0xff] %vm3849_vm3, %v7408_v54  ;;  %v7378_v12 = vadd.f32 %v9606_v11, %v12050_v36  ;;  %v7291_v20 = vpop.f32.mrb[29].mxu1 }
 0x611   : > { %7439 = vst.msk [vmem:[%s12058_s21 + $0xd0] sm:$0xff] %vm3849_vm3, %v7407_v56  ;;  %v7377_v23 = vadd.f32 %v12050_v36, %v7291_v20 }
 0x612   : > { %v7410_v52 = vmax.f32 %v7378_v12, 0.0 }
 0x613   : > { %v7409_v57 = vmax.f32 %v7377_v23, 0.0  ;;  %v9609_v22 = vpop.f32.mrb[30].mxu1 }
 0x614   : > { %7442 = vst.msk [vmem:[%s12058_s21 + $0xe8] sm:$0xff] %vm3849_vm3, %v7410_v52  ;;  %v7380_v58 = vadd.f32 %v9609_v22, %v12050_v36  ;;  %v7301_v10 = vpop.f32.mrb[31].mxu1 }
 0x615   : > { %7441 = vst.msk [vmem:[%s12058_s21 + $0xe0] sm:$0xff] %vm3849_vm3, %v7409_v57  ;;  %v7379_v9 = vadd.f32 %v12050_v36, %v7301_v10 }
 0x616   : > { %v7412_v5 = vmax.f32 %v7380_v58, 0.0 }
 0x617   : > { %v7411_v13 = vmax.f32 %v7379_v9, 0.0 }
 0x618   : > { %7444 = vst.msk [vmem:[%s12058_s21 + $0xf8] sm:$0xff] %vm3849_vm3, %v7412_v5 }
 0x619   : > { %7443 = vst.msk [vmem:[%s12058_s21 + $0xf0] sm:$0xff] %vm3849_vm3, %v7411_v13 }
 0x61a PF: > { %s15_s18 = sadd.s32 1, %s10137_s18  }
 0x61b   : > { %p12_p4 = scmp.ge.s32.totalorder %s15_s18, 4  }
 0x61d   :  { %14 = sbr.rel (!%p12_p4) target bundleno = 1 (0x1), region = 92 }

</bundles_post_ra>
